<compile_context>
chip_gen: v7x
topology: tpu7x:2x2x1
jax: 0.10.0
libtpu: 0.0.40
codegen_flags: <defaults>
</compile_context>

<pallas_src>
import functools

import jax
import jax.numpy as jnp
from jax.experimental import pallas as pl
from jax.experimental.pallas import tpu as pltpu


_VMEM_LIMIT = 32 * 1024 * 1024   # fits v7x's 64 MiB/core budget; fine on v5e/v6e
_BN_EPS = 1e-5


# ----------------------------------------------------------------------------- utils
def _round_up(x, m):
    return (x + m - 1) // m * m


def _pick_tile(m, cap):
    """Row-tile size: multiple of 8, <= cap, and >= 2 grid steps when m allows
    (keeps both v7x TensorCores busy; one extra ~0.35us step on v5e/v6e)."""
    t = min(cap, _round_up(m, 8))
    if m > 8 and _round_up(m, t) // t < 2:
        t = _round_up((m + 1) // 2, 8)
    return t


# --------------------------------------------- Pallas matmul + fused BN partial sums
def _conv_matmul_stats_kernel(a_ref, b_ref, y_ref, sum_ref, ssq_ref):
    """One M-tile of  Y = A @ B  plus 8-row per-channel partial sum / sum-of-squares."""
    acc = jnp.dot(a_ref[...], b_ref[...], preferred_element_type=jnp.float32)
    y_ref[...] = acc.astype(y_ref.dtype)            # bf16 intermediate (stats use f32 acc)

    # 8-row sublane partials; the final cross-row reduction happens outside.
    sq = acc * acc
    s = acc[0:8, :]
    q = sq[0:8, :]
    for r in range(8, acc.shape[0], 8):             # static, unrolled at trace time
        s = s + acc[r:r + 8, :]
        q = q + sq[r:r + 8, :]
    sum_ref[...] = s
    ssq_ref[...] = q


def pallas_conv_matmul(a, b):
    """a: (M, Kp) bf16 patches, b: (Kp, Cp) bf16 weights ->
    (y bf16 (M, Cp), tile_sums f32, tile_sqs f32)."""
    M, K = a.shape
    K2, Cp = b.shape
    assert K == K2 and K % 8 == 0 and Cp % 128 == 0

    TM = _pick_tile(M, 256)
    M_pad = _round_up(M, TM)
    if M_pad != M:                                   # zero rows: harmless for BN stats
        a = jnp.pad(a, ((0, M_pad - M), (0, 0)))
    ntiles = M_pad // TM

    y, tsum, tssq = pl.pallas_call(
        _conv_matmul_stats_kernel,
        out_shape=(
            jax.ShapeDtypeStruct((M_pad, Cp), jnp.bfloat16),
            jax.ShapeDtypeStruct((ntiles * 8, Cp), jnp.float32),
            jax.ShapeDtypeStruct((ntiles * 8, Cp), jnp.float32),
        ),
        grid=(ntiles,),
        in_specs=[
            pl.BlockSpec((TM, K), lambda i: (i, 0)),
            pl.BlockSpec((K, Cp), lambda i: (0, 0)),
        ],
        out_specs=(
            pl.BlockSpec((TM, Cp), lambda i: (i, 0)),
            pl.BlockSpec((8, Cp), lambda i: (i, 0)),
            pl.BlockSpec((8, Cp), lambda i: (i, 0)),
        ),
        compiler_params=pltpu.CompilerParams(
            dimension_semantics=("parallel",),
            vmem_limit_bytes=_VMEM_LIMIT,
        ),
        cost_estimate=pl.CostEstimate(
            flops=2 * M_pad * K * Cp,
            transcendentals=0,
            bytes_accessed=M_pad * K * 2 + K * Cp * 2 + M_pad * Cp * 2,
        ),
    )(a, b)
    if M_pad != M:
        y = y[:M]
    return y, tsum, tssq


# -------------------------------------------- Pallas fused affine + activation pass
def _apply_act(y, act):
    if act == "relu":
        return jnp.maximum(y, 0.0)
    if act == "tanh":
        return jnp.tanh(y)
    return y


def _affine_act_kernel(x_ref, s_ref, h_ref, o_ref, *, act):
    y = x_ref[...].astype(jnp.float32) * s_ref[...] + h_ref[...]
    o_ref[...] = _apply_act(y, act).astype(o_ref.dtype)


def _affine_act_res_kernel(x_ref, s_ref, h_ref, r_ref, o_ref, *, act):
    y = (x_ref[...].astype(jnp.float32) * s_ref[...] + h_ref[...]
         + r_ref[...].astype(jnp.float32))
    o_ref[...] = _apply_act(y, act).astype(o_ref.dtype)


def pallas_affine_act(x, scale, shift, res=None, act="none", out_dtype=jnp.bfloat16):
    """y = act(x * scale + shift [+ res]); scale/shift broadcast over rows.

    x: (R, Cp) bf16 with Cp a multiple of 128 (lane-dense Pallas output layout)."""
    R, Cp = x.shape
    assert Cp % 128 == 0
    TR = _pick_tile(R, 512)
    R_pad = _round_up(R, TR)
    if R_pad != R:
        x = jnp.pad(x, ((0, R_pad - R), (0, 0)))
        if res is not None:
            res = jnp.pad(res, ((0, R_pad - R), (0, 0)))
    ntiles = R_pad // TR

    s2 = scale.reshape(1, Cp).astype(jnp.float32)
    h2 = shift.reshape(1, Cp).astype(jnp.float32)

    in_specs = [
        pl.BlockSpec((TR, Cp), lambda i: (i, 0)),
        pl.BlockSpec((1, Cp), lambda i: (0, 0)),
        pl.BlockSpec((1, Cp), lambda i: (0, 0)),
    ]
    args = [x, s2, h2]
    if res is None:
        kernel = functools.partial(_affine_act_kernel, act=act)
    else:
        kernel = functools.partial(_affine_act_res_kernel, act=act)
        in_specs.append(pl.BlockSpec((TR, Cp), lambda i: (i, 0)))
        args.append(res)

    out = pl.pallas_call(
        kernel,
        out_shape=jax.ShapeDtypeStruct((R_pad, Cp), out_dtype),
        grid=(ntiles,),
        in_specs=in_specs,
        out_specs=pl.BlockSpec((TR, Cp), lambda i: (i, 0)),
        compiler_params=pltpu.CompilerParams(
            dimension_semantics=("parallel",),
            vmem_limit_bytes=_VMEM_LIMIT,
        ),
    )(*args)
    if R_pad != R:
        out = out[:R]
    return out


# ----------------------------------------------------------------- conv via im2col
def _extract_patches(x, kh, kw, stride, k_pad):
    """x: NHWC with REAL channels -> (N*Ho*Wo, k_pad); tap-major, channel-minor order,
    total K zero-padded once to the weight matrix's row count."""
    N, H, W, C = x.shape
    Ho = (H - kh) // stride + 1
    Wo = (W - kw) // stride + 1
    cols = []
    for i in range(kh):
        for j in range(kw):
            cols.append(
                x[:, i: i + (Ho - 1) * stride + 1: stride,
                     j: j + (Wo - 1) * stride + 1: stride, :]
            )
    patches = jnp.concatenate(cols, axis=-1).reshape(N * Ho * Wo, kh * kw * C)
    if k_pad > kh * kw * C:
        patches = jnp.pad(patches, ((0, 0), (0, k_pad - kh * kw * C)))
    return patches, (N, Ho, Wo)


def conv2d_core(x, w_mat, kh, kw, c_in, stride=1, zero_pad=0, reflect_pad=0):
    """x: (N,H,W,C>=c_in) bf16; w_mat: (Kp, Cp_out) bf16 (tap-major real channels)."""
    x = x[..., :c_in]
    if reflect_pad:
        x = jnp.pad(x, ((0, 0), (reflect_pad,) * 2, (reflect_pad,) * 2, (0, 0)),
                    mode="reflect")
    if zero_pad:
        x = jnp.pad(x, ((0, 0), (zero_pad,) * 2, (zero_pad,) * 2, (0, 0)))
    patches, (N, Ho, Wo) = _extract_patches(x, kh, kw, stride, k_pad=w_mat.shape[0])
    y, tsum, tssq = pallas_conv_matmul(patches, w_mat)
    return y, tsum, tssq, (N, Ho, Wo)


def bn_affine_act(y, tsum, tssq, m_rows, gamma_p, beta_p, act="relu", res=None,
                  out_dtype=jnp.bfloat16):
    """Training-mode BatchNorm2d from fused partial sums + residual + activation."""
    s = jnp.sum(tsum, axis=0)
    sq = jnp.sum(tssq, axis=0)
    mean = s / m_rows
    var = jnp.maximum(sq / m_rows - mean * mean, 0.0)   # biased var (training BN)
    scale = gamma_p * jax.lax.rsqrt(var + _BN_EPS)
    shift = beta_p - mean * scale
    return pallas_affine_act(y, scale, shift, res=res, act=act, out_dtype=out_dtype)


def conv_transpose_bn_relu(x, w_mat, c_in, c_out, gamma, beta):
    """ConvTranspose2d(k=3, s=2, p=1, op=1) + BN + ReLU via sub-pixel decomposition:
    2x2-tap conv producing 4*c_out phase channels, then depth-to-space scatter."""
    x = x[..., :c_in]
    N, H, W, _ = x.shape
    xp = jnp.pad(x, ((0, 0), (0, 1), (0, 1), (0, 0)))          # one zero row/col, high side
    patches, _ = _extract_patches(xp, 2, 2, 1, k_pad=w_mat.shape[0])
    y, tsum, tssq = pallas_conv_matmul(patches, w_mat)          # (N*H*W, 128)

    # BN statistics per REAL output channel: sum over the 4 phase groups.
    m_rows = 4 * N * H * W                                      # = N * (2H) * (2W)
    s = jnp.sum(tsum, axis=0)[: 4 * c_out].reshape(4, c_out).sum(axis=0)
    q = jnp.sum(tssq, axis=0)[: 4 * c_out].reshape(4, c_out).sum(axis=0)
    mean = s / m_rows
    var = jnp.maximum(q / m_rows - mean * mean, 0.0)
    scale = gamma * jax.lax.rsqrt(var + _BN_EPS)
    shift = beta - mean * scale

    cp = w_mat.shape[1]
    scale_p = jnp.pad(jnp.tile(scale, 4), (0, cp - 4 * c_out))  # phase-major replication
    shift_p = jnp.pad(jnp.tile(shift, 4), (0, cp - 4 * c_out))
    a = pallas_affine_act(y, scale_p, shift_p, act="relu")

    # depth-to-space: (N,H,W, [4 phases x c_out]) -> (N, 2H, 2W, c_out)
    a = a.reshape(N, H, W, cp)[..., : 4 * c_out].reshape(N, H, W, 2, 2, c_out)
    a = jnp.transpose(a, (0, 1, 3, 2, 4, 5)).reshape(N, 2 * H, 2 * W, c_out)
    return a


# --------------------------------------------------------------- parameter handling
def init_params(key, input_nc=3, output_nc=3, ngf=8, n_blocks=2):
    """Raw parameters in PyTorch layouts (Conv2d: (Co,Ci,k,k); ConvT: (Ci,Co,k,k))."""
    params = {}

    def nxt():
        nonlocal key
        key, sub = jax.random.split(key)
        return sub

    def conv_w(co, ci, k):
        return 0.1 * jax.random.normal(nxt(), (co, ci, k, k), jnp.float32)

    def bn(name, c):
        params[name + "_g"] = 1.0 + 0.05 * jax.random.normal(nxt(), (c,), jnp.float32)
        params[name + "_b"] = 0.05 * jax.random.normal(nxt(), (c,), jnp.float32)

    params["conv0_w"] = conv_w(ngf, input_nc, 7)
    bn("bn0", ngf)
    for i in range(2):
        mult = 2 ** i
        params[f"down{i}_w"] = conv_w(ngf * mult * 2, ngf * mult, 3)
        bn(f"down{i}", ngf * mult * 2)
    dim = ngf * 4
    for b in range(n_blocks):
        params[f"res{b}_w1"] = conv_w(dim, dim, 3)
        bn(f"res{b}_1", dim)
        params[f"res{b}_w2"] = conv_w(dim, dim, 3)
        bn(f"res{b}_2", dim)
    for i in range(2):
        mult = 2 ** (2 - i)
        params[f"up{i}_w"] = 0.1 * jax.random.normal(
            nxt(), (ngf * mult, ngf * mult // 2, 3, 3), jnp.float32)
        bn(f"up{i}", ngf * mult // 2)
    params["out_w"] = conv_w(output_nc, ngf, 7)
    params["out_b"] = 0.05 * jax.random.normal(nxt(), (output_nc,), jnp.float32)
    return params


def _prep_conv_weight(w):
    """(Co, Ci, kh, kw) Conv2d weight -> (round_up(kh*kw*Ci,128), round_up(Co,128)) bf16.

    Tap-major, channel-minor rows with REAL input channels; total K padded once."""
    c_out, c_in, kh, kw = w.shape
    k_real = kh * kw * c_in
    kp, cpo = _round_up(k_real, 128), _round_up(c_out, 128)
    wm = jnp.transpose(w, (2, 3, 1, 0)).reshape(k_real, c_out)   # (kh,kw,ci) x co
    wm = jnp.pad(wm, ((0, kp - k_real), (0, cpo - c_out)))
    return wm.astype(jnp.bfloat16)


def _prep_convT_weight(w):
    """(Ci, Co, 3, 3) ConvTranspose2d (s=2, p=1, op=1) -> sub-pixel 2x2-conv matrix of
    shape (round_up(4*Ci,128), round_up(4*Co,128)); output lanes are phase-major."""
    ci, co, kh, kw = w.shape
    assert (kh, kw) == (3, 3)
    w_eq = jnp.zeros((2, 2, ci, 4, co), w.dtype)
    # phase 0: output (even, even)  = x[i,j]   * W[1,1]
    w_eq = w_eq.at[0, 0, :, 0, :].set(w[:, :, 1, 1])
    # phase 1: output (even, odd)   = x[i,j]*W[1,2] + x[i,j+1]*W[1,0]
    w_eq = w_eq.at[0, 0, :, 1, :].set(w[:, :, 1, 2])
    w_eq = w_eq.at[0, 1, :, 1, :].set(w[:, :, 1, 0])
    # phase 2: output (odd, even)   = x[i,j]*W[2,1] + x[i+1,j]*W[0,1]
    w_eq = w_eq.at[0, 0, :, 2, :].set(w[:, :, 2, 1])
    w_eq = w_eq.at[1, 0, :, 2, :].set(w[:, :, 0, 1])
    # phase 3: output (odd, odd)
    w_eq = w_eq.at[0, 0, :, 3, :].set(w[:, :, 2, 2])
    w_eq = w_eq.at[0, 1, :, 3, :].set(w[:, :, 2, 0])
    w_eq = w_eq.at[1, 0, :, 3, :].set(w[:, :, 0, 2])
    w_eq = w_eq.at[1, 1, :, 3, :].set(w[:, :, 0, 0])
    k_real, c_real = 4 * ci, 4 * co
    kp, cpo = _round_up(k_real, 128), _round_up(c_real, 128)
    wm = w_eq.reshape(k_real, c_real)
    wm = jnp.pad(wm, ((0, kp - k_real), (0, cpo - c_real)))
    return wm.astype(jnp.bfloat16)


def _prep_vec(v):
    c = v.shape[0]
    return jnp.pad(v, (0, _round_up(c, 128) - c)).astype(jnp.float32)


def prepare_params(params, n_blocks=2):
    """One-time conversion into K-compact bf16 matmul matrices + padded BN vectors."""
    prep = {
        "conv0_w": _prep_conv_weight(params["conv0_w"]),
        "bn0_g": _prep_vec(params["bn0_g"]),
        "bn0_b": _prep_vec(params["bn0_b"]),
        "out_w": _prep_conv_weight(params["out_w"]),
        "out_b": _prep_vec(params["out_b"]),
    }
    for i in range(2):
        prep[f"down{i}_w"] = _prep_conv_weight(params[f"down{i}_w"])
        prep[f"down{i}_g"] = _prep_vec(params[f"down{i}_g"])
        prep[f"down{i}_b"] = _prep_vec(params[f"down{i}_b"])
    for b in range(n_blocks):
        prep[f"res{b}_w1"] = _prep_conv_weight(params[f"res{b}_w1"])
        prep[f"res{b}_1_g"] = _prep_vec(params[f"res{b}_1_g"])
        prep[f"res{b}_1_b"] = _prep_vec(params[f"res{b}_1_b"])
        prep[f"res{b}_w2"] = _prep_conv_weight(params[f"res{b}_w2"])
        prep[f"res{b}_2_g"] = _prep_vec(params[f"res{b}_2_g"])
        prep[f"res{b}_2_b"] = _prep_vec(params[f"res{b}_2_b"])
    for i in range(2):
        prep[f"up{i}_w"] = _prep_convT_weight(params[f"up{i}_w"])
        prep[f"up{i}_g"] = params[f"up{i}_g"].astype(jnp.float32)   # raw (c_out,)
        prep[f"up{i}_b"] = params[f"up{i}_b"].astype(jnp.float32)
    return prep


# ------------------------------------------------------------------- the generator
def resnet_generator_forward(prep, x_nchw, input_nc=3, output_nc=3, ngf=8, n_blocks=2):
    # NCHW -> NHWC bf16, real channels only (no lane padding on the A side).
    x = jnp.transpose(x_nchw, (0, 2, 3, 1)).astype(jnp.bfloat16)

    # stem: ReflectionPad(3) + Conv(input_nc -> ngf, 7) + BN + ReLU   (no bias: BN)
    y, ts, tq, (N, H, W) = conv2d_core(x, prep["conv0_w"], 7, 7, c_in=input_nc,
                                       reflect_pad=3)
    a = bn_affine_act(y, ts, tq, N * H * W, prep["bn0_g"], prep["bn0_b"], act="relu")
    cp = prep["conv0_w"].shape[1]
    x = a.reshape(N, H, W, cp)
    c_real = ngf

    # downsampling x2
    for i in range(2):
        w = prep[f"down{i}_w"]
        y, ts, tq, (N, H, W) = conv2d_core(x, w, 3, 3, c_in=c_real, stride=2, zero_pad=1)
        a = bn_affine_act(y, ts, tq, N * H * W,
                          prep[f"down{i}_g"], prep[f"down{i}_b"], act="relu")
        cp = w.shape[1]
        x = a.reshape(N, H, W, cp)
        c_real *= 2

    # resnet blocks (padding_type='reflect', use_dropout=False)
    for b in range(n_blocks):
        y, ts, tq, _ = conv2d_core(x, prep[f"res{b}_w1"], 3, 3, c_in=c_real, reflect_pad=1)
        a = bn_affine_act(y, ts, tq, N * H * W,
                          prep[f"res{b}_1_g"], prep[f"res{b}_1_b"], act="relu")
        h = a.reshape(N, H, W, cp)
        y, ts, tq, _ = conv2d_core(h, prep[f"res{b}_w2"], 3, 3, c_in=c_real, reflect_pad=1)
        a = bn_affine_act(y, ts, tq, N * H * W,
                          prep[f"res{b}_2_g"], prep[f"res{b}_2_b"],
                          act="none", res=x.reshape(N * H * W, cp))
        x = a.reshape(N, H, W, cp)

    # upsampling x2 (ConvTranspose, stride 2, padding 1, output_padding 1) + BN + ReLU
    for i in range(2):
        c_out = c_real // 2
        x = conv_transpose_bn_relu(x, prep[f"up{i}_w"], c_in=c_real, c_out=c_out,
                                   gamma=prep[f"up{i}_g"], beta=prep[f"up{i}_b"])
        c_real = c_out
    N, H, W = x.shape[0], x.shape[1], x.shape[2]

    # output head: ReflectionPad(3) + Conv(ngf -> output_nc, 7) + bias + Tanh
    y, ts, tq, (N, H, W) = conv2d_core(x, prep["out_w"], 7, 7, c_in=c_real, reflect_pad=3)
    cp = prep["out_w"].shape[1]
    a = pallas_affine_act(y, jnp.ones((cp,), jnp.float32), prep["out_b"],
                          act="tanh", out_dtype=jnp.float32)
    out = a.reshape(N, H, W, cp)[..., :output_nc]   # un-pad lanes once, at the end

    # learn_residual defaults to False -> no residual/clamp
    return jnp.transpose(out, (0, 3, 1, 2))  # NHWC -> NCHW


if __name__ == "__main__":
    key = jax.random.PRNGKey(0)
    pkey, xkey = jax.random.split(key)

    INPUT_NC, OUTPUT_NC, NGF, N_BLOCKS = 3, 3, 8, 2
    params = init_params(pkey, input_nc=INPUT_NC, output_nc=OUTPUT_NC,
                         ngf=NGF, n_blocks=N_BLOCKS)
    prep = prepare_params(params, n_blocks=N_BLOCKS)

    x = jax.random.normal(xkey, (2, INPUT_NC, 16, 16), jnp.float32)  # NCHW like PyTorch

    fwd = jax.jit(functools.partial(resnet_generator_forward,
                                    input_nc=INPUT_NC, output_nc=OUTPUT_NC,
                                    ngf=NGF, n_blocks=N_BLOCKS))
    out = fwd(prep, x)
    jax.block_until_ready(out)
    assert out.shape == (2, OUTPUT_NC, 16, 16)
    assert bool(jnp.all(jnp.isfinite(out)))
    print("KERNEL_OK")
</pallas_src>

<mosaic_0001>
module attributes {stable_mosaic.version = 11 : i64} {
  func.func @_conv_matmul_stats_kernel(%arg0: i32, %arg1: memref<256x256xbf16, #tpu.memory_space<vmem>>, %arg2: memref<256x128xbf16, #tpu.memory_space<vmem>>, %arg3: memref<256x128xbf16, #tpu.memory_space<vmem>>, %arg4: memref<8x128xf32, #tpu.memory_space<vmem>>, %arg5: memref<8x128xf32, #tpu.memory_space<vmem>>) attributes {dimension_semantics = [#tpu.dimension_semantics<parallel>], iteration_bounds = array<i64: 2>, scalar_prefetch = 0 : i64, scratch_operands = 0 : i64, tpu.core_type = #tpu.core_type<tc>, window_params = [{transform_indices = @transform_0, window_bounds = array<i64: 256, 256>}, {pipeline_mode = #tpu.pipeline_mode<synchronous>, transform_indices = @transform_1, window_bounds = array<i64: 256, 128>}, {transform_indices = @transform_2, window_bounds = array<i64: 256, 128>}, {transform_indices = @transform_3, window_bounds = array<i64: 8, 128>}, {transform_indices = @transform_4, window_bounds = array<i64: 8, 128>}]} {
    %c0 = arith.constant 0 : index
    %c0_0 = arith.constant 0 : index
    %0 = vector.load %arg1[%c0, %c0_0] : memref<256x256xbf16, #tpu.memory_space<vmem>>, vector<256x256xbf16>
    %c0_1 = arith.constant 0 : index
    %c0_2 = arith.constant 0 : index
    %1 = vector.load %arg2[%c0_1, %c0_2] : memref<256x128xbf16, #tpu.memory_space<vmem>>, vector<256x128xbf16>
    %cst = arith.constant dense<0.000000e+00> : vector<256x128xf32>
    %2 = tpu.matmul %0, %1, %cst {dimension_numbers = #tpu.dot_dimension_numbers<[1], [0], [0], [1], [0, 0, 1, 1], [], []>} : vector<256x256xbf16>, vector<256x128xbf16>, vector<256x128xf32> -> vector<256x128xf32>
    %3 = arith.truncf %2 : vector<256x128xf32> to vector<256x128xbf16>
    %c0_3 = arith.constant 0 : index
    %c0_4 = arith.constant 0 : index
    %4 = vector.load %arg3[%c0_3, %c0_4] : memref<256x128xbf16, #tpu.memory_space<vmem>>, vector<256x128xbf16>
    tpu.vector_store %arg3[%c0_3, %c0_4], %3 {strides = array<i32>} : memref<256x128xbf16, #tpu.memory_space<vmem>>, vector<256x128xbf16>,
    %5 = arith.mulf %2, %2 : vector<256x128xf32>
    %6 = vector.extract_strided_slice %2 {offsets = [0, 0], sizes = [8, 128], strides = [1, 1]} : vector<256x128xf32> to vector<8x128xf32>
    %7 = vector.extract_strided_slice %5 {offsets = [0, 0], sizes = [8, 128], strides = [1, 1]} : vector<256x128xf32> to vector<8x128xf32>
    %8 = vector.extract_strided_slice %2 {offsets = [8, 0], sizes = [8, 128], strides = [1, 1]} : vector<256x128xf32> to vector<8x128xf32>
    %9 = arith.addf %6, %8 : vector<8x128xf32>
    %10 = vector.extract_strided_slice %5 {offsets = [8, 0], sizes = [8, 128], strides = [1, 1]} : vector<256x128xf32> to vector<8x128xf32>
    %11 = arith.addf %7, %10 : vector<8x128xf32>
    %12 = vector.extract_strided_slice %2 {offsets = [16, 0], sizes = [8, 128], strides = [1, 1]} : vector<256x128xf32> to vector<8x128xf32>
    %13 = arith.addf %9, %12 : vector<8x128xf32>
    %14 = vector.extract_strided_slice %5 {offsets = [16, 0], sizes = [8, 128], strides = [1, 1]} : vector<256x128xf32> to vector<8x128xf32>
    %15 = arith.addf %11, %14 : vector<8x128xf32>
    %16 = vector.extract_strided_slice %2 {offsets = [24, 0], sizes = [8, 128], strides = [1, 1]} : vector<256x128xf32> to vector<8x128xf32>
    %17 = arith.addf %13, %16 : vector<8x128xf32>
    %18 = vector.extract_strided_slice %5 {offsets = [24, 0], sizes = [8, 128], strides = [1, 1]} : vector<256x128xf32> to vector<8x128xf32>
    %19 = arith.addf %15, %18 : vector<8x128xf32>
    %20 = vector.extract_strided_slice %2 {offsets = [32, 0], sizes = [8, 128], strides = [1, 1]} : vector<256x128xf32> to vector<8x128xf32>
    %21 = arith.addf %17, %20 : vector<8x128xf32>
    %22 = vector.extract_strided_slice %5 {offsets = [32, 0], sizes = [8, 128], strides = [1, 1]} : vector<256x128xf32> to vector<8x128xf32>
    %23 = arith.addf %19, %22 : vector<8x128xf32>
    %24 = vector.extract_strided_slice %2 {offsets = [40, 0], sizes = [8, 128], strides = [1, 1]} : vector<256x128xf32> to vector<8x128xf32>
    %25 = arith.addf %21, %24 : vector<8x128xf32>
    %26 = vector.extract_strided_slice %5 {offsets = [40, 0], sizes = [8, 128], strides = [1, 1]} : vector<256x128xf32> to vector<8x128xf32>
    %27 = arith.addf %23, %26 : vector<8x128xf32>
    %28 = vector.extract_strided_slice %2 {offsets = [48, 0], sizes = [8, 128], strides = [1, 1]} : vector<256x128xf32> to vector<8x128xf32>
    %29 = arith.addf %25, %28 : vector<8x128xf32>
    %30 = vector.extract_strided_slice %5 {offsets = [48, 0], sizes = [8, 128], strides = [1, 1]} : vector<256x128xf32> to vector<8x128xf32>
    %31 = arith.addf %27, %30 : vector<8x128xf32>
    %32 = vector.extract_strided_slice %2 {offsets = [56, 0], sizes = [8, 128], strides = [1, 1]} : vector<256x128xf32> to vector<8x128xf32>
    %33 = arith.addf %29, %32 : vector<8x128xf32>
    %34 = vector.extract_strided_slice %5 {offsets = [56, 0], sizes = [8, 128], strides = [1, 1]} : vector<256x128xf32> to vector<8x128xf32>
    %35 = arith.addf %31, %34 : vector<8x128xf32>
    %36 = vector.extract_strided_slice %2 {offsets = [64, 0], sizes = [8, 128], strides = [1, 1]} : vector<256x128xf32> to vector<8x128xf32>
    %37 = arith.addf %33, %36 : vector<8x128xf32>
    %38 = vector.extract_strided_slice %5 {offsets = [64, 0], sizes = [8, 128], strides = [1, 1]} : vector<256x128xf32> to vector<8x128xf32>
    %39 = arith.addf %35, %38 : vector<8x128xf32>
    %40 = vector.extract_strided_slice %2 {offsets = [72, 0], sizes = [8, 128], strides = [1, 1]} : vector<256x128xf32> to vector<8x128xf32>
    %41 = arith.addf %37, %40 : vector<8x128xf32>
    %42 = vector.extract_strided_slice %5 {offsets = [72, 0], sizes = [8, 128], strides = [1, 1]} : vector<256x128xf32> to vector<8x128xf32>
    %43 = arith.addf %39, %42 : vector<8x128xf32>
    %44 = vector.extract_strided_slice %2 {offsets = [80, 0], sizes = [8, 128], strides = [1, 1]} : vector<256x128xf32> to vector<8x128xf32>
    %45 = arith.addf %41, %44 : vector<8x128xf32>
    %46 = vector.extract_strided_slice %5 {offsets = [80, 0], sizes = [8, 128], strides = [1, 1]} : vector<256x128xf32> to vector<8x128xf32>
    %47 = arith.addf %43, %46 : vector<8x128xf32>
    %48 = vector.extract_strided_slice %2 {offsets = [88, 0], sizes = [8, 128], strides = [1, 1]} : vector<256x128xf32> to vector<8x128xf32>
    %49 = arith.addf %45, %48 : vector<8x128xf32>
    %50 = vector.extract_strided_slice %5 {offsets = [88, 0], sizes = [8, 128], strides = [1, 1]} : vector<256x128xf32> to vector<8x128xf32>
    %51 = arith.addf %47, %50 : vector<8x128xf32>
    %52 = vector.extract_strided_slice %2 {offsets = [96, 0], sizes = [8, 128], strides = [1, 1]} : vector<256x128xf32> to vector<8x128xf32>
    %53 = arith.addf %49, %52 : vector<8x128xf32>
    %54 = vector.extract_strided_slice %5 {offsets = [96, 0], sizes = [8, 128], strides = [1, 1]} : vector<256x128xf32> to vector<8x128xf32>
    %55 = arith.addf %51, %54 : vector<8x128xf32>
    %56 = vector.extract_strided_slice %2 {offsets = [104, 0], sizes = [8, 128], strides = [1, 1]} : vector<256x128xf32> to vector<8x128xf32>
    %57 = arith.addf %53, %56 : vector<8x128xf32>
    %58 = vector.extract_strided_slice %5 {offsets = [104, 0], sizes = [8, 128], strides = [1, 1]} : vector<256x128xf32> to vector<8x128xf32>
    %59 = arith.addf %55, %58 : vector<8x128xf32>
    %60 = vector.extract_strided_slice %2 {offsets = [112, 0], sizes = [8, 128], strides = [1, 1]} : vector<256x128xf32> to vector<8x128xf32>
    %61 = arith.addf %57, %60 : vector<8x128xf32>
    %62 = vector.extract_strided_slice %5 {offsets = [112, 0], sizes = [8, 128], strides = [1, 1]} : vector<256x128xf32> to vector<8x128xf32>
    %63 = arith.addf %59, %62 : vector<8x128xf32>
    %64 = vector.extract_strided_slice %2 {offsets = [120, 0], sizes = [8, 128], strides = [1, 1]} : vector<256x128xf32> to vector<8x128xf32>
    %65 = arith.addf %61, %64 : vector<8x128xf32>
    %66 = vector.extract_strided_slice %5 {offsets = [120, 0], sizes = [8, 128], strides = [1, 1]} : vector<256x128xf32> to vector<8x128xf32>
    %67 = arith.addf %63, %66 : vector<8x128xf32>
    %68 = vector.extract_strided_slice %2 {offsets = [128, 0], sizes = [8, 128], strides = [1, 1]} : vector<256x128xf32> to vector<8x128xf32>
    %69 = arith.addf %65, %68 : vector<8x128xf32>
    %70 = vector.extract_strided_slice %5 {offsets = [128, 0], sizes = [8, 128], strides = [1, 1]} : vector<256x128xf32> to vector<8x128xf32>
    %71 = arith.addf %67, %70 : vector<8x128xf32>
    %72 = vector.extract_strided_slice %2 {offsets = [136, 0], sizes = [8, 128], strides = [1, 1]} : vector<256x128xf32> to vector<8x128xf32>
    %73 = arith.addf %69, %72 : vector<8x128xf32>
    %74 = vector.extract_strided_slice %5 {offsets = [136, 0], sizes = [8, 128], strides = [1, 1]} : vector<256x128xf32> to vector<8x128xf32>
    %75 = arith.addf %71, %74 : vector<8x128xf32>
    %76 = vector.extract_strided_slice %2 {offsets = [144, 0], sizes = [8, 128], strides = [1, 1]} : vector<256x128xf32> to vector<8x128xf32>
    %77 = arith.addf %73, %76 : vector<8x128xf32>
    %78 = vector.extract_strided_slice %5 {offsets = [144, 0], sizes = [8, 128], strides = [1, 1]} : vector<256x128xf32> to vector<8x128xf32>
    %79 = arith.addf %75, %78 : vector<8x128xf32>
    %80 = vector.extract_strided_slice %2 {offsets = [152, 0], sizes = [8, 128], strides = [1, 1]} : vector<256x128xf32> to vector<8x128xf32>
    %81 = arith.addf %77, %80 : vector<8x128xf32>
    %82 = vector.extract_strided_slice %5 {offsets = [152, 0], sizes = [8, 128], strides = [1, 1]} : vector<256x128xf32> to vector<8x128xf32>
    %83 = arith.addf %79, %82 : vector<8x128xf32>
    %84 = vector.extract_strided_slice %2 {offsets = [160, 0], sizes = [8, 128], strides = [1, 1]} : vector<256x128xf32> to vector<8x128xf32>
    %85 = arith.addf %81, %84 : vector<8x128xf32>
    %86 = vector.extract_strided_slice %5 {offsets = [160, 0], sizes = [8, 128], strides = [1, 1]} : vector<256x128xf32> to vector<8x128xf32>
    %87 = arith.addf %83, %86 : vector<8x128xf32>
    %88 = vector.extract_strided_slice %2 {offsets = [168, 0], sizes = [8, 128], strides = [1, 1]} : vector<256x128xf32> to vector<8x128xf32>
    %89 = arith.addf %85, %88 : vector<8x128xf32>
    %90 = vector.extract_strided_slice %5 {offsets = [168, 0], sizes = [8, 128], strides = [1, 1]} : vector<256x128xf32> to vector<8x128xf32>
    %91 = arith.addf %87, %90 : vector<8x128xf32>
    %92 = vector.extract_strided_slice %2 {offsets = [176, 0], sizes = [8, 128], strides = [1, 1]} : vector<256x128xf32> to vector<8x128xf32>
    %93 = arith.addf %89, %92 : vector<8x128xf32>
    %94 = vector.extract_strided_slice %5 {offsets = [176, 0], sizes = [8, 128], strides = [1, 1]} : vector<256x128xf32> to vector<8x128xf32>
    %95 = arith.addf %91, %94 : vector<8x128xf32>
    %96 = vector.extract_strided_slice %2 {offsets = [184, 0], sizes = [8, 128], strides = [1, 1]} : vector<256x128xf32> to vector<8x128xf32>
    %97 = arith.addf %93, %96 : vector<8x128xf32>
    %98 = vector.extract_strided_slice %5 {offsets = [184, 0], sizes = [8, 128], strides = [1, 1]} : vector<256x128xf32> to vector<8x128xf32>
    %99 = arith.addf %95, %98 : vector<8x128xf32>
    %100 = vector.extract_strided_slice %2 {offsets = [192, 0], sizes = [8, 128], strides = [1, 1]} : vector<256x128xf32> to vector<8x128xf32>
    %101 = arith.addf %97, %100 : vector<8x128xf32>
    %102 = vector.extract_strided_slice %5 {offsets = [192, 0], sizes = [8, 128], strides = [1, 1]} : vector<256x128xf32> to vector<8x128xf32>
    %103 = arith.addf %99, %102 : vector<8x128xf32>
    %104 = vector.extract_strided_slice %2 {offsets = [200, 0], sizes = [8, 128], strides = [1, 1]} : vector<256x128xf32> to vector<8x128xf32>
    %105 = arith.addf %101, %104 : vector<8x128xf32>
    %106 = vector.extract_strided_slice %5 {offsets = [200, 0], sizes = [8, 128], strides = [1, 1]} : vector<256x128xf32> to vector<8x128xf32>
    %107 = arith.addf %103, %106 : vector<8x128xf32>
    %108 = vector.extract_strided_slice %2 {offsets = [208, 0], sizes = [8, 128], strides = [1, 1]} : vector<256x128xf32> to vector<8x128xf32>
    %109 = arith.addf %105, %108 : vector<8x128xf32>
    %110 = vector.extract_strided_slice %5 {offsets = [208, 0], sizes = [8, 128], strides = [1, 1]} : vector<256x128xf32> to vector<8x128xf32>
    %111 = arith.addf %107, %110 : vector<8x128xf32>
    %112 = vector.extract_strided_slice %2 {offsets = [216, 0], sizes = [8, 128], strides = [1, 1]} : vector<256x128xf32> to vector<8x128xf32>
    %113 = arith.addf %109, %112 : vector<8x128xf32>
    %114 = vector.extract_strided_slice %5 {offsets = [216, 0], sizes = [8, 128], strides = [1, 1]} : vector<256x128xf32> to vector<8x128xf32>
    %115 = arith.addf %111, %114 : vector<8x128xf32>
    %116 = vector.extract_strided_slice %2 {offsets = [224, 0], sizes = [8, 128], strides = [1, 1]} : vector<256x128xf32> to vector<8x128xf32>
    %117 = arith.addf %113, %116 : vector<8x128xf32>
    %118 = vector.extract_strided_slice %5 {offsets = [224, 0], sizes = [8, 128], strides = [1, 1]} : vector<256x128xf32> to vector<8x128xf32>
    %119 = arith.addf %115, %118 : vector<8x128xf32>
    %120 = vector.extract_strided_slice %2 {offsets = [232, 0], sizes = [8, 128], strides = [1, 1]} : vector<256x128xf32> to vector<8x128xf32>
    %121 = arith.addf %117, %120 : vector<8x128xf32>
    %122 = vector.extract_strided_slice %5 {offsets = [232, 0], sizes = [8, 128], strides = [1, 1]} : vector<256x128xf32> to vector<8x128xf32>
    %123 = arith.addf %119, %122 : vector<8x128xf32>
    %124 = vector.extract_strided_slice %2 {offsets = [240, 0], sizes = [8, 128], strides = [1, 1]} : vector<256x128xf32> to vector<8x128xf32>
    %125 = arith.addf %121, %124 : vector<8x128xf32>
    %126 = vector.extract_strided_slice %5 {offsets = [240, 0], sizes = [8, 128], strides = [1, 1]} : vector<256x128xf32> to vector<8x128xf32>
    %127 = arith.addf %123, %126 : vector<8x128xf32>
    %128 = vector.extract_strided_slice %2 {offsets = [248, 0], sizes = [8, 128], strides = [1, 1]} : vector<256x128xf32> to vector<8x128xf32>
    %129 = arith.addf %125, %128 : vector<8x128xf32>
    %130 = vector.extract_strided_slice %5 {offsets = [248, 0], sizes = [8, 128], strides = [1, 1]} : vector<256x128xf32> to vector<8x128xf32>
    %131 = arith.addf %127, %130 : vector<8x128xf32>
    %c0_5 = arith.constant 0 : index
    %c0_6 = arith.constant 0 : index
    %132 = vector.load %arg4[%c0_5, %c0_6] : memref<8x128xf32, #tpu.memory_space<vmem>>, vector<8x128xf32>
    tpu.vector_store %arg4[%c0_5, %c0_6], %129 {strides = array<i32>} : memref<8x128xf32, #tpu.memory_space<vmem>>, vector<8x128xf32>,
    %c0_7 = arith.constant 0 : index
    %c0_8 = arith.constant 0 : index
    %133 = vector.load %arg5[%c0_7, %c0_8] : memref<8x128xf32, #tpu.memory_space<vmem>>, vector<8x128xf32>
    tpu.vector_store %arg5[%c0_7, %c0_8], %131 {strides = array<i32>} : memref<8x128xf32, #tpu.memory_space<vmem>>, vector<8x128xf32>,
    return
  }
  func.func @transform_0(%arg0: i32) -> (i32, i32) {
    %c0_i32 = arith.constant 0 : i32
    %c0_i32_0 = arith.constant 0 : i32
    return %arg0, %c0_i32 : i32, i32
  }
  func.func @transform_1(%arg0: i32) -> (i32, i32) {
    %c0_i32 = arith.constant 0 : i32
    %c0_i32_0 = arith.constant 0 : i32
    %c0_i32_1 = arith.constant 0 : i32
    return %c0_i32, %c0_i32_0 : i32, i32
  }
  func.func @transform_2(%arg0: i32) -> (i32, i32) {
    %c0_i32 = arith.constant 0 : i32
    %c0_i32_0 = arith.constant 0 : i32
    return %arg0, %c0_i32 : i32, i32
  }
  func.func @transform_3(%arg0: i32) -> (i32, i32) {
    %c0_i32 = arith.constant 0 : i32
    %c0_i32_0 = arith.constant 0 : i32
    return %arg0, %c0_i32 : i32, i32
  }
  func.func @transform_4(%arg0: i32) -> (i32, i32) {
    %c0_i32 = arith.constant 0 : i32
    %c0_i32_0 = arith.constant 0 : i32
    return %arg0, %c0_i32 : i32, i32
  }
}

module attributes {stable_mosaic.version = 11 : i64} {
  func.func @_affine_act_kernel(%arg0: i32, %arg1: memref<256x128xbf16, #tpu.memory_space<vmem>>, %arg2: memref<1x128xf32, #tpu.memory_space<vmem>>, %arg3: memref<1x128xf32, #tpu.memory_space<vmem>>, %arg4: memref<256x128xbf16, #tpu.memory_space<vmem>>) attributes {dimension_semantics = [#tpu.dimension_semantics<parallel>], iteration_bounds = array<i64: 2>, scalar_prefetch = 0 : i64, scratch_operands = 0 : i64, tpu.core_type = #tpu.core_type<tc>, window_params = [{transform_indices = @transform_0, window_bounds = array<i64: 256, 128>}, {pipeline_mode = #tpu.pipeline_mode<synchronous>, transform_indices = @transform_1, window_bounds = array<i64: 1, 128>}, {pipeline_mode = #tpu.pipeline_mode<synchronous>, transform_indices = @transform_2, window_bounds = array<i64: 1, 128>}, {transform_indices = @transform_3, window_bounds = array<i64: 256, 128>}]} {
    %c0 = arith.constant 0 : index
    %c0_0 = arith.constant 0 : index
    %0 = vector.load %arg1[%c0, %c0_0] : memref<256x128xbf16, #tpu.memory_space<vmem>>, vector<256x128xbf16>
    %1 = arith.extf %0 : vector<256x128xbf16> to vector<256x128xf32>
    %c0_1 = arith.constant 0 : index
    %c0_2 = arith.constant 0 : index
    %2 = vector.load %arg2[%c0_1, %c0_2] : memref<1x128xf32, #tpu.memory_space<vmem>>, vector<1x128xf32>
    %3 = vector.broadcast %2 : vector<1x128xf32> to vector<256x128xf32>
    %4 = arith.mulf %1, %3 : vector<256x128xf32>
    %c0_3 = arith.constant 0 : index
    %c0_4 = arith.constant 0 : index
    %5 = vector.load %arg3[%c0_3, %c0_4] : memref<1x128xf32, #tpu.memory_space<vmem>>, vector<1x128xf32>
    %6 = vector.broadcast %5 : vector<1x128xf32> to vector<256x128xf32>
    %7 = arith.addf %4, %6 : vector<256x128xf32>
    %cst = arith.constant 0.000000e+00 : f32
    %8 = vector.broadcast %cst : f32 to vector<256x128xf32>
    %9 = arith.maximumf %7, %8 : vector<256x128xf32>
    %10 = arith.truncf %9 : vector<256x128xf32> to vector<256x128xbf16>
    %c0_5 = arith.constant 0 : index
    %c0_6 = arith.constant 0 : index
    %11 = vector.load %arg4[%c0_5, %c0_6] : memref<256x128xbf16, #tpu.memory_space<vmem>>, vector<256x128xbf16>
    tpu.vector_store %arg4[%c0_5, %c0_6], %10 {strides = array<i32>} : memref<256x128xbf16, #tpu.memory_space<vmem>>, vector<256x128xbf16>,
    return
  }
  func.func @transform_0(%arg0: i32) -> (i32, i32) {
    %c0_i32 = arith.constant 0 : i32
    %c0_i32_0 = arith.constant 0 : i32
    return %arg0, %c0_i32 : i32, i32
  }
  func.func @transform_1(%arg0: i32) -> (i32, i32) {
    %c0_i32 = arith.constant 0 : i32
    %c0_i32_0 = arith.constant 0 : i32
    %c0_i32_1 = arith.constant 0 : i32
    return %c0_i32, %c0_i32_0 : i32, i32
  }
  func.func @transform_2(%arg0: i32) -> (i32, i32) {
    %c0_i32 = arith.constant 0 : i32
    %c0_i32_0 = arith.constant 0 : i32
    %c0_i32_1 = arith.constant 0 : i32
    return %c0_i32, %c0_i32_0 : i32, i32
  }
  func.func @transform_3(%arg0: i32) -> (i32, i32) {
    %c0_i32 = arith.constant 0 : i32
    %c0_i32_0 = arith.constant 0 : i32
    return %arg0, %c0_i32 : i32, i32
  }
}

module attributes {stable_mosaic.version = 11 : i64} {
  func.func @_conv_matmul_stats_kernel(%arg0: i32, %arg1: memref<64x128xbf16, #tpu.memory_space<vmem>>, %arg2: memref<128x128xbf16, #tpu.memory_space<vmem>>, %arg3: memref<64x128xbf16, #tpu.memory_space<vmem>>, %arg4: memref<8x128xf32, #tpu.memory_space<vmem>>, %arg5: memref<8x128xf32, #tpu.memory_space<vmem>>) attributes {dimension_semantics = [#tpu.dimension_semantics<parallel>], iteration_bounds = array<i64: 2>, scalar_prefetch = 0 : i64, scratch_operands = 0 : i64, tpu.core_type = #tpu.core_type<tc>, window_params = [{transform_indices = @transform_0, window_bounds = array<i64: 64, 128>}, {pipeline_mode = #tpu.pipeline_mode<synchronous>, transform_indices = @transform_1, window_bounds = array<i64: 128, 128>}, {transform_indices = @transform_2, window_bounds = array<i64: 64, 128>}, {transform_indices = @transform_3, window_bounds = array<i64: 8, 128>}, {transform_indices = @transform_4, window_bounds = array<i64: 8, 128>}]} {
    %c0 = arith.constant 0 : index
    %c0_0 = arith.constant 0 : index
    %0 = vector.load %arg1[%c0, %c0_0] : memref<64x128xbf16, #tpu.memory_space<vmem>>, vector<64x128xbf16>
    %c0_1 = arith.constant 0 : index
    %c0_2 = arith.constant 0 : index
    %1 = vector.load %arg2[%c0_1, %c0_2] : memref<128x128xbf16, #tpu.memory_space<vmem>>, vector<128x128xbf16>
    %cst = arith.constant dense<0.000000e+00> : vector<64x128xf32>
    %2 = tpu.matmul %0, %1, %cst {dimension_numbers = #tpu.dot_dimension_numbers<[1], [0], [0], [1], [0, 0, 1, 1], [], []>} : vector<64x128xbf16>, vector<128x128xbf16>, vector<64x128xf32> -> vector<64x128xf32>
    %3 = arith.truncf %2 : vector<64x128xf32> to vector<64x128xbf16>
    %c0_3 = arith.constant 0 : index
    %c0_4 = arith.constant 0 : index
    %4 = vector.load %arg3[%c0_3, %c0_4] : memref<64x128xbf16, #tpu.memory_space<vmem>>, vector<64x128xbf16>
    tpu.vector_store %arg3[%c0_3, %c0_4], %3 {strides = array<i32>} : memref<64x128xbf16, #tpu.memory_space<vmem>>, vector<64x128xbf16>,
    %5 = arith.mulf %2, %2 : vector<64x128xf32>
    %6 = vector.extract_strided_slice %2 {offsets = [0, 0], sizes = [8, 128], strides = [1, 1]} : vector<64x128xf32> to vector<8x128xf32>
    %7 = vector.extract_strided_slice %5 {offsets = [0, 0], sizes = [8, 128], strides = [1, 1]} : vector<64x128xf32> to vector<8x128xf32>
    %8 = vector.extract_strided_slice %2 {offsets = [8, 0], sizes = [8, 128], strides = [1, 1]} : vector<64x128xf32> to vector<8x128xf32>
    %9 = arith.addf %6, %8 : vector<8x128xf32>
    %10 = vector.extract_strided_slice %5 {offsets = [8, 0], sizes = [8, 128], strides = [1, 1]} : vector<64x128xf32> to vector<8x128xf32>
    %11 = arith.addf %7, %10 : vector<8x128xf32>
    %12 = vector.extract_strided_slice %2 {offsets = [16, 0], sizes = [8, 128], strides = [1, 1]} : vector<64x128xf32> to vector<8x128xf32>
    %13 = arith.addf %9, %12 : vector<8x128xf32>
    %14 = vector.extract_strided_slice %5 {offsets = [16, 0], sizes = [8, 128], strides = [1, 1]} : vector<64x128xf32> to vector<8x128xf32>
    %15 = arith.addf %11, %14 : vector<8x128xf32>
    %16 = vector.extract_strided_slice %2 {offsets = [24, 0], sizes = [8, 128], strides = [1, 1]} : vector<64x128xf32> to vector<8x128xf32>
    %17 = arith.addf %13, %16 : vector<8x128xf32>
    %18 = vector.extract_strided_slice %5 {offsets = [24, 0], sizes = [8, 128], strides = [1, 1]} : vector<64x128xf32> to vector<8x128xf32>
    %19 = arith.addf %15, %18 : vector<8x128xf32>
    %20 = vector.extract_strided_slice %2 {offsets = [32, 0], sizes = [8, 128], strides = [1, 1]} : vector<64x128xf32> to vector<8x128xf32>
    %21 = arith.addf %17, %20 : vector<8x128xf32>
    %22 = vector.extract_strided_slice %5 {offsets = [32, 0], sizes = [8, 128], strides = [1, 1]} : vector<64x128xf32> to vector<8x128xf32>
    %23 = arith.addf %19, %22 : vector<8x128xf32>
    %24 = vector.extract_strided_slice %2 {offsets = [40, 0], sizes = [8, 128], strides = [1, 1]} : vector<64x128xf32> to vector<8x128xf32>
    %25 = arith.addf %21, %24 : vector<8x128xf32>
    %26 = vector.extract_strided_slice %5 {offsets = [40, 0], sizes = [8, 128], strides = [1, 1]} : vector<64x128xf32> to vector<8x128xf32>
    %27 = arith.addf %23, %26 : vector<8x128xf32>
    %28 = vector.extract_strided_slice %2 {offsets = [48, 0], sizes = [8, 128], strides = [1, 1]} : vector<64x128xf32> to vector<8x128xf32>
    %29 = arith.addf %25, %28 : vector<8x128xf32>
    %30 = vector.extract_strided_slice %5 {offsets = [48, 0], sizes = [8, 128], strides = [1, 1]} : vector<64x128xf32> to vector<8x128xf32>
    %31 = arith.addf %27, %30 : vector<8x128xf32>
    %32 = vector.extract_strided_slice %2 {offsets = [56, 0], sizes = [8, 128], strides = [1, 1]} : vector<64x128xf32> to vector<8x128xf32>
    %33 = arith.addf %29, %32 : vector<8x128xf32>
    %34 = vector.extract_strided_slice %5 {offsets = [56, 0], sizes = [8, 128], strides = [1, 1]} : vector<64x128xf32> to vector<8x128xf32>
    %35 = arith.addf %31, %34 : vector<8x128xf32>
    %c0_5 = arith.constant 0 : index
    %c0_6 = arith.constant 0 : index
    %36 = vector.load %arg4[%c0_5, %c0_6] : memref<8x128xf32, #tpu.memory_space<vmem>>, vector<8x128xf32>
    tpu.vector_store %arg4[%c0_5, %c0_6], %33 {strides = array<i32>} : memref<8x128xf32, #tpu.memory_space<vmem>>, vector<8x128xf32>,
    %c0_7 = arith.constant 0 : index
    %c0_8 = arith.constant 0 : index
    %37 = vector.load %arg5[%c0_7, %c0_8] : memref<8x128xf32, #tpu.memory_space<vmem>>, vector<8x128xf32>
    tpu.vector_store %arg5[%c0_7, %c0_8], %35 {strides = array<i32>} : memref<8x128xf32, #tpu.memory_space<vmem>>, vector<8x128xf32>,
    return
  }
  func.func @transform_0(%arg0: i32) -> (i32, i32) {
    %c0_i32 = arith.constant 0 : i32
    %c0_i32_0 = arith.constant 0 : i32
    return %arg0, %c0_i32 : i32, i32
  }
  func.func @transform_1(%arg0: i32) -> (i32, i32) {
    %c0_i32 = arith.constant 0 : i32
    %c0_i32_0 = arith.constant 0 : i32
    %c0_i32_1 = arith.constant 0 : i32
    return %c0_i32, %c0_i32_0 : i32, i32
  }
  func.func @transform_2(%arg0: i32) -> (i32, i32) {
    %c0_i32 = arith.constant 0 : i32
    %c0_i32_0 = arith.constant 0 : i32
    return %arg0, %c0_i32 : i32, i32
  }
  func.func @transform_3(%arg0: i32) -> (i32, i32) {
    %c0_i32 = arith.constant 0 : i32
    %c0_i32_0 = arith.constant 0 : i32
    return %arg0, %c0_i32 : i32, i32
  }
  func.func @transform_4(%arg0: i32) -> (i32, i32) {
    %c0_i32 = arith.constant 0 : i32
    %c0_i32_0 = arith.constant 0 : i32
    return %arg0, %c0_i32 : i32, i32
  }
}

module attributes {stable_mosaic.version = 11 : i64} {
  func.func @_affine_act_kernel(%arg0: i32, %arg1: memref<64x128xbf16, #tpu.memory_space<vmem>>, %arg2: memref<1x128xf32, #tpu.memory_space<vmem>>, %arg3: memref<1x128xf32, #tpu.memory_space<vmem>>, %arg4: memref<64x128xbf16, #tpu.memory_space<vmem>>) attributes {dimension_semantics = [#tpu.dimension_semantics<parallel>], iteration_bounds = array<i64: 2>, scalar_prefetch = 0 : i64, scratch_operands = 0 : i64, tpu.core_type = #tpu.core_type<tc>, window_params = [{transform_indices = @transform_0, window_bounds = array<i64: 64, 128>}, {pipeline_mode = #tpu.pipeline_mode<synchronous>, transform_indices = @transform_1, window_bounds = array<i64: 1, 128>}, {pipeline_mode = #tpu.pipeline_mode<synchronous>, transform_indices = @transform_2, window_bounds = array<i64: 1, 128>}, {transform_indices = @transform_3, window_bounds = array<i64: 64, 128>}]} {
    %c0 = arith.constant 0 : index
    %c0_0 = arith.constant 0 : index
    %0 = vector.load %arg1[%c0, %c0_0] : memref<64x128xbf16, #tpu.memory_space<vmem>>, vector<64x128xbf16>
    %1 = arith.extf %0 : vector<64x128xbf16> to vector<64x128xf32>
    %c0_1 = arith.constant 0 : index
    %c0_2 = arith.constant 0 : index
    %2 = vector.load %arg2[%c0_1, %c0_2] : memref<1x128xf32, #tpu.memory_space<vmem>>, vector<1x128xf32>
    %3 = vector.broadcast %2 : vector<1x128xf32> to vector<64x128xf32>
    %4 = arith.mulf %1, %3 : vector<64x128xf32>
    %c0_3 = arith.constant 0 : index
    %c0_4 = arith.constant 0 : index
    %5 = vector.load %arg3[%c0_3, %c0_4] : memref<1x128xf32, #tpu.memory_space<vmem>>, vector<1x128xf32>
    %6 = vector.broadcast %5 : vector<1x128xf32> to vector<64x128xf32>
    %7 = arith.addf %4, %6 : vector<64x128xf32>
    %cst = arith.constant 0.000000e+00 : f32
    %8 = vector.broadcast %cst : f32 to vector<64x128xf32>
    %9 = arith.maximumf %7, %8 : vector<64x128xf32>
    %10 = arith.truncf %9 : vector<64x128xf32> to vector<64x128xbf16>
    %c0_5 = arith.constant 0 : index
    %c0_6 = arith.constant 0 : index
    %11 = vector.load %arg4[%c0_5, %c0_6] : memref<64x128xbf16, #tpu.memory_space<vmem>>, vector<64x128xbf16>
    tpu.vector_store %arg4[%c0_5, %c0_6], %10 {strides = array<i32>} : memref<64x128xbf16, #tpu.memory_space<vmem>>, vector<64x128xbf16>,
    return
  }
  func.func @transform_0(%arg0: i32) -> (i32, i32) {
    %c0_i32 = arith.constant 0 : i32
    %c0_i32_0 = arith.constant 0 : i32
    return %arg0, %c0_i32 : i32, i32
  }
  func.func @transform_1(%arg0: i32) -> (i32, i32) {
    %c0_i32 = arith.constant 0 : i32
    %c0_i32_0 = arith.constant 0 : i32
    %c0_i32_1 = arith.constant 0 : i32
    return %c0_i32, %c0_i32_0 : i32, i32
  }
  func.func @transform_2(%arg0: i32) -> (i32, i32) {
    %c0_i32 = arith.constant 0 : i32
    %c0_i32_0 = arith.constant 0 : i32
    %c0_i32_1 = arith.constant 0 : i32
    return %c0_i32, %c0_i32_0 : i32, i32
  }
  func.func @transform_3(%arg0: i32) -> (i32, i32) {
    %c0_i32 = arith.constant 0 : i32
    %c0_i32_0 = arith.constant 0 : i32
    return %arg0, %c0_i32 : i32, i32
  }
}

module attributes {stable_mosaic.version = 11 : i64} {
  func.func @_conv_matmul_stats_kernel(%arg0: i32, %arg1: memref<16x256xbf16, #tpu.memory_space<vmem>>, %arg2: memref<256x128xbf16, #tpu.memory_space<vmem>>, %arg3: memref<16x128xbf16, #tpu.memory_space<vmem>>, %arg4: memref<8x128xf32, #tpu.memory_space<vmem>>, %arg5: memref<8x128xf32, #tpu.memory_space<vmem>>) attributes {dimension_semantics = [#tpu.dimension_semantics<parallel>], iteration_bounds = array<i64: 2>, scalar_prefetch = 0 : i64, scratch_operands = 0 : i64, tpu.core_type = #tpu.core_type<tc>, window_params = [{transform_indices = @transform_0, window_bounds = array<i64: 16, 256>}, {pipeline_mode = #tpu.pipeline_mode<synchronous>, transform_indices = @transform_1, window_bounds = array<i64: 256, 128>}, {transform_indices = @transform_2, window_bounds = array<i64: 16, 128>}, {transform_indices = @transform_3, window_bounds = array<i64: 8, 128>}, {transform_indices = @transform_4, window_bounds = array<i64: 8, 128>}]} {
    %c0 = arith.constant 0 : index
    %c0_0 = arith.constant 0 : index
    %0 = vector.load %arg1[%c0, %c0_0] : memref<16x256xbf16, #tpu.memory_space<vmem>>, vector<16x256xbf16>
    %c0_1 = arith.constant 0 : index
    %c0_2 = arith.constant 0 : index
    %1 = vector.load %arg2[%c0_1, %c0_2] : memref<256x128xbf16, #tpu.memory_space<vmem>>, vector<256x128xbf16>
    %cst = arith.constant dense<0.000000e+00> : vector<16x128xf32>
    %2 = tpu.matmul %0, %1, %cst {dimension_numbers = #tpu.dot_dimension_numbers<[1], [0], [0], [1], [0, 0, 1, 1], [], []>} : vector<16x256xbf16>, vector<256x128xbf16>, vector<16x128xf32> -> vector<16x128xf32>
    %3 = arith.truncf %2 : vector<16x128xf32> to vector<16x128xbf16>
    %c0_3 = arith.constant 0 : index
    %c0_4 = arith.constant 0 : index
    %4 = vector.load %arg3[%c0_3, %c0_4] : memref<16x128xbf16, #tpu.memory_space<vmem>>, vector<16x128xbf16>
    tpu.vector_store %arg3[%c0_3, %c0_4], %3 {strides = array<i32>} : memref<16x128xbf16, #tpu.memory_space<vmem>>, vector<16x128xbf16>,
    %5 = arith.mulf %2, %2 : vector<16x128xf32>
    %6 = vector.extract_strided_slice %2 {offsets = [0, 0], sizes = [8, 128], strides = [1, 1]} : vector<16x128xf32> to vector<8x128xf32>
    %7 = vector.extract_strided_slice %5 {offsets = [0, 0], sizes = [8, 128], strides = [1, 1]} : vector<16x128xf32> to vector<8x128xf32>
    %8 = vector.extract_strided_slice %2 {offsets = [8, 0], sizes = [8, 128], strides = [1, 1]} : vector<16x128xf32> to vector<8x128xf32>
    %9 = arith.addf %6, %8 : vector<8x128xf32>
    %10 = vector.extract_strided_slice %5 {offsets = [8, 0], sizes = [8, 128], strides = [1, 1]} : vector<16x128xf32> to vector<8x128xf32>
    %11 = arith.addf %7, %10 : vector<8x128xf32>
    %c0_5 = arith.constant 0 : index
    %c0_6 = arith.constant 0 : index
    %12 = vector.load %arg4[%c0_5, %c0_6] : memref<8x128xf32, #tpu.memory_space<vmem>>, vector<8x128xf32>
    tpu.vector_store %arg4[%c0_5, %c0_6], %9 {strides = array<i32>} : memref<8x128xf32, #tpu.memory_space<vmem>>, vector<8x128xf32>,
    %c0_7 = arith.constant 0 : index
    %c0_8 = arith.constant 0 : index
    %13 = vector.load %arg5[%c0_7, %c0_8] : memref<8x128xf32, #tpu.memory_space<vmem>>, vector<8x128xf32>
    tpu.vector_store %arg5[%c0_7, %c0_8], %11 {strides = array<i32>} : memref<8x128xf32, #tpu.memory_space<vmem>>, vector<8x128xf32>,
    return
  }
  func.func @transform_0(%arg0: i32) -> (i32, i32) {
    %c0_i32 = arith.constant 0 : i32
    %c0_i32_0 = arith.constant 0 : i32
    return %arg0, %c0_i32 : i32, i32
  }
  func.func @transform_1(%arg0: i32) -> (i32, i32) {
    %c0_i32 = arith.constant 0 : i32
    %c0_i32_0 = arith.constant 0 : i32
    %c0_i32_1 = arith.constant 0 : i32
    return %c0_i32, %c0_i32_0 : i32, i32
  }
  func.func @transform_2(%arg0: i32) -> (i32, i32) {
    %c0_i32 = arith.constant 0 : i32
    %c0_i32_0 = arith.constant 0 : i32
    return %arg0, %c0_i32 : i32, i32
  }
  func.func @transform_3(%arg0: i32) -> (i32, i32) {
    %c0_i32 = arith.constant 0 : i32
    %c0_i32_0 = arith.constant 0 : i32
    return %arg0, %c0_i32 : i32, i32
  }
  func.func @transform_4(%arg0: i32) -> (i32, i32) {
    %c0_i32 = arith.constant 0 : i32
    %c0_i32_0 = arith.constant 0 : i32
    return %arg0, %c0_i32 : i32, i32
  }
}

module attributes {stable_mosaic.version = 11 : i64} {
  func.func @_affine_act_kernel(%arg0: i32, %arg1: memref<16x128xbf16, #tpu.memory_space<vmem>>, %arg2: memref<1x128xf32, #tpu.memory_space<vmem>>, %arg3: memref<1x128xf32, #tpu.memory_space<vmem>>, %arg4: memref<16x128xbf16, #tpu.memory_space<vmem>>) attributes {dimension_semantics = [#tpu.dimension_semantics<parallel>], iteration_bounds = array<i64: 2>, scalar_prefetch = 0 : i64, scratch_operands = 0 : i64, tpu.core_type = #tpu.core_type<tc>, window_params = [{transform_indices = @transform_0, window_bounds = array<i64: 16, 128>}, {pipeline_mode = #tpu.pipeline_mode<synchronous>, transform_indices = @transform_1, window_bounds = array<i64: 1, 128>}, {pipeline_mode = #tpu.pipeline_mode<synchronous>, transform_indices = @transform_2, window_bounds = array<i64: 1, 128>}, {transform_indices = @transform_3, window_bounds = array<i64: 16, 128>}]} {
    %c0 = arith.constant 0 : index
    %c0_0 = arith.constant 0 : index
    %0 = vector.load %arg1[%c0, %c0_0] : memref<16x128xbf16, #tpu.memory_space<vmem>>, vector<16x128xbf16>
    %1 = arith.extf %0 : vector<16x128xbf16> to vector<16x128xf32>
    %c0_1 = arith.constant 0 : index
    %c0_2 = arith.constant 0 : index
    %2 = vector.load %arg2[%c0_1, %c0_2] : memref<1x128xf32, #tpu.memory_space<vmem>>, vector<1x128xf32>
    %3 = vector.broadcast %2 : vector<1x128xf32> to vector<16x128xf32>
    %4 = arith.mulf %1, %3 : vector<16x128xf32>
    %c0_3 = arith.constant 0 : index
    %c0_4 = arith.constant 0 : index
    %5 = vector.load %arg3[%c0_3, %c0_4] : memref<1x128xf32, #tpu.memory_space<vmem>>, vector<1x128xf32>
    %6 = vector.broadcast %5 : vector<1x128xf32> to vector<16x128xf32>
    %7 = arith.addf %4, %6 : vector<16x128xf32>
    %cst = arith.constant 0.000000e+00 : f32
    %8 = vector.broadcast %cst : f32 to vector<16x128xf32>
    %9 = arith.maximumf %7, %8 : vector<16x128xf32>
    %10 = arith.truncf %9 : vector<16x128xf32> to vector<16x128xbf16>
    %c0_5 = arith.constant 0 : index
    %c0_6 = arith.constant 0 : index
    %11 = vector.load %arg4[%c0_5, %c0_6] : memref<16x128xbf16, #tpu.memory_space<vmem>>, vector<16x128xbf16>
    tpu.vector_store %arg4[%c0_5, %c0_6], %10 {strides = array<i32>} : memref<16x128xbf16, #tpu.memory_space<vmem>>, vector<16x128xbf16>,
    return
  }
  func.func @transform_0(%arg0: i32) -> (i32, i32) {
    %c0_i32 = arith.constant 0 : i32
    %c0_i32_0 = arith.constant 0 : i32
    return %arg0, %c0_i32 : i32, i32
  }
  func.func @transform_1(%arg0: i32) -> (i32, i32) {
    %c0_i32 = arith.constant 0 : i32
    %c0_i32_0 = arith.constant 0 : i32
    %c0_i32_1 = arith.constant 0 : i32
    return %c0_i32, %c0_i32_0 : i32, i32
  }
  func.func @transform_2(%arg0: i32) -> (i32, i32) {
    %c0_i32 = arith.constant 0 : i32
    %c0_i32_0 = arith.constant 0 : i32
    %c0_i32_1 = arith.constant 0 : i32
    return %c0_i32, %c0_i32_0 : i32, i32
  }
  func.func @transform_3(%arg0: i32) -> (i32, i32) {
    %c0_i32 = arith.constant 0 : i32
    %c0_i32_0 = arith.constant 0 : i32
    return %arg0, %c0_i32 : i32, i32
  }
}

module attributes {stable_mosaic.version = 11 : i64} {
  func.func @_conv_matmul_stats_kernel(%arg0: i32, %arg1: memref<16x384xbf16, #tpu.memory_space<vmem>>, %arg2: memref<384x128xbf16, #tpu.memory_space<vmem>>, %arg3: memref<16x128xbf16, #tpu.memory_space<vmem>>, %arg4: memref<8x128xf32, #tpu.memory_space<vmem>>, %arg5: memref<8x128xf32, #tpu.memory_space<vmem>>) attributes {dimension_semantics = [#tpu.dimension_semantics<parallel>], iteration_bounds = array<i64: 2>, scalar_prefetch = 0 : i64, scratch_operands = 0 : i64, tpu.core_type = #tpu.core_type<tc>, window_params = [{transform_indices = @transform_0, window_bounds = array<i64: 16, 384>}, {pipeline_mode = #tpu.pipeline_mode<synchronous>, transform_indices = @transform_1, window_bounds = array<i64: 384, 128>}, {transform_indices = @transform_2, window_bounds = array<i64: 16, 128>}, {transform_indices = @transform_3, window_bounds = array<i64: 8, 128>}, {transform_indices = @transform_4, window_bounds = array<i64: 8, 128>}]} {
    %c0 = arith.constant 0 : index
    %c0_0 = arith.constant 0 : index
    %0 = vector.load %arg1[%c0, %c0_0] : memref<16x384xbf16, #tpu.memory_space<vmem>>, vector<16x384xbf16>
    %c0_1 = arith.constant 0 : index
    %c0_2 = arith.constant 0 : index
    %1 = vector.load %arg2[%c0_1, %c0_2] : memref<384x128xbf16, #tpu.memory_space<vmem>>, vector<384x128xbf16>
    %cst = arith.constant dense<0.000000e+00> : vector<16x128xf32>
    %2 = tpu.matmul %0, %1, %cst {dimension_numbers = #tpu.dot_dimension_numbers<[1], [0], [0], [1], [0, 0, 1, 1], [], []>} : vector<16x384xbf16>, vector<384x128xbf16>, vector<16x128xf32> -> vector<16x128xf32>
    %3 = arith.truncf %2 : vector<16x128xf32> to vector<16x128xbf16>
    %c0_3 = arith.constant 0 : index
    %c0_4 = arith.constant 0 : index
    %4 = vector.load %arg3[%c0_3, %c0_4] : memref<16x128xbf16, #tpu.memory_space<vmem>>, vector<16x128xbf16>
    tpu.vector_store %arg3[%c0_3, %c0_4], %3 {strides = array<i32>} : memref<16x128xbf16, #tpu.memory_space<vmem>>, vector<16x128xbf16>,
    %5 = arith.mulf %2, %2 : vector<16x128xf32>
    %6 = vector.extract_strided_slice %2 {offsets = [0, 0], sizes = [8, 128], strides = [1, 1]} : vector<16x128xf32> to vector<8x128xf32>
    %7 = vector.extract_strided_slice %5 {offsets = [0, 0], sizes = [8, 128], strides = [1, 1]} : vector<16x128xf32> to vector<8x128xf32>
    %8 = vector.extract_strided_slice %2 {offsets = [8, 0], sizes = [8, 128], strides = [1, 1]} : vector<16x128xf32> to vector<8x128xf32>
    %9 = arith.addf %6, %8 : vector<8x128xf32>
    %10 = vector.extract_strided_slice %5 {offsets = [8, 0], sizes = [8, 128], strides = [1, 1]} : vector<16x128xf32> to vector<8x128xf32>
    %11 = arith.addf %7, %10 : vector<8x128xf32>
    %c0_5 = arith.constant 0 : index
    %c0_6 = arith.constant 0 : index
    %12 = vector.load %arg4[%c0_5, %c0_6] : memref<8x128xf32, #tpu.memory_space<vmem>>, vector<8x128xf32>
    tpu.vector_store %arg4[%c0_5, %c0_6], %9 {strides = array<i32>} : memref<8x128xf32, #tpu.memory_space<vmem>>, vector<8x128xf32>,
    %c0_7 = arith.constant 0 : index
    %c0_8 = arith.constant 0 : index
    %13 = vector.load %arg5[%c0_7, %c0_8] : memref<8x128xf32, #tpu.memory_space<vmem>>, vector<8x128xf32>
    tpu.vector_store %arg5[%c0_7, %c0_8], %11 {strides = array<i32>} : memref<8x128xf32, #tpu.memory_space<vmem>>, vector<8x128xf32>,
    return
  }
  func.func @transform_0(%arg0: i32) -> (i32, i32) {
    %c0_i32 = arith.constant 0 : i32
    %c0_i32_0 = arith.constant 0 : i32
    return %arg0, %c0_i32 : i32, i32
  }
  func.func @transform_1(%arg0: i32) -> (i32, i32) {
    %c0_i32 = arith.constant 0 : i32
    %c0_i32_0 = arith.constant 0 : i32
    %c0_i32_1 = arith.constant 0 : i32
    return %c0_i32, %c0_i32_0 : i32, i32
  }
  func.func @transform_2(%arg0: i32) -> (i32, i32) {
    %c0_i32 = arith.constant 0 : i32
    %c0_i32_0 = arith.constant 0 : i32
    return %arg0, %c0_i32 : i32, i32
  }
  func.func @transform_3(%arg0: i32) -> (i32, i32) {
    %c0_i32 = arith.constant 0 : i32
    %c0_i32_0 = arith.constant 0 : i32
    return %arg0, %c0_i32 : i32, i32
  }
  func.func @transform_4(%arg0: i32) -> (i32, i32) {
    %c0_i32 = arith.constant 0 : i32
    %c0_i32_0 = arith.constant 0 : i32
    return %arg0, %c0_i32 : i32, i32
  }
}

module attributes {stable_mosaic.version = 11 : i64} {
  func.func @_affine_act_res_kernel(%arg0: i32, %arg1: memref<16x128xbf16, #tpu.memory_space<vmem>>, %arg2: memref<1x128xf32, #tpu.memory_space<vmem>>, %arg3: memref<1x128xf32, #tpu.memory_space<vmem>>, %arg4: memref<16x128xbf16, #tpu.memory_space<vmem>>, %arg5: memref<16x128xbf16, #tpu.memory_space<vmem>>) attributes {dimension_semantics = [#tpu.dimension_semantics<parallel>], iteration_bounds = array<i64: 2>, scalar_prefetch = 0 : i64, scratch_operands = 0 : i64, tpu.core_type = #tpu.core_type<tc>, window_params = [{transform_indices = @transform_0, window_bounds = array<i64: 16, 128>}, {pipeline_mode = #tpu.pipeline_mode<synchronous>, transform_indices = @transform_1, window_bounds = array<i64: 1, 128>}, {pipeline_mode = #tpu.pipeline_mode<synchronous>, transform_indices = @transform_2, window_bounds = array<i64: 1, 128>}, {transform_indices = @transform_3, window_bounds = array<i64: 16, 128>}, {transform_indices = @transform_4, window_bounds = array<i64: 16, 128>}]} {
    %c0 = arith.constant 0 : index
    %c0_0 = arith.constant 0 : index
    %0 = vector.load %arg1[%c0, %c0_0] : memref<16x128xbf16, #tpu.memory_space<vmem>>, vector<16x128xbf16>
    %1 = arith.extf %0 : vector<16x128xbf16> to vector<16x128xf32>
    %c0_1 = arith.constant 0 : index
    %c0_2 = arith.constant 0 : index
    %2 = vector.load %arg2[%c0_1, %c0_2] : memref<1x128xf32, #tpu.memory_space<vmem>>, vector<1x128xf32>
    %3 = vector.broadcast %2 : vector<1x128xf32> to vector<16x128xf32>
    %4 = arith.mulf %1, %3 : vector<16x128xf32>
    %c0_3 = arith.constant 0 : index
    %c0_4 = arith.constant 0 : index
    %5 = vector.load %arg3[%c0_3, %c0_4] : memref<1x128xf32, #tpu.memory_space<vmem>>, vector<1x128xf32>
    %6 = vector.broadcast %5 : vector<1x128xf32> to vector<16x128xf32>
    %7 = arith.addf %4, %6 : vector<16x128xf32>
    %c0_5 = arith.constant 0 : index
    %c0_6 = arith.constant 0 : index
    %8 = vector.load %arg4[%c0_5, %c0_6] : memref<16x128xbf16, #tpu.memory_space<vmem>>, vector<16x128xbf16>
    %9 = arith.extf %8 : vector<16x128xbf16> to vector<16x128xf32>
    %10 = arith.addf %7, %9 : vector<16x128xf32>
    %11 = arith.truncf %10 : vector<16x128xf32> to vector<16x128xbf16>
    %c0_7 = arith.constant 0 : index
    %c0_8 = arith.constant 0 : index
    %12 = vector.load %arg5[%c0_7, %c0_8] : memref<16x128xbf16, #tpu.memory_space<vmem>>, vector<16x128xbf16>
    tpu.vector_store %arg5[%c0_7, %c0_8], %11 {strides = array<i32>} : memref<16x128xbf16, #tpu.memory_space<vmem>>, vector<16x128xbf16>,
    return
  }
  func.func @transform_0(%arg0: i32) -> (i32, i32) {
    %c0_i32 = arith.constant 0 : i32
    %c0_i32_0 = arith.constant 0 : i32
    return %arg0, %c0_i32 : i32, i32
  }
  func.func @transform_1(%arg0: i32) -> (i32, i32) {
    %c0_i32 = arith.constant 0 : i32
    %c0_i32_0 = arith.constant 0 : i32
    %c0_i32_1 = arith.constant 0 : i32
    return %c0_i32, %c0_i32_0 : i32, i32
  }
  func.func @transform_2(%arg0: i32) -> (i32, i32) {
    %c0_i32 = arith.constant 0 : i32
    %c0_i32_0 = arith.constant 0 : i32
    %c0_i32_1 = arith.constant 0 : i32
    return %c0_i32, %c0_i32_0 : i32, i32
  }
  func.func @transform_3(%arg0: i32) -> (i32, i32) {
    %c0_i32 = arith.constant 0 : i32
    %c0_i32_0 = arith.constant 0 : i32
    return %arg0, %c0_i32 : i32, i32
  }
  func.func @transform_4(%arg0: i32) -> (i32, i32) {
    %c0_i32 = arith.constant 0 : i32
    %c0_i32_0 = arith.constant 0 : i32
    return %arg0, %c0_i32 : i32, i32
  }
}

module attributes {stable_mosaic.version = 11 : i64} {
  func.func @_conv_matmul_stats_kernel(%arg0: i32, %arg1: memref<16x128xbf16, #tpu.memory_space<vmem>>, %arg2: memref<128x128xbf16, #tpu.memory_space<vmem>>, %arg3: memref<16x128xbf16, #tpu.memory_space<vmem>>, %arg4: memref<8x128xf32, #tpu.memory_space<vmem>>, %arg5: memref<8x128xf32, #tpu.memory_space<vmem>>) attributes {dimension_semantics = [#tpu.dimension_semantics<parallel>], iteration_bounds = array<i64: 2>, scalar_prefetch = 0 : i64, scratch_operands = 0 : i64, tpu.core_type = #tpu.core_type<tc>, window_params = [{transform_indices = @transform_0, window_bounds = array<i64: 16, 128>}, {pipeline_mode = #tpu.pipeline_mode<synchronous>, transform_indices = @transform_1, window_bounds = array<i64: 128, 128>}, {transform_indices = @transform_2, window_bounds = array<i64: 16, 128>}, {transform_indices = @transform_3, window_bounds = array<i64: 8, 128>}, {transform_indices = @transform_4, window_bounds = array<i64: 8, 128>}]} {
    %c0 = arith.constant 0 : index
    %c0_0 = arith.constant 0 : index
    %0 = vector.load %arg1[%c0, %c0_0] : memref<16x128xbf16, #tpu.memory_space<vmem>>, vector<16x128xbf16>
    %c0_1 = arith.constant 0 : index
    %c0_2 = arith.constant 0 : index
    %1 = vector.load %arg2[%c0_1, %c0_2] : memref<128x128xbf16, #tpu.memory_space<vmem>>, vector<128x128xbf16>
    %cst = arith.constant dense<0.000000e+00> : vector<16x128xf32>
    %2 = tpu.matmul %0, %1, %cst {dimension_numbers = #tpu.dot_dimension_numbers<[1], [0], [0], [1], [0, 0, 1, 1], [], []>} : vector<16x128xbf16>, vector<128x128xbf16>, vector<16x128xf32> -> vector<16x128xf32>
    %3 = arith.truncf %2 : vector<16x128xf32> to vector<16x128xbf16>
    %c0_3 = arith.constant 0 : index
    %c0_4 = arith.constant 0 : index
    %4 = vector.load %arg3[%c0_3, %c0_4] : memref<16x128xbf16, #tpu.memory_space<vmem>>, vector<16x128xbf16>
    tpu.vector_store %arg3[%c0_3, %c0_4], %3 {strides = array<i32>} : memref<16x128xbf16, #tpu.memory_space<vmem>>, vector<16x128xbf16>,
    %5 = arith.mulf %2, %2 : vector<16x128xf32>
    %6 = vector.extract_strided_slice %2 {offsets = [0, 0], sizes = [8, 128], strides = [1, 1]} : vector<16x128xf32> to vector<8x128xf32>
    %7 = vector.extract_strided_slice %5 {offsets = [0, 0], sizes = [8, 128], strides = [1, 1]} : vector<16x128xf32> to vector<8x128xf32>
    %8 = vector.extract_strided_slice %2 {offsets = [8, 0], sizes = [8, 128], strides = [1, 1]} : vector<16x128xf32> to vector<8x128xf32>
    %9 = arith.addf %6, %8 : vector<8x128xf32>
    %10 = vector.extract_strided_slice %5 {offsets = [8, 0], sizes = [8, 128], strides = [1, 1]} : vector<16x128xf32> to vector<8x128xf32>
    %11 = arith.addf %7, %10 : vector<8x128xf32>
    %c0_5 = arith.constant 0 : index
    %c0_6 = arith.constant 0 : index
    %12 = vector.load %arg4[%c0_5, %c0_6] : memref<8x128xf32, #tpu.memory_space<vmem>>, vector<8x128xf32>
    tpu.vector_store %arg4[%c0_5, %c0_6], %9 {strides = array<i32>} : memref<8x128xf32, #tpu.memory_space<vmem>>, vector<8x128xf32>,
    %c0_7 = arith.constant 0 : index
    %c0_8 = arith.constant 0 : index
    %13 = vector.load %arg5[%c0_7, %c0_8] : memref<8x128xf32, #tpu.memory_space<vmem>>, vector<8x128xf32>
    tpu.vector_store %arg5[%c0_7, %c0_8], %11 {strides = array<i32>} : memref<8x128xf32, #tpu.memory_space<vmem>>, vector<8x128xf32>,
    return
  }
  func.func @transform_0(%arg0: i32) -> (i32, i32) {
    %c0_i32 = arith.constant 0 : i32
    %c0_i32_0 = arith.constant 0 : i32
    return %arg0, %c0_i32 : i32, i32
  }
  func.func @transform_1(%arg0: i32) -> (i32, i32) {
    %c0_i32 = arith.constant 0 : i32
    %c0_i32_0 = arith.constant 0 : i32
    %c0_i32_1 = arith.constant 0 : i32
    return %c0_i32, %c0_i32_0 : i32, i32
  }
  func.func @transform_2(%arg0: i32) -> (i32, i32) {
    %c0_i32 = arith.constant 0 : i32
    %c0_i32_0 = arith.constant 0 : i32
    return %arg0, %c0_i32 : i32, i32
  }
  func.func @transform_3(%arg0: i32) -> (i32, i32) {
    %c0_i32 = arith.constant 0 : i32
    %c0_i32_0 = arith.constant 0 : i32
    return %arg0, %c0_i32 : i32, i32
  }
  func.func @transform_4(%arg0: i32) -> (i32, i32) {
    %c0_i32 = arith.constant 0 : i32
    %c0_i32_0 = arith.constant 0 : i32
    return %arg0, %c0_i32 : i32, i32
  }
}

module attributes {stable_mosaic.version = 11 : i64} {
  func.func @_affine_act_kernel(%arg0: i32, %arg1: memref<256x128xbf16, #tpu.memory_space<vmem>>, %arg2: memref<1x128xf32, #tpu.memory_space<vmem>>, %arg3: memref<1x128xf32, #tpu.memory_space<vmem>>, %arg4: memref<256x128xf32, #tpu.memory_space<vmem>>) attributes {dimension_semantics = [#tpu.dimension_semantics<parallel>], iteration_bounds = array<i64: 2>, scalar_prefetch = 0 : i64, scratch_operands = 0 : i64, tpu.core_type = #tpu.core_type<tc>, window_params = [{transform_indices = @transform_0, window_bounds = array<i64: 256, 128>}, {pipeline_mode = #tpu.pipeline_mode<synchronous>, transform_indices = @transform_1, window_bounds = array<i64: 1, 128>}, {pipeline_mode = #tpu.pipeline_mode<synchronous>, transform_indices = @transform_2, window_bounds = array<i64: 1, 128>}, {transform_indices = @transform_3, window_bounds = array<i64: 256, 128>}]} {
    %c0 = arith.constant 0 : index
    %c0_0 = arith.constant 0 : index
    %0 = vector.load %arg1[%c0, %c0_0] : memref<256x128xbf16, #tpu.memory_space<vmem>>, vector<256x128xbf16>
    %1 = arith.extf %0 : vector<256x128xbf16> to vector<256x128xf32>
    %c0_1 = arith.constant 0 : index
    %c0_2 = arith.constant 0 : index
    %2 = vector.load %arg2[%c0_1, %c0_2] : memref<1x128xf32, #tpu.memory_space<vmem>>, vector<1x128xf32>
    %3 = vector.broadcast %2 : vector<1x128xf32> to vector<256x128xf32>
    %4 = arith.mulf %1, %3 : vector<256x128xf32>
    %c0_3 = arith.constant 0 : index
    %c0_4 = arith.constant 0 : index
    %5 = vector.load %arg3[%c0_3, %c0_4] : memref<1x128xf32, #tpu.memory_space<vmem>>, vector<1x128xf32>
    %6 = vector.broadcast %5 : vector<1x128xf32> to vector<256x128xf32>
    %7 = arith.addf %4, %6 : vector<256x128xf32>
    %8 = math.tanh %7 : vector<256x128xf32>
    %c0_5 = arith.constant 0 : index
    %c0_6 = arith.constant 0 : index
    %9 = vector.load %arg4[%c0_5, %c0_6] : memref<256x128xf32, #tpu.memory_space<vmem>>, vector<256x128xf32>
    tpu.vector_store %arg4[%c0_5, %c0_6], %8 {strides = array<i32>} : memref<256x128xf32, #tpu.memory_space<vmem>>, vector<256x128xf32>,
    return
  }
  func.func @transform_0(%arg0: i32) -> (i32, i32) {
    %c0_i32 = arith.constant 0 : i32
    %c0_i32_0 = arith.constant 0 : i32
    return %arg0, %c0_i32 : i32, i32
  }
  func.func @transform_1(%arg0: i32) -> (i32, i32) {
    %c0_i32 = arith.constant 0 : i32
    %c0_i32_0 = arith.constant 0 : i32
    %c0_i32_1 = arith.constant 0 : i32
    return %c0_i32, %c0_i32_0 : i32, i32
  }
  func.func @transform_2(%arg0: i32) -> (i32, i32) {
    %c0_i32 = arith.constant 0 : i32
    %c0_i32_0 = arith.constant 0 : i32
    %c0_i32_1 = arith.constant 0 : i32
    return %c0_i32, %c0_i32_0 : i32, i32
  }
  func.func @transform_3(%arg0: i32) -> (i32, i32) {
    %c0_i32 = arith.constant 0 : i32
    %c0_i32_0 = arith.constant 0 : i32
    return %arg0, %c0_i32 : i32, i32
  }
}

module attributes {stable_mosaic.version = 11 : i64} {
  func.func @_conv_matmul_stats_kernel(%arg0: i32, %arg1: memref<256x512xbf16, #tpu.memory_space<vmem>>, %arg2: memref<512x128xbf16, #tpu.memory_space<vmem>>, %arg3: memref<256x128xbf16, #tpu.memory_space<vmem>>, %arg4: memref<8x128xf32, #tpu.memory_space<vmem>>, %arg5: memref<8x128xf32, #tpu.memory_space<vmem>>) attributes {dimension_semantics = [#tpu.dimension_semantics<parallel>], iteration_bounds = array<i64: 2>, scalar_prefetch = 0 : i64, scratch_operands = 0 : i64, tpu.core_type = #tpu.core_type<tc>, window_params = [{transform_indices = @transform_0, window_bounds = array<i64: 256, 512>}, {pipeline_mode = #tpu.pipeline_mode<synchronous>, transform_indices = @transform_1, window_bounds = array<i64: 512, 128>}, {transform_indices = @transform_2, window_bounds = array<i64: 256, 128>}, {transform_indices = @transform_3, window_bounds = array<i64: 8, 128>}, {transform_indices = @transform_4, window_bounds = array<i64: 8, 128>}]} {
    %c0 = arith.constant 0 : index
    %c0_0 = arith.constant 0 : index
    %0 = vector.load %arg1[%c0, %c0_0] : memref<256x512xbf16, #tpu.memory_space<vmem>>, vector<256x512xbf16>
    %c0_1 = arith.constant 0 : index
    %c0_2 = arith.constant 0 : index
    %1 = vector.load %arg2[%c0_1, %c0_2] : memref<512x128xbf16, #tpu.memory_space<vmem>>, vector<512x128xbf16>
    %cst = arith.constant dense<0.000000e+00> : vector<256x128xf32>
    %2 = tpu.matmul %0, %1, %cst {dimension_numbers = #tpu.dot_dimension_numbers<[1], [0], [0], [1], [0, 0, 1, 1], [], []>} : vector<256x512xbf16>, vector<512x128xbf16>, vector<256x128xf32> -> vector<256x128xf32>
    %3 = arith.truncf %2 : vector<256x128xf32> to vector<256x128xbf16>
    %c0_3 = arith.constant 0 : index
    %c0_4 = arith.constant 0 : index
    %4 = vector.load %arg3[%c0_3, %c0_4] : memref<256x128xbf16, #tpu.memory_space<vmem>>, vector<256x128xbf16>
    tpu.vector_store %arg3[%c0_3, %c0_4], %3 {strides = array<i32>} : memref<256x128xbf16, #tpu.memory_space<vmem>>, vector<256x128xbf16>,
    %5 = arith.mulf %2, %2 : vector<256x128xf32>
    %6 = vector.extract_strided_slice %2 {offsets = [0, 0], sizes = [8, 128], strides = [1, 1]} : vector<256x128xf32> to vector<8x128xf32>
    %7 = vector.extract_strided_slice %5 {offsets = [0, 0], sizes = [8, 128], strides = [1, 1]} : vector<256x128xf32> to vector<8x128xf32>
    %8 = vector.extract_strided_slice %2 {offsets = [8, 0], sizes = [8, 128], strides = [1, 1]} : vector<256x128xf32> to vector<8x128xf32>
    %9 = arith.addf %6, %8 : vector<8x128xf32>
    %10 = vector.extract_strided_slice %5 {offsets = [8, 0], sizes = [8, 128], strides = [1, 1]} : vector<256x128xf32> to vector<8x128xf32>
    %11 = arith.addf %7, %10 : vector<8x128xf32>
    %12 = vector.extract_strided_slice %2 {offsets = [16, 0], sizes = [8, 128], strides = [1, 1]} : vector<256x128xf32> to vector<8x128xf32>
    %13 = arith.addf %9, %12 : vector<8x128xf32>
    %14 = vector.extract_strided_slice %5 {offsets = [16, 0], sizes = [8, 128], strides = [1, 1]} : vector<256x128xf32> to vector<8x128xf32>
    %15 = arith.addf %11, %14 : vector<8x128xf32>
    %16 = vector.extract_strided_slice %2 {offsets = [24, 0], sizes = [8, 128], strides = [1, 1]} : vector<256x128xf32> to vector<8x128xf32>
    %17 = arith.addf %13, %16 : vector<8x128xf32>
    %18 = vector.extract_strided_slice %5 {offsets = [24, 0], sizes = [8, 128], strides = [1, 1]} : vector<256x128xf32> to vector<8x128xf32>
    %19 = arith.addf %15, %18 : vector<8x128xf32>
    %20 = vector.extract_strided_slice %2 {offsets = [32, 0], sizes = [8, 128], strides = [1, 1]} : vector<256x128xf32> to vector<8x128xf32>
    %21 = arith.addf %17, %20 : vector<8x128xf32>
    %22 = vector.extract_strided_slice %5 {offsets = [32, 0], sizes = [8, 128], strides = [1, 1]} : vector<256x128xf32> to vector<8x128xf32>
    %23 = arith.addf %19, %22 : vector<8x128xf32>
    %24 = vector.extract_strided_slice %2 {offsets = [40, 0], sizes = [8, 128], strides = [1, 1]} : vector<256x128xf32> to vector<8x128xf32>
    %25 = arith.addf %21, %24 : vector<8x128xf32>
    %26 = vector.extract_strided_slice %5 {offsets = [40, 0], sizes = [8, 128], strides = [1, 1]} : vector<256x128xf32> to vector<8x128xf32>
    %27 = arith.addf %23, %26 : vector<8x128xf32>
    %28 = vector.extract_strided_slice %2 {offsets = [48, 0], sizes = [8, 128], strides = [1, 1]} : vector<256x128xf32> to vector<8x128xf32>
    %29 = arith.addf %25, %28 : vector<8x128xf32>
    %30 = vector.extract_strided_slice %5 {offsets = [48, 0], sizes = [8, 128], strides = [1, 1]} : vector<256x128xf32> to vector<8x128xf32>
    %31 = arith.addf %27, %30 : vector<8x128xf32>
    %32 = vector.extract_strided_slice %2 {offsets = [56, 0], sizes = [8, 128], strides = [1, 1]} : vector<256x128xf32> to vector<8x128xf32>
    %33 = arith.addf %29, %32 : vector<8x128xf32>
    %34 = vector.extract_strided_slice %5 {offsets = [56, 0], sizes = [8, 128], strides = [1, 1]} : vector<256x128xf32> to vector<8x128xf32>
    %35 = arith.addf %31, %34 : vector<8x128xf32>
    %36 = vector.extract_strided_slice %2 {offsets = [64, 0], sizes = [8, 128], strides = [1, 1]} : vector<256x128xf32> to vector<8x128xf32>
    %37 = arith.addf %33, %36 : vector<8x128xf32>
    %38 = vector.extract_strided_slice %5 {offsets = [64, 0], sizes = [8, 128], strides = [1, 1]} : vector<256x128xf32> to vector<8x128xf32>
    %39 = arith.addf %35, %38 : vector<8x128xf32>
    %40 = vector.extract_strided_slice %2 {offsets = [72, 0], sizes = [8, 128], strides = [1, 1]} : vector<256x128xf32> to vector<8x128xf32>
    %41 = arith.addf %37, %40 : vector<8x128xf32>
    %42 = vector.extract_strided_slice %5 {offsets = [72, 0], sizes = [8, 128], strides = [1, 1]} : vector<256x128xf32> to vector<8x128xf32>
    %43 = arith.addf %39, %42 : vector<8x128xf32>
    %44 = vector.extract_strided_slice %2 {offsets = [80, 0], sizes = [8, 128], strides = [1, 1]} : vector<256x128xf32> to vector<8x128xf32>
    %45 = arith.addf %41, %44 : vector<8x128xf32>
    %46 = vector.extract_strided_slice %5 {offsets = [80, 0], sizes = [8, 128], strides = [1, 1]} : vector<256x128xf32> to vector<8x128xf32>
    %47 = arith.addf %43, %46 : vector<8x128xf32>
    %48 = vector.extract_strided_slice %2 {offsets = [88, 0], sizes = [8, 128], strides = [1, 1]} : vector<256x128xf32> to vector<8x128xf32>
    %49 = arith.addf %45, %48 : vector<8x128xf32>
    %50 = vector.extract_strided_slice %5 {offsets = [88, 0], sizes = [8, 128], strides = [1, 1]} : vector<256x128xf32> to vector<8x128xf32>
    %51 = arith.addf %47, %50 : vector<8x128xf32>
    %52 = vector.extract_strided_slice %2 {offsets = [96, 0], sizes = [8, 128], strides = [1, 1]} : vector<256x128xf32> to vector<8x128xf32>
    %53 = arith.addf %49, %52 : vector<8x128xf32>
    %54 = vector.extract_strided_slice %5 {offsets = [96, 0], sizes = [8, 128], strides = [1, 1]} : vector<256x128xf32> to vector<8x128xf32>
    %55 = arith.addf %51, %54 : vector<8x128xf32>
    %56 = vector.extract_strided_slice %2 {offsets = [104, 0], sizes = [8, 128], strides = [1, 1]} : vector<256x128xf32> to vector<8x128xf32>
    %57 = arith.addf %53, %56 : vector<8x128xf32>
    %58 = vector.extract_strided_slice %5 {offsets = [104, 0], sizes = [8, 128], strides = [1, 1]} : vector<256x128xf32> to vector<8x128xf32>
    %59 = arith.addf %55, %58 : vector<8x128xf32>
    %60 = vector.extract_strided_slice %2 {offsets = [112, 0], sizes = [8, 128], strides = [1, 1]} : vector<256x128xf32> to vector<8x128xf32>
    %61 = arith.addf %57, %60 : vector<8x128xf32>
    %62 = vector.extract_strided_slice %5 {offsets = [112, 0], sizes = [8, 128], strides = [1, 1]} : vector<256x128xf32> to vector<8x128xf32>
    %63 = arith.addf %59, %62 : vector<8x128xf32>
    %64 = vector.extract_strided_slice %2 {offsets = [120, 0], sizes = [8, 128], strides = [1, 1]} : vector<256x128xf32> to vector<8x128xf32>
    %65 = arith.addf %61, %64 : vector<8x128xf32>
    %66 = vector.extract_strided_slice %5 {offsets = [120, 0], sizes = [8, 128], strides = [1, 1]} : vector<256x128xf32> to vector<8x128xf32>
    %67 = arith.addf %63, %66 : vector<8x128xf32>
    %68 = vector.extract_strided_slice %2 {offsets = [128, 0], sizes = [8, 128], strides = [1, 1]} : vector<256x128xf32> to vector<8x128xf32>
    %69 = arith.addf %65, %68 : vector<8x128xf32>
    %70 = vector.extract_strided_slice %5 {offsets = [128, 0], sizes = [8, 128], strides = [1, 1]} : vector<256x128xf32> to vector<8x128xf32>
    %71 = arith.addf %67, %70 : vector<8x128xf32>
    %72 = vector.extract_strided_slice %2 {offsets = [136, 0], sizes = [8, 128], strides = [1, 1]} : vector<256x128xf32> to vector<8x128xf32>
    %73 = arith.addf %69, %72 : vector<8x128xf32>
    %74 = vector.extract_strided_slice %5 {offsets = [136, 0], sizes = [8, 128], strides = [1, 1]} : vector<256x128xf32> to vector<8x128xf32>
    %75 = arith.addf %71, %74 : vector<8x128xf32>
    %76 = vector.extract_strided_slice %2 {offsets = [144, 0], sizes = [8, 128], strides = [1, 1]} : vector<256x128xf32> to vector<8x128xf32>
    %77 = arith.addf %73, %76 : vector<8x128xf32>
    %78 = vector.extract_strided_slice %5 {offsets = [144, 0], sizes = [8, 128], strides = [1, 1]} : vector<256x128xf32> to vector<8x128xf32>
    %79 = arith.addf %75, %78 : vector<8x128xf32>
    %80 = vector.extract_strided_slice %2 {offsets = [152, 0], sizes = [8, 128], strides = [1, 1]} : vector<256x128xf32> to vector<8x128xf32>
    %81 = arith.addf %77, %80 : vector<8x128xf32>
    %82 = vector.extract_strided_slice %5 {offsets = [152, 0], sizes = [8, 128], strides = [1, 1]} : vector<256x128xf32> to vector<8x128xf32>
    %83 = arith.addf %79, %82 : vector<8x128xf32>
    %84 = vector.extract_strided_slice %2 {offsets = [160, 0], sizes = [8, 128], strides = [1, 1]} : vector<256x128xf32> to vector<8x128xf32>
    %85 = arith.addf %81, %84 : vector<8x128xf32>
    %86 = vector.extract_strided_slice %5 {offsets = [160, 0], sizes = [8, 128], strides = [1, 1]} : vector<256x128xf32> to vector<8x128xf32>
    %87 = arith.addf %83, %86 : vector<8x128xf32>
    %88 = vector.extract_strided_slice %2 {offsets = [168, 0], sizes = [8, 128], strides = [1, 1]} : vector<256x128xf32> to vector<8x128xf32>
    %89 = arith.addf %85, %88 : vector<8x128xf32>
    %90 = vector.extract_strided_slice %5 {offsets = [168, 0], sizes = [8, 128], strides = [1, 1]} : vector<256x128xf32> to vector<8x128xf32>
    %91 = arith.addf %87, %90 : vector<8x128xf32>
    %92 = vector.extract_strided_slice %2 {offsets = [176, 0], sizes = [8, 128], strides = [1, 1]} : vector<256x128xf32> to vector<8x128xf32>
    %93 = arith.addf %89, %92 : vector<8x128xf32>
    %94 = vector.extract_strided_slice %5 {offsets = [176, 0], sizes = [8, 128], strides = [1, 1]} : vector<256x128xf32> to vector<8x128xf32>
    %95 = arith.addf %91, %94 : vector<8x128xf32>
    %96 = vector.extract_strided_slice %2 {offsets = [184, 0], sizes = [8, 128], strides = [1, 1]} : vector<256x128xf32> to vector<8x128xf32>
    %97 = arith.addf %93, %96 : vector<8x128xf32>
    %98 = vector.extract_strided_slice %5 {offsets = [184, 0], sizes = [8, 128], strides = [1, 1]} : vector<256x128xf32> to vector<8x128xf32>
    %99 = arith.addf %95, %98 : vector<8x128xf32>
    %100 = vector.extract_strided_slice %2 {offsets = [192, 0], sizes = [8, 128], strides = [1, 1]} : vector<256x128xf32> to vector<8x128xf32>
    %101 = arith.addf %97, %100 : vector<8x128xf32>
    %102 = vector.extract_strided_slice %5 {offsets = [192, 0], sizes = [8, 128], strides = [1, 1]} : vector<256x128xf32> to vector<8x128xf32>
    %103 = arith.addf %99, %102 : vector<8x128xf32>
    %104 = vector.extract_strided_slice %2 {offsets = [200, 0], sizes = [8, 128], strides = [1, 1]} : vector<256x128xf32> to vector<8x128xf32>
    %105 = arith.addf %101, %104 : vector<8x128xf32>
    %106 = vector.extract_strided_slice %5 {offsets = [200, 0], sizes = [8, 128], strides = [1, 1]} : vector<256x128xf32> to vector<8x128xf32>
    %107 = arith.addf %103, %106 : vector<8x128xf32>
    %108 = vector.extract_strided_slice %2 {offsets = [208, 0], sizes = [8, 128], strides = [1, 1]} : vector<256x128xf32> to vector<8x128xf32>
    %109 = arith.addf %105, %108 : vector<8x128xf32>
    %110 = vector.extract_strided_slice %5 {offsets = [208, 0], sizes = [8, 128], strides = [1, 1]} : vector<256x128xf32> to vector<8x128xf32>
    %111 = arith.addf %107, %110 : vector<8x128xf32>
    %112 = vector.extract_strided_slice %2 {offsets = [216, 0], sizes = [8, 128], strides = [1, 1]} : vector<256x128xf32> to vector<8x128xf32>
    %113 = arith.addf %109, %112 : vector<8x128xf32>
    %114 = vector.extract_strided_slice %5 {offsets = [216, 0], sizes = [8, 128], strides = [1, 1]} : vector<256x128xf32> to vector<8x128xf32>
    %115 = arith.addf %111, %114 : vector<8x128xf32>
    %116 = vector.extract_strided_slice %2 {offsets = [224, 0], sizes = [8, 128], strides = [1, 1]} : vector<256x128xf32> to vector<8x128xf32>
    %117 = arith.addf %113, %116 : vector<8x128xf32>
    %118 = vector.extract_strided_slice %5 {offsets = [224, 0], sizes = [8, 128], strides = [1, 1]} : vector<256x128xf32> to vector<8x128xf32>
    %119 = arith.addf %115, %118 : vector<8x128xf32>
    %120 = vector.extract_strided_slice %2 {offsets = [232, 0], sizes = [8, 128], strides = [1, 1]} : vector<256x128xf32> to vector<8x128xf32>
    %121 = arith.addf %117, %120 : vector<8x128xf32>
    %122 = vector.extract_strided_slice %5 {offsets = [232, 0], sizes = [8, 128], strides = [1, 1]} : vector<256x128xf32> to vector<8x128xf32>
    %123 = arith.addf %119, %122 : vector<8x128xf32>
    %124 = vector.extract_strided_slice %2 {offsets = [240, 0], sizes = [8, 128], strides = [1, 1]} : vector<256x128xf32> to vector<8x128xf32>
    %125 = arith.addf %121, %124 : vector<8x128xf32>
    %126 = vector.extract_strided_slice %5 {offsets = [240, 0], sizes = [8, 128], strides = [1, 1]} : vector<256x128xf32> to vector<8x128xf32>
    %127 = arith.addf %123, %126 : vector<8x128xf32>
    %128 = vector.extract_strided_slice %2 {offsets = [248, 0], sizes = [8, 128], strides = [1, 1]} : vector<256x128xf32> to vector<8x128xf32>
    %129 = arith.addf %125, %128 : vector<8x128xf32>
    %130 = vector.extract_strided_slice %5 {offsets = [248, 0], sizes = [8, 128], strides = [1, 1]} : vector<256x128xf32> to vector<8x128xf32>
    %131 = arith.addf %127, %130 : vector<8x128xf32>
    %c0_5 = arith.constant 0 : index
    %c0_6 = arith.constant 0 : index
    %132 = vector.load %arg4[%c0_5, %c0_6] : memref<8x128xf32, #tpu.memory_space<vmem>>, vector<8x128xf32>
    tpu.vector_store %arg4[%c0_5, %c0_6], %129 {strides = array<i32>} : memref<8x128xf32, #tpu.memory_space<vmem>>, vector<8x128xf32>,
    %c0_7 = arith.constant 0 : index
    %c0_8 = arith.constant 0 : index
    %133 = vector.load %arg5[%c0_7, %c0_8] : memref<8x128xf32, #tpu.memory_space<vmem>>, vector<8x128xf32>
    tpu.vector_store %arg5[%c0_7, %c0_8], %131 {strides = array<i32>} : memref<8x128xf32, #tpu.memory_space<vmem>>, vector<8x128xf32>,
    return
  }
  func.func @transform_0(%arg0: i32) -> (i32, i32) {
    %c0_i32 = arith.constant 0 : i32
    %c0_i32_0 = arith.constant 0 : i32
    return %arg0, %c0_i32 : i32, i32
  }
  func.func @transform_1(%arg0: i32) -> (i32, i32) {
    %c0_i32 = arith.constant 0 : i32
    %c0_i32_0 = arith.constant 0 : i32
    %c0_i32_1 = arith.constant 0 : i32
    return %c0_i32, %c0_i32_0 : i32, i32
  }
  func.func @transform_2(%arg0: i32) -> (i32, i32) {
    %c0_i32 = arith.constant 0 : i32
    %c0_i32_0 = arith.constant 0 : i32
    return %arg0, %c0_i32 : i32, i32
  }
  func.func @transform_3(%arg0: i32) -> (i32, i32) {
    %c0_i32 = arith.constant 0 : i32
    %c0_i32_0 = arith.constant 0 : i32
    return %arg0, %c0_i32 : i32, i32
  }
  func.func @transform_4(%arg0: i32) -> (i32, i32) {
    %c0_i32 = arith.constant 0 : i32
    %c0_i32_0 = arith.constant 0 : i32
    return %arg0, %c0_i32 : i32, i32
  }
}

</mosaic_0001>

<bundles_post_ra>
// kernel: resnet_generator_forward.21
= control target key start
LH: loop header
LB: loop body
LE: loop exit
PB: predicated region body
PF: predicated region fallthrough
CT: control target
= control target key end

     0   :  { %s851_s12 = smov 0   ;;  %s985_s0 = inlined_call_operand.vmem [shape: bf16[512,128], index: 0, kind: input, shape index: {}]   ;;  %s986_s1 = inlined_call_operand.vmem [shape: f32[1,128], index: 1, kind: input, shape index: {}]   ;;  %s987_s2 = inlined_call_operand.vmem [shape: f32[1,128], index: 2, kind: input, shape index: {}]   ;;  %s988_s3 = inlined_call_operand.vmem [shape: bf16[512,128], index: 3, kind: output, shape index: {}]  }
   0x1 LB: > { %s564_s13 = sadd.s32 4294967295, %s829_s12   ;;  %p568_p0 = scmp.ge.s32.totalorder %s829_s12, 1  ;;  %s829_s12 = sphi %s851_s12, %s13_s12  }
   0x2   : > { %p138_p1 = scmp.lt.s32.totalorder %s829_s12, 3 }
   0x4   : > { %p139_p2 = pnand %p568_p0, %p138_p1 }
   0x5   : > { %s569_s14 = sshll.u32 (!%p139_p2), %s564_s13, 5  ;;  %v872_v0 = vld [vmem:[%s986_s1] ss:$0 sm:$0xff] (!%p139_p2) }
   0x6   : > { %142 = sbr.rel (%p139_p2) target bundleno = 59 (0x3b), region = 32  ;;  %p163_p3 = scmp.lt.s32.totalorder (!%p139_p2), %s569_s14, 63  ;;  %v881_v9 = vld [vmem:[%s987_s2] ss:$0 sm:$0xff] (!%p139_p2) }
   0xd   : > { %s990_s14 = smov (!%p163_p3, %s569_s14), 63 }
   0xe   : > { %s570_s15 = sshll.u32 %s990_s14, 2 }
   0xf   : > { %s867_s18 = scalar_lea.vmem %s985_s0, %s570_s15  ;;  %s906_s25 = scalar_lea.vmem %s988_s3, %s570_s15 }
  0x10   : > { %v642_v1 = vld [vmem:[%s867_s18] sm:$0xff]   ;;  %v785_v2 = vld [vmem:[%s867_s18 + $0x8] sm:$0xff]   ;;  %v786_v3 = vld [vmem:[%s867_s18 + $0x10] sm:$0xff]  }
  0x11   : > { %v643_v4 = vunpack.c.l.bf16 %v642_v1  ;;  %v644_v5 = vunpack.c.h.bf16 %v642_v1  ;;  %v647_v6 = vunpack.c.l.bf16 %v785_v2  ;;  %v648_v7 = vunpack.c.h.bf16 %v785_v2  ;;  %v787_v8 = vld [vmem:[%s867_s18 + $0x18] sm:$0xff]   ;;  %v788_v30 = vld [vmem:[%s867_s18 + $0x20] sm:$0xff]   ;;  %v789_v35 = vld [vmem:[%s867_s18 + $0x28] sm:$0xff]  }
  0x12   : > { %v651_v10 = vunpack.c.l.bf16 %v786_v3  ;;  %v652_v11 = vunpack.c.h.bf16 %v786_v3  ;;  %v655_v12 = vunpack.c.l.bf16 %v787_v8  ;;  %v656_v13 = vunpack.c.h.bf16 %v787_v8  ;;  %v790_v40 = vld [vmem:[%s867_s18 + $0x30] sm:$0xff]   ;;  %v791_v45 = vld [vmem:[%s867_s18 + $0x38] sm:$0xff]   ;;  %v792_v3 = vld [vmem:[%s867_s18 + $0x40] sm:$0xff]  }
  0x13   : > { %v245_v14 = vmul.f32 %v643_v4, %v872_v0  ;;  %v246_v15 = vmul.f32 %v644_v5, %v872_v0  ;;  %v247_v16 = vmul.f32 %v647_v6, %v872_v0  ;;  %v248_v17 = vmul.f32 %v648_v7, %v872_v0 }
  0x14   : > { %v249_v18 = vmul.f32 %v651_v10, %v872_v0  ;;  %v250_v19 = vmul.f32 %v652_v11, %v872_v0  ;;  %v251_v20 = vmul.f32 %v655_v12, %v872_v0  ;;  %v252_v21 = vmul.f32 %v656_v13, %v872_v0  ;;  %v793_v13 = vld [vmem:[%s867_s18 + $0x48] sm:$0xff]  }
  0x15   : > { %v284_v22 = vadd.f32 %v881_v9, %v245_v14  ;;  %v285_v23 = vadd.f32 %v881_v9, %v246_v15  ;;  %v286_v24 = vadd.f32 %v881_v9, %v247_v16  ;;  %v287_v25 = vadd.f32 %v881_v9, %v248_v17 }
  0x16   : > { %v288_v26 = vadd.f32 %v881_v9, %v249_v18  ;;  %v289_v27 = vadd.f32 %v881_v9, %v250_v19  ;;  %v290_v28 = vadd.f32 %v881_v9, %v251_v20  ;;  %v291_v29 = vadd.f32 %v881_v9, %v252_v21  ;;  %v794_v18 = vld [vmem:[%s867_s18 + $0x50] sm:$0xff]  }
  0x17   : > { %v316_v31 = vmax.f32 %v284_v22, 0.0  ;;  %v317_v32 = vmax.f32 %v285_v23, 0.0  ;;  %v318_v33 = vmax.f32 %v286_v24, 0.0  ;;  %v319_v34 = vmax.f32 %v287_v25, 0.0  ;;  %v795_v23 = vld [vmem:[%s867_s18 + $0x58] sm:$0xff]  }
  0x18   : > { %v320_v36 = vmax.f32 %v288_v26, 0.0  ;;  %v321_v37 = vmax.f32 %v289_v27, 0.0  ;;  %v322_v38 = vmax.f32 %v290_v28, 0.0  ;;  %v323_v39 = vmax.f32 %v291_v29, 0.0 }
  0x19   : > { %v708_v41 = vpack.c.bf16 %v317_v32, %v316_v31  ;;  %v713_v42 = vpack.c.bf16 %v319_v34, %v318_v33  ;;  %v659_v43 = vunpack.c.l.bf16 %v788_v30  ;;  %v660_v44 = vunpack.c.h.bf16 %v788_v30 }
  0x1a   : > { %v718_v46 = vpack.c.bf16 %v321_v37, %v320_v36  ;;  %v723_v47 = vpack.c.bf16 %v323_v39, %v322_v38  ;;  %v663_v48 = vunpack.c.l.bf16 %v789_v35  ;;  %v664_v49 = vunpack.c.h.bf16 %v789_v35 }
  0x1b   : > { %709 = vst [vmem:[%s906_s25] sm:$0xff] %v708_v41   ;;  %800 = vst [vmem:[%s906_s25 + $0x8] sm:$0xff] %v713_v42   ;;  %v253_v50 = vmul.f32 %v659_v43, %v872_v0  ;;  %v254_v51 = vmul.f32 %v660_v44, %v872_v0  ;;  %v667_v52 = vunpack.c.l.bf16 %v790_v40  ;;  %v668_v53 = vunpack.c.h.bf16 %v790_v40  ;;  %v796_v40 = vld [vmem:[%s867_s18 + $0x60] sm:$0xff]  }
  0x1c   : > { %801 = vst [vmem:[%s906_s25 + $0x10] sm:$0xff] %v718_v46   ;;  %802 = vst [vmem:[%s906_s25 + $0x18] sm:$0xff] %v723_v47   ;;  %v255_v54 = vmul.f32 %v663_v48, %v872_v0  ;;  %v256_v55 = vmul.f32 %v664_v49, %v872_v0  ;;  %v671_v56 = vunpack.c.l.bf16 %v791_v45  ;;  %v672_v57 = vunpack.c.h.bf16 %v791_v45 }
  0x1d   : > { %v292_v58 = vadd.f32 %v881_v9, %v253_v50  ;;  %v293_v59 = vadd.f32 %v881_v9, %v254_v51  ;;  %v257_v60 = vmul.f32 %v667_v52, %v872_v0  ;;  %v258_v61 = vmul.f32 %v668_v53, %v872_v0  ;;  %v797_v53 = vld [vmem:[%s867_s18 + $0x68] sm:$0xff]  }
  0x1e   : > { %v294_v62 = vadd.f32 %v881_v9, %v255_v54  ;;  %v295_v63 = vadd.f32 %v881_v9, %v256_v55  ;;  %v259_v1 = vmul.f32 %v671_v56, %v872_v0  ;;  %v260_v2 = vmul.f32 %v672_v57, %v872_v0 }
  0x1f   : > { %v324_v4 = vmax.f32 %v292_v58, 0.0  ;;  %v325_v5 = vmax.f32 %v293_v59, 0.0  ;;  %v296_v6 = vadd.f32 %v881_v9, %v257_v60  ;;  %v297_v7 = vadd.f32 %v881_v9, %v258_v61  ;;  %v798_v58 = vld [vmem:[%s867_s18 + $0x70] sm:$0xff]  }
  0x20   : > { %v326_v8 = vmax.f32 %v294_v62, 0.0  ;;  %v327_v10 = vmax.f32 %v295_v63, 0.0  ;;  %v298_v11 = vadd.f32 %v881_v9, %v259_v1  ;;  %v299_v12 = vadd.f32 %v881_v9, %v260_v2  ;;  %v799_v63 = vld [vmem:[%s867_s18 + $0x78] sm:$0xff]  }
  0x21   : > { %v728_v14 = vpack.c.bf16 %v325_v5, %v324_v4  ;;  %v328_v15 = vmax.f32 %v296_v6, 0.0  ;;  %v329_v16 = vmax.f32 %v297_v7, 0.0  ;;  %v675_v17 = vunpack.c.l.bf16 %v792_v3 }
  0x22   : > { %v733_v19 = vpack.c.bf16 %v327_v10, %v326_v8  ;;  %v330_v20 = vmax.f32 %v298_v11, 0.0  ;;  %v331_v21 = vmax.f32 %v299_v12, 0.0  ;;  %v676_v22 = vunpack.c.h.bf16 %v792_v3 }
  0x23   : > { %803 = vst [vmem:[%s906_s25 + $0x20] sm:$0xff] %v728_v14   ;;  %v738_v24 = vpack.c.bf16 %v329_v16, %v328_v15  ;;  %v261_v25 = vmul.f32 %v675_v17, %v872_v0  ;;  %v679_v26 = vunpack.c.l.bf16 %v793_v13  ;;  %v680_v27 = vunpack.c.h.bf16 %v793_v13 }
  0x24   : > { %804 = vst [vmem:[%s906_s25 + $0x28] sm:$0xff] %v733_v19   ;;  %v743_v28 = vpack.c.bf16 %v331_v21, %v330_v20  ;;  %v262_v29 = vmul.f32 %v676_v22, %v872_v0  ;;  %v683_v30 = vunpack.c.l.bf16 %v794_v18  ;;  %v684_v31 = vunpack.c.h.bf16 %v794_v18 }
  0x25   : > { %805 = vst [vmem:[%s906_s25 + $0x30] sm:$0xff] %v738_v24   ;;  %v300_v32 = vadd.f32 %v881_v9, %v261_v25  ;;  %v263_v33 = vmul.f32 %v679_v26, %v872_v0  ;;  %v264_v34 = vmul.f32 %v680_v27, %v872_v0  ;;  %v687_v35 = vunpack.c.l.bf16 %v795_v23 }
  0x26   : > { %806 = vst [vmem:[%s906_s25 + $0x38] sm:$0xff] %v743_v28   ;;  %v301_v36 = vadd.f32 %v881_v9, %v262_v29  ;;  %v265_v37 = vmul.f32 %v683_v30, %v872_v0  ;;  %v266_v38 = vmul.f32 %v684_v31, %v872_v0  ;;  %v688_v39 = vunpack.c.h.bf16 %v795_v23 }
  0x27   : > { %v332_v41 = vmax.f32 %v300_v32, 0.0  ;;  %v302_v42 = vadd.f32 %v881_v9, %v263_v33  ;;  %v303_v43 = vadd.f32 %v881_v9, %v264_v34  ;;  %v267_v44 = vmul.f32 %v687_v35, %v872_v0 }
  0x28   : > { %v333_v45 = vmax.f32 %v301_v36, 0.0  ;;  %v304_v46 = vadd.f32 %v881_v9, %v265_v37  ;;  %v305_v47 = vadd.f32 %v881_v9, %v266_v38  ;;  %v268_v48 = vmul.f32 %v688_v39, %v872_v0 }
  0x29   : > { %v334_v49 = vmax.f32 %v302_v42, 0.0  ;;  %v335_v50 = vmax.f32 %v303_v43, 0.0  ;;  %v306_v51 = vadd.f32 %v881_v9, %v267_v44  ;;  %v691_v52 = vunpack.c.l.bf16 %v796_v40 }
  0x2a   : > { %v748_v54 = vpack.c.bf16 %v333_v45, %v332_v41  ;;  %v336_v55 = vmax.f32 %v304_v46, 0.0  ;;  %v337_v56 = vmax.f32 %v305_v47, 0.0  ;;  %v307_v57 = vadd.f32 %v881_v9, %v268_v48 }
  0x2b   : > { %v753_v59 = vpack.c.bf16 %v335_v50, %v334_v49  ;;  %v338_v60 = vmax.f32 %v306_v51, 0.0  ;;  %v692_v61 = vunpack.c.h.bf16 %v796_v40  ;;  %v269_v62 = vmul.f32 %v691_v52, %v872_v0 }
  0x2c   : > { %807 = vst [vmem:[%s906_s25 + $0x40] sm:$0xff] %v748_v54   ;;  %v758_v1 = vpack.c.bf16 %v337_v56, %v336_v55  ;;  %v339_v2 = vmax.f32 %v307_v57, 0.0  ;;  %v695_v3 = vunpack.c.l.bf16 %v797_v53  ;;  %v696_v4 = vunpack.c.h.bf16 %v797_v53 }
  0x2d   : > { %808 = vst [vmem:[%s906_s25 + $0x48] sm:$0xff] %v753_v59   ;;  %v270_v5 = vmul.f32 %v692_v61, %v872_v0  ;;  %v308_v6 = vadd.f32 %v881_v9, %v269_v62  ;;  %v699_v7 = vunpack.c.l.bf16 %v798_v58  ;;  %v700_v8 = vunpack.c.h.bf16 %v798_v58 }
  0x2e   : > { %809 = vst [vmem:[%s906_s25 + $0x50] sm:$0xff] %v758_v1   ;;  %v763_v10 = vpack.c.bf16 %v339_v2, %v338_v60  ;;  %v271_v11 = vmul.f32 %v695_v3, %v872_v0  ;;  %v272_v12 = vmul.f32 %v696_v4, %v872_v0  ;;  %v703_v13 = vunpack.c.l.bf16 %v799_v63 }
  0x2f   : > { %v309_v14 = vadd.f32 %v881_v9, %v270_v5  ;;  %v340_v15 = vmax.f32 %v308_v6, 0.0  ;;  %v273_v16 = vmul.f32 %v699_v7, %v872_v0  ;;  %v274_v17 = vmul.f32 %v700_v8, %v872_v0 }
  0x30   : > { %810 = vst [vmem:[%s906_s25 + $0x58] sm:$0xff] %v763_v10   ;;  %v310_v18 = vadd.f32 %v881_v9, %v271_v11  ;;  %v311_v19 = vadd.f32 %v881_v9, %v272_v12  ;;  %v704_v20 = vunpack.c.h.bf16 %v799_v63  ;;  %v275_v21 = vmul.f32 %v703_v13, %v872_v0 }
  0x31   : > { %v341_v22 = vmax.f32 %v309_v14, 0.0  ;;  %v312_v23 = vadd.f32 %v881_v9, %v273_v16  ;;  %v313_v24 = vadd.f32 %v881_v9, %v274_v17 }
  0x32   : > { %v342_v25 = vmax.f32 %v310_v18, 0.0  ;;  %v343_v26 = vmax.f32 %v311_v19, 0.0  ;;  %v276_v27 = vmul.f32 %v704_v20, %v872_v0  ;;  %v314_v28 = vadd.f32 %v881_v9, %v275_v21 }
  0x33   : > { %v768_v29 = vpack.c.bf16 %v341_v22, %v340_v15  ;;  %v344_v30 = vmax.f32 %v312_v23, 0.0  ;;  %v345_v31 = vmax.f32 %v313_v24, 0.0 }
  0x34   : > { %v773_v32 = vpack.c.bf16 %v343_v26, %v342_v25  ;;  %v315_v33 = vadd.f32 %v881_v9, %v276_v27  ;;  %v346_v34 = vmax.f32 %v314_v28, 0.0 }
  0x35   : > { %811 = vst [vmem:[%s906_s25 + $0x60] sm:$0xff] %v768_v29   ;;  %v778_v35 = vpack.c.bf16 %v345_v31, %v344_v30 }
  0x36   : > { %812 = vst [vmem:[%s906_s25 + $0x68] sm:$0xff] %v773_v32   ;;  %v347_v36 = vmax.f32 %v315_v33, 0.0 }
  0x37   : > { %813 = vst [vmem:[%s906_s25 + $0x70] sm:$0xff] %v778_v35  }
  0x38   : > { %v783_v37 = vpack.c.bf16 %v347_v36, %v346_v34 }
  0x3a   : > { %814 = vst [vmem:[%s906_s25 + $0x78] sm:$0xff] %v783_v37  }
  0x3b PF: > { %s13_s12 = sadd.s32 1, %s829_s12  }
  0x3c   : > { %p10_p4 = scmp.ge.s32.totalorder %s13_s12, 4  }
  0x3e   :  { %12 = sbr.rel (!%p10_p4) target bundleno = 1 (0x1), region = 62 }

// kernel: resnet_generator_forward.20
= control target key start
LH: loop header
LB: loop body
LE: loop exit
PB: predicated region body
PF: predicated region fallthrough
CT: control target
= control target key end

     0   :  { %s1536_s15 = smov 0   ;;  %s1752_s0 = inlined_call_operand.vmem [shape: bf16[512,256], index: 0, kind: input, shape index: {}]   ;;  %s1753_s1 = inlined_call_operand.vmem [shape: bf16[256,128], index: 1, kind: input, shape index: {}]   ;;  %s1754_s2 = inlined_call_operand.vmem [shape: bf16[512,128], index: 2, kind: output, shape index: {0}]   ;;  %s1755_s3 = inlined_call_operand.vmem [shape: f32[16,128], index: 3, kind: output, shape index: {1}]   ;;  %s1756_s4 = inlined_call_operand.vmem [shape: f32[16,128], index: 4, kind: output, shape index: {2}]  }
   0x1 LB: > { %s1542_s16 = sadd.s32 4294967295, %s1509_s15   ;;  %p1085_p0 = scmp.ge.s32.totalorder %s1509_s15, 1  ;;  %s1509_s15 = sphi %s1536_s15, %s15_s15  }
   0x2   : > { %p169_p1 = scmp.lt.s32.totalorder %s1509_s15, 3 }
   0x4   : > { %p170_p2 = pnand %p1085_p0, %p169_p1 }
   0x5   : > { %v1439_v0 = vld [vmem:[%s1753_s1 + $0x40] sm:$0xff] (!%p170_p2)   ;;  %s1086_s19 = sshll.u32 (!%p170_p2), %s1542_s16, 5  ;;  %v1441_v2 = vld [vmem:[%s1753_s1 + $0x48] sm:$0xff] (!%p170_p2)   ;;  %v1443_v4 = vld [vmem:[%s1753_s1 + $0x50] sm:$0xff] (!%p170_p2)   ;;  %p217_p4 = scmp.lt.s32.totalorder (!%p170_p2), %s1542_s16, 1 }
   0x6   : > { %173 = sbr.rel (%p170_p2) target bundleno = 348 (0x15c), region = 28  ;;  %v1440_v1 = vld [vmem:[%s1753_s1] sm:$0xff] (!%p170_p2)   ;;  %1303 = vmatprep.subr.bf16.mxu0 (!%p170_p2), %v1439_v0  ;;  %1415 = vmatprep.subr.bf16.mxu1 (!%p170_p2), %v1439_v0  ;;  %v1442_v3 = vld [vmem:[%s1753_s1 + $0x8] sm:$0xff] (!%p170_p2)   ;;  %p205_p3 = scmp.lt.s32.totalorder (!%p170_p2), %s1086_s19, 63  ;;  %v1444_v5 = vld [vmem:[%s1753_s1 + $0x10] sm:$0xff] (!%p170_p2)  }
   0x7   : > { %1304 = vmatpush3.bf16.msra.mxu0 (!%p170_p2), %v1440_v1  ;;  %1423 = vmatpush3.bf16.msra.mxu1 (!%p170_p2), %v1440_v1  ;;  %v1445_v6 = vld [vmem:[%s1753_s1 + $0x58] sm:$0xff] (!%p170_p2)   ;;  %v1447_v8 = vld [vmem:[%s1753_s1 + $0x60] sm:$0xff] (!%p170_p2)   ;;  %v1449_v10 = vld [vmem:[%s1753_s1 + $0x68] sm:$0xff] (!%p170_p2)  }
   0x8   : > { %1305 = vmatprep.subr.bf16.mxu0 (!%p170_p2), %v1441_v2  ;;  %1416 = vmatprep.subr.bf16.mxu1 (!%p170_p2), %v1441_v2  ;;  %v1446_v7 = vld [vmem:[%s1753_s1 + $0x18] sm:$0xff] (!%p170_p2)   ;;  %v1448_v9 = vld [vmem:[%s1753_s1 + $0x20] sm:$0xff] (!%p170_p2)   ;;  %v1450_v12 = vld [vmem:[%s1753_s1 + $0x28] sm:$0xff] (!%p170_p2)  }
   0x9   : > { %v1451_v13 = vld [vmem:[%s1753_s1 + $0x70] sm:$0xff] (!%p170_p2)   ;;  %v1453_v16 = vld [vmem:[%s1753_s1 + $0x78] sm:$0xff] (!%p170_p2)  }
   0xa   : > { %v1452_v15 = vld [vmem:[%s1753_s1 + $0x30] sm:$0xff] (!%p170_p2)   ;;  %v1454_v17 = vld [vmem:[%s1753_s1 + $0x38] sm:$0xff] (!%p170_p2)  }
   0xb   : > { %1306 = vmatpush3.bf16.msra.mxu0 (!%p170_p2), %v1442_v3  ;;  %1424 = vmatpush3.bf16.msra.mxu1 (!%p170_p2), %v1442_v3 }
   0xc   : > { %1307 = vmatprep.subr.bf16.mxu0 (!%p170_p2), %v1443_v4  ;;  %1417 = vmatprep.subr.bf16.mxu1 (!%p170_p2), %v1443_v4 }
   0xd   : > { %s1758_s19 = smov (!%p205_p3, %s1086_s19), 63  ;;  %s1760_s16 = smov (!%p217_p4, %s1542_s16), 1 }
   0xe   : > { %s1175_s8 = sshll.u32 %s1758_s19, 3  ;;  %s1090_s5 = sshll.u32 %s1758_s19, 2 }
   0xf   : > { %1308 = vmatpush3.bf16.msra.mxu0 %v1444_v5  ;;  %1425 = vmatpush3.bf16.msra.mxu1 %v1444_v5  ;;  %s1580_s13 = scalar_lea.vmem %s1752_s0, %s1175_s8  ;;  %s1641_s8 = scalar_lea.vmem %s1754_s2, %s1090_s5 }
  0x10   : > { %1309 = vmatprep.subr.bf16.mxu0 %v1445_v6  ;;  %1418 = vmatprep.subr.bf16.mxu1 %v1445_v6  ;;  %v1457_v11 = vld [vmem:[%s1580_s13 + $0x4] ss:$8 sps:$4 sm:$0xff]   ;;  %v1455_v18 = vld [vmem:[%s1580_s13] ss:$8 sps:$4 sm:$0xff]   ;;  %v1458_v19 = vld [vmem:[%s1580_s13 + $0x14] ss:$8 sps:$4 sm:$0xff]  }
  0x11   : > { %578 = vmatprep.mubr.bf16.mxu0 %v1457_v11  ;;  %v1469_v14 = vld [vmem:[%s1580_s13 + $0x84] ss:$8 sps:$4 sm:$0xff]   ;;  %v1467_v20 = vld [vmem:[%s1580_s13 + $0x80] ss:$8 sps:$4 sm:$0xff]   ;;  %v1473_v21 = vld [vmem:[%s1580_s13 + $0x94] ss:$8 sps:$4 sm:$0xff]  }
  0x12   : > { %642 = vmatprep.mubr.bf16.mxu1 %v1469_v14  ;;  %v1460_v22 = vld [vmem:[%s1580_s13 + $0x10] ss:$8 sps:$4 sm:$0xff]   ;;  %v1461_v23 = vld [vmem:[%s1580_s13 + $0x24] ss:$8 sps:$4 sm:$0xff]   ;;  %v1463_v26 = vld [vmem:[%s1580_s13 + $0x20] ss:$8 sps:$4 sm:$0xff]  }
  0x13   : > { %1310 = vmatpush3.bf16.msra.mxu0 %v1446_v7  ;;  %1426 = vmatpush3.bf16.msra.mxu1 %v1446_v7  ;;  %v1475_v24 = vld [vmem:[%s1580_s13 + $0x90] ss:$8 sps:$4 sm:$0xff]   ;;  %v1479_v25 = vld [vmem:[%s1580_s13 + $0xa4] ss:$8 sps:$4 sm:$0xff]   ;;  %v1464_v27 = vld [vmem:[%s1580_s13 + $0x34] ss:$8 sps:$4 sm:$0xff]  }
  0x14   : > { %1311 = vmatprep.subr.bf16.mxu0 %v1447_v8  ;;  %1419 = vmatprep.subr.bf16.mxu1 %v1447_v8  ;;  %v1481_v28 = vld [vmem:[%s1580_s13 + $0xa0] ss:$8 sps:$4 sm:$0xff]   ;;  %v1485_v29 = vld [vmem:[%s1580_s13 + $0xb4] ss:$8 sps:$4 sm:$0xff]   ;;  %v1466_v30 = vld [vmem:[%s1580_s13 + $0x30] ss:$8 sps:$4 sm:$0xff]  }
  0x15   : > { %v1470_v31 = vld [vmem:[%s1580_s13 + $0x44] ss:$8 sps:$4 sm:$0xff]   ;;  %v1487_v32 = vld [vmem:[%s1580_s13 + $0xb0] ss:$8 sps:$4 sm:$0xff]   ;;  %v1472_v34 = vld [vmem:[%s1580_s13 + $0x40] ss:$8 sps:$4 sm:$0xff]  }
  0x16   : > { %v1491_v33 = vld [vmem:[%s1580_s13 + $0xc4] ss:$8 sps:$4 sm:$0xff]   ;;  %v1476_v35 = vld [vmem:[%s1580_s13 + $0x54] ss:$8 sps:$4 sm:$0xff]   ;;  %v1493_v36 = vld [vmem:[%s1580_s13 + $0xc0] ss:$8 sps:$4 sm:$0xff]  }
  0x17   : > { %1312 = vmatpush3.bf16.msra.mxu0 %v1448_v9  ;;  %1427 = vmatpush3.bf16.msra.mxu1 %v1448_v9  ;;  %v1494_v37 = vld [vmem:[%s1580_s13 + $0xd4] ss:$8 sps:$4 sm:$0xff]   ;;  %v1478_v38 = vld [vmem:[%s1580_s13 + $0x50] ss:$8 sps:$4 sm:$0xff]   ;;  %v1482_v39 = vld [vmem:[%s1580_s13 + $0x64] ss:$8 sps:$4 sm:$0xff]  }
  0x18   : > { %1313 = vmatprep.subr.bf16.mxu0 %v1449_v10  ;;  %1420 = vmatprep.subr.bf16.mxu1 %v1449_v10  ;;  %v1496_v40 = vld [vmem:[%s1580_s13 + $0xd0] ss:$8 sps:$4 sm:$0xff]   ;;  %v1497_v41 = vld [vmem:[%s1580_s13 + $0xe4] ss:$8 sps:$4 sm:$0xff]   ;;  %v1484_v42 = vld [vmem:[%s1580_s13 + $0x60] ss:$8 sps:$4 sm:$0xff]  }
  0x19   : > { %v1488_v43 = vld [vmem:[%s1580_s13 + $0x74] ss:$8 sps:$4 sm:$0xff]   ;;  %v1499_v44 = vld [vmem:[%s1580_s13 + $0xe0] ss:$8 sps:$4 sm:$0xff]   ;;  %v1490_v46 = vld [vmem:[%s1580_s13 + $0x70] ss:$8 sps:$4 sm:$0xff]  }
  0x1a   : > { %v1500_v45 = vld [vmem:[%s1580_s13 + $0xf4] ss:$8 sps:$4 sm:$0xff]   ;;  %v1502_v47 = vld [vmem:[%s1580_s13 + $0xf0] ss:$8 sps:$4 sm:$0xff]   ;;  %s1091_s19 = sshll.u32 %s1760_s16, 3 }
  0x1b   : > { %1314 = vmatpush3.bf16.msra.mxu0 %v1450_v12  ;;  %1428 = vmatpush3.bf16.msra.mxu1 %v1450_v12  ;;  %s220_s11 = scalar_lea.vmem %s1755_s3, %s1091_s19  ;;  %s224_s14 = scalar_lea.vmem %s1756_s4, %s1091_s19 }
  0x1c   : > { %1315 = vmatprep.subr.bf16.mxu0 %v1451_v13  ;;  %1421 = vmatprep.subr.bf16.mxu1 %v1451_v13 }
  0x1f   : > { %1316 = vmatpush3.bf16.msra.mxu0 %v1452_v15  ;;  %1429 = vmatpush3.bf16.msra.mxu1 %v1452_v15 }
  0x20   : > { %1317 = vmatprep.subr.bf16.mxu0 %v1453_v16  ;;  %1422 = vmatprep.subr.bf16.mxu1 %v1453_v16 }
  0x23   : > { %1318 = vmatpush3.bf16.msra.mxu0 %v1454_v17  ;;  %1430 = vmatpush3.bf16.msra.mxu1 %v1454_v17 }
  0x26   : > { %579 = vmatmul.mubr.bf16.vlgmr.msra.gmra.mrb[0].mxu0 %v1455_v18  ;;  %643 = vmatmul.mubr.bf16.vlgmr.msra.gmra.mrb[0].mxu1 %v1467_v20 }
  0x27   : > { %586 = vmatprep.mubr.bf16.mxu0 %v1458_v19  ;;  %650 = vmatprep.mubr.bf16.mxu1 %v1473_v21 }
  0x2e   : > { %587 = vmatmul.mubr.bf16.gmra.mrb[4].mxu0 %v1460_v22  ;;  %651 = vmatmul.mubr.bf16.gmra.mrb[4].mxu1 %v1475_v24 }
  0x2f   : > { %594 = vmatprep.mubr.bf16.mxu0 %v1461_v23  ;;  %658 = vmatprep.mubr.bf16.mxu1 %v1479_v25 }
  0x36   : > { %595 = vmatmul.mubr.bf16.gmra.mrb[8].mxu0 %v1463_v26  ;;  %659 = vmatmul.mubr.bf16.gmra.mrb[8].mxu1 %v1481_v28 }
  0x37   : > { %602 = vmatprep.mubr.bf16.mxu0 %v1464_v27  ;;  %666 = vmatprep.mubr.bf16.mxu1 %v1485_v29 }
  0x3e   : > { %603 = vmatmul.mubr.bf16.gmra.mrb[12].mxu0 %v1466_v30  ;;  %667 = vmatmul.mubr.bf16.gmra.mrb[12].mxu1 %v1487_v32 }
  0x3f   : > { %610 = vmatprep.mubr.bf16.mxu0 %v1470_v31  ;;  %674 = vmatprep.mubr.bf16.mxu1 %v1491_v33 }
  0x46   : > { %611 = vmatmul.mubr.bf16.gmra.mrb[16].mxu0 %v1472_v34  ;;  %675 = vmatmul.mubr.bf16.gmra.mrb[16].mxu1 %v1493_v36 }
  0x47   : > { %618 = vmatprep.mubr.bf16.mxu0 %v1476_v35  ;;  %682 = vmatprep.mubr.bf16.mxu1 %v1494_v37 }
  0x4e   : > { %619 = vmatmul.mubr.bf16.gmra.mrb[20].mxu0 %v1478_v38  ;;  %683 = vmatmul.mubr.bf16.gmra.mrb[20].mxu1 %v1496_v40 }
  0x4f   : > { %626 = vmatprep.mubr.bf16.mxu0 %v1482_v39  ;;  %690 = vmatprep.mubr.bf16.mxu1 %v1497_v41 }
  0x56   : > { %627 = vmatmul.mubr.bf16.gmra.mrb[24].mxu0 %v1484_v42  ;;  %691 = vmatmul.mubr.bf16.gmra.mrb[24].mxu1 %v1499_v44 }
  0x57   : > { %634 = vmatprep.mubr.bf16.mxu0 %v1488_v43  ;;  %698 = vmatprep.mubr.bf16.mxu1 %v1500_v45 }
  0x5e   : > { %635 = vmatmul.mubr.bf16.gmra.mrb[28].mxu0 %v1490_v46  ;;  %699 = vmatmul.mubr.bf16.gmra.mrb[28].mxu1 %v1502_v47 }
  0xf9   : > { %v1319_v48 = vpop.f32.mrb[0].mxu0  ;;  %v1367_v50 = vpop.f32.mrb[0].mxu1 }
  0xfa   : > { %v1320_v49 = vpop.f32.mrb[1].mxu0  ;;  %v1368_v53 = vpop.f32.mrb[1].mxu1 }
  0xfb   : > { %v1321_v51 = vadd.f32 %v1320_v49, %v1319_v48  ;;  %v1322_v52 = vpop.f32.mrb[2].mxu0  ;;  %v1636_v55 = vadd.f32 %v1368_v53, %v1367_v50  ;;  %v1370_v56 = vpop.f32.mrb[2].mxu1 }
  0xfc   : > { %v1323_v54 = vpop.f32.mrb[3].mxu0  ;;  %v1371_v58 = vpop.f32.mrb[3].mxu1 }
  0xfd   : > { %v1324_v57 = vadd.f32 %v1323_v54, %v1322_v52  ;;  %v1643_v59 = vadd.f32 %v1371_v58, %v1370_v56  ;;  %v867_v60 = vmul.f32 %v1321_v51, %v1321_v51 }
  0xff   : > { %v1211_v61 = vpack.c.bf16 %v1324_v57, %v1321_v51  ;;  %v868_v62 = vmul.f32 %v1324_v57, %v1324_v57  ;;  %v899_v63 = vadd.f32 %v1324_v57, %v1321_v51  ;;  %v1251_v0 = vpack.c.bf16 %v1643_v59, %v1636_v55 }
 0x101   : > { %1212 = vst [vmem:[%s1641_s8] sm:$0xff] %v1211_v61   ;;  %v900_v1 = vadd.f32 %v868_v62, %v867_v60  ;;  %v1325_v2 = vpop.f32.mrb[4].mxu0  ;;  %1295 = vst [vmem:[%s1641_s8 + $0x40] sm:$0xff] %v1251_v0   ;;  %v1373_v4 = vpop.f32.mrb[4].mxu1 }
 0x102   : > { %v1326_v3 = vpop.f32.mrb[5].mxu0  ;;  %v1374_v7 = vpop.f32.mrb[5].mxu1 }
 0x103   : > { %v1327_v5 = vadd.f32 %v1326_v3, %v1325_v2  ;;  %v1328_v6 = vpop.f32.mrb[6].mxu0  ;;  %v1649_v9 = vadd.f32 %v1374_v7, %v1373_v4  ;;  %v1376_v10 = vpop.f32.mrb[6].mxu1 }
 0x104   : > { %v1329_v8 = vpop.f32.mrb[7].mxu0  ;;  %v1377_v14 = vpop.f32.mrb[7].mxu1 }
 0x105   : > { %v869_v11 = vmul.f32 %v1327_v5, %v1327_v5  ;;  %v901_v12 = vadd.f32 %v1327_v5, %v899_v63  ;;  %v1330_v13 = vadd.f32 %v1329_v8, %v1328_v6  ;;  %v1651_v15 = vadd.f32 %v1377_v14, %v1376_v10 }
 0x107   : > { %v902_v16 = vadd.f32 %v900_v1, %v869_v11  ;;  %v1216_v17 = vpack.c.bf16 %v1330_v13, %v1327_v5  ;;  %v870_v18 = vmul.f32 %v1330_v13, %v1330_v13  ;;  %v903_v19 = vadd.f32 %v1330_v13, %v901_v12 }
 0x108   : > { %v1256_v20 = vpack.c.bf16 %v1651_v15, %v1649_v9 }
 0x109   : > { %1288 = vst [vmem:[%s1641_s8 + $0x8] sm:$0xff] %v1216_v17   ;;  %v904_v21 = vadd.f32 %v902_v16, %v870_v18  ;;  %v1331_v22 = vpop.f32.mrb[8].mxu0  ;;  %v1379_v24 = vpop.f32.mrb[8].mxu1 }
 0x10a   : > { %v1332_v23 = vpop.f32.mrb[9].mxu0  ;;  %1296 = vst [vmem:[%s1641_s8 + $0x48] sm:$0xff] %v1256_v20   ;;  %v1380_v27 = vpop.f32.mrb[9].mxu1 }
 0x10b   : > { %v1333_v25 = vadd.f32 %v1332_v23, %v1331_v22  ;;  %v1334_v26 = vpop.f32.mrb[10].mxu0  ;;  %v1657_v29 = vadd.f32 %v1380_v27, %v1379_v24  ;;  %v1382_v30 = vpop.f32.mrb[10].mxu1 }
 0x10c   : > { %v1335_v28 = vpop.f32.mrb[11].mxu0  ;;  %v1383_v34 = vpop.f32.mrb[11].mxu1 }
 0x10d   : > { %v871_v31 = vmul.f32 %v1333_v25, %v1333_v25  ;;  %v905_v32 = vadd.f32 %v1333_v25, %v903_v19  ;;  %v1336_v33 = vadd.f32 %v1335_v28, %v1334_v26  ;;  %v1659_v35 = vadd.f32 %v1383_v34, %v1382_v30 }
 0x10f   : > { %v906_v36 = vadd.f32 %v904_v21, %v871_v31  ;;  %v1221_v37 = vpack.c.bf16 %v1336_v33, %v1333_v25  ;;  %v872_v38 = vmul.f32 %v1336_v33, %v1336_v33  ;;  %v907_v39 = vadd.f32 %v1336_v33, %v905_v32 }
 0x110   : > { %v1261_v40 = vpack.c.bf16 %v1659_v35, %v1657_v29 }
 0x111   : > { %1289 = vst [vmem:[%s1641_s8 + $0x10] sm:$0xff] %v1221_v37   ;;  %v908_v41 = vadd.f32 %v906_v36, %v872_v38  ;;  %v1337_v42 = vpop.f32.mrb[12].mxu0  ;;  %v1385_v44 = vpop.f32.mrb[12].mxu1 }
 0x112   : > { %v1338_v43 = vpop.f32.mrb[13].mxu0  ;;  %1297 = vst [vmem:[%s1641_s8 + $0x50] sm:$0xff] %v1261_v40   ;;  %v1386_v47 = vpop.f32.mrb[13].mxu1 }
 0x113   : > { %v1339_v45 = vadd.f32 %v1338_v43, %v1337_v42  ;;  %v1340_v46 = vpop.f32.mrb[14].mxu0  ;;  %v1665_v49 = vadd.f32 %v1386_v47, %v1385_v44  ;;  %v1388_v50 = vpop.f32.mrb[14].mxu1 }
 0x114   : > { %v1341_v48 = vpop.f32.mrb[15].mxu0  ;;  %v1389_v54 = vpop.f32.mrb[15].mxu1 }
 0x115   : > { %v873_v51 = vmul.f32 %v1339_v45, %v1339_v45  ;;  %v909_v52 = vadd.f32 %v1339_v45, %v907_v39  ;;  %v1342_v53 = vadd.f32 %v1341_v48, %v1340_v46  ;;  %v1667_v56 = vadd.f32 %v1389_v54, %v1388_v50 }
 0x117   : > { %v910_v57 = vadd.f32 %v908_v41, %v873_v51  ;;  %v1226_v58 = vpack.c.bf16 %v1342_v53, %v1339_v45  ;;  %v874_v60 = vmul.f32 %v1342_v53, %v1342_v53  ;;  %v911_v61 = vadd.f32 %v1342_v53, %v909_v52 }
 0x118   : > { %v1266_v62 = vpack.c.bf16 %v1667_v56, %v1665_v49 }
 0x119   : > { %1290 = vst [vmem:[%s1641_s8 + $0x18] sm:$0xff] %v1226_v58   ;;  %v912_v63 = vadd.f32 %v910_v57, %v874_v60  ;;  %v1343_v0 = vpop.f32.mrb[16].mxu0  ;;  %v1391_v2 = vpop.f32.mrb[16].mxu1 }
 0x11a   : > { %v1344_v1 = vpop.f32.mrb[17].mxu0  ;;  %1298 = vst [vmem:[%s1641_s8 + $0x58] sm:$0xff] %v1266_v62   ;;  %v1392_v5 = vpop.f32.mrb[17].mxu1 }
 0x11b   : > { %v1345_v3 = vadd.f32 %v1344_v1, %v1343_v0  ;;  %v1346_v4 = vpop.f32.mrb[18].mxu0  ;;  %v1673_v7 = vadd.f32 %v1392_v5, %v1391_v2  ;;  %v1394_v8 = vpop.f32.mrb[18].mxu1 }
 0x11c   : > { %v1347_v6 = vpop.f32.mrb[19].mxu0  ;;  %v1395_v13 = vpop.f32.mrb[19].mxu1 }
 0x11d   : > { %v875_v10 = vmul.f32 %v1345_v3, %v1345_v3  ;;  %v913_v11 = vadd.f32 %v1345_v3, %v911_v61  ;;  %v1348_v12 = vadd.f32 %v1347_v6, %v1346_v4  ;;  %v1675_v14 = vadd.f32 %v1395_v13, %v1394_v8 }
 0x11f   : > { %v914_v16 = vadd.f32 %v912_v63, %v875_v10  ;;  %v1231_v17 = vpack.c.bf16 %v1348_v12, %v1345_v3  ;;  %v876_v18 = vmul.f32 %v1348_v12, %v1348_v12  ;;  %v915_v19 = vadd.f32 %v1348_v12, %v913_v11 }
 0x120   : > { %v1271_v20 = vpack.c.bf16 %v1675_v14, %v1673_v7 }
 0x121   : > { %1291 = vst [vmem:[%s1641_s8 + $0x20] sm:$0xff] %v1231_v17   ;;  %v916_v21 = vadd.f32 %v914_v16, %v876_v18  ;;  %v1349_v22 = vpop.f32.mrb[20].mxu0  ;;  %v1397_v24 = vpop.f32.mrb[20].mxu1 }
 0x122   : > { %v1350_v23 = vpop.f32.mrb[21].mxu0  ;;  %1299 = vst [vmem:[%s1641_s8 + $0x60] sm:$0xff] %v1271_v20   ;;  %v1398_v27 = vpop.f32.mrb[21].mxu1 }
 0x123   : > { %v1351_v25 = vadd.f32 %v1350_v23, %v1349_v22  ;;  %v1352_v26 = vpop.f32.mrb[22].mxu0  ;;  %v1681_v30 = vadd.f32 %v1398_v27, %v1397_v24  ;;  %v1400_v31 = vpop.f32.mrb[22].mxu1  ;;  %v883_v27 = vmul.f32 %v1636_v55, %v1636_v55 }
 0x124   : > { %v1353_v28 = vpop.f32.mrb[23].mxu0  ;;  %v1401_v36 = vpop.f32.mrb[23].mxu1 }
 0x125   : > { %v877_v32 = vmul.f32 %v1351_v25, %v1351_v25  ;;  %v917_v33 = vadd.f32 %v1351_v25, %v915_v19  ;;  %v1354_v34 = vadd.f32 %v1353_v28, %v1352_v26  ;;  %v1683_v37 = vadd.f32 %v1401_v36, %v1400_v31 }
 0x126   : > { %v885_v36 = vmul.f32 %v1649_v9, %v1649_v9 }
 0x127   : > { %v918_v38 = vadd.f32 %v916_v21, %v877_v32  ;;  %v1236_v39 = vpack.c.bf16 %v1354_v34, %v1351_v25  ;;  %v878_v40 = vmul.f32 %v1354_v34, %v1354_v34  ;;  %v919_v41 = vadd.f32 %v1354_v34, %v917_v33 }
 0x128   : > { %v1276_v42 = vpack.c.bf16 %v1683_v37, %v1681_v30  ;;  %v884_v32 = vmul.f32 %v1643_v59, %v1643_v59 }
 0x129   : > { %1292 = vst [vmem:[%s1641_s8 + $0x28] sm:$0xff] %v1236_v39   ;;  %v920_v43 = vadd.f32 %v918_v38, %v878_v40  ;;  %v1355_v44 = vpop.f32.mrb[24].mxu0  ;;  %v1403_v46 = vpop.f32.mrb[24].mxu1  ;;  %v886_v40 = vmul.f32 %v1651_v15, %v1651_v15 }
 0x12a   : > { %v1356_v45 = vpop.f32.mrb[25].mxu0  ;;  %1300 = vst [vmem:[%s1641_s8 + $0x68] sm:$0xff] %v1276_v42   ;;  %v1404_v50 = vpop.f32.mrb[25].mxu1 }
 0x12b   : > { %v1357_v47 = vadd.f32 %v1356_v45, %v1355_v44  ;;  %v1358_v48 = vpop.f32.mrb[26].mxu0  ;;  %v1689_v52 = vadd.f32 %v1404_v50, %v1403_v46  ;;  %v1406_v53 = vpop.f32.mrb[26].mxu1 }
 0x12c   : > { %v1359_v51 = vpop.f32.mrb[27].mxu0  ;;  %v1407_v60 = vpop.f32.mrb[27].mxu1 }
 0x12d   : > { %v879_v54 = vmul.f32 %v1357_v47, %v1357_v47  ;;  %v921_v57 = vadd.f32 %v1357_v47, %v919_v41  ;;  %v1360_v58 = vadd.f32 %v1359_v51, %v1358_v48  ;;  %v1691_v61 = vadd.f32 %v1407_v60, %v1406_v53 }
 0x12e   : > { %v891_v51 = vmul.f32 %v1673_v7, %v1673_v7  ;;  %v893_v60 = vmul.f32 %v1681_v30, %v1681_v30 }
 0x12f   : > { %v922_v62 = vadd.f32 %v920_v43, %v879_v54  ;;  %v1241_v63 = vpack.c.bf16 %v1360_v58, %v1357_v47  ;;  %v880_v0 = vmul.f32 %v1360_v58, %v1360_v58  ;;  %v923_v1 = vadd.f32 %v1360_v58, %v921_v57 }
 0x130   : > { %v1281_v2 = vpack.c.bf16 %v1691_v61, %v1689_v52  ;;  %v892_v57 = vmul.f32 %v1675_v14, %v1675_v14 }
 0x131   : > { %1293 = vst [vmem:[%s1641_s8 + $0x30] sm:$0xff] %v1241_v63   ;;  %v924_v3 = vadd.f32 %v922_v62, %v880_v0  ;;  %v1361_v4 = vpop.f32.mrb[28].mxu0  ;;  %v1409_v6 = vpop.f32.mrb[28].mxu1  ;;  %v894_v63 = vmul.f32 %v1683_v37, %v1683_v37 }
 0x132   : > { %v1362_v5 = vpop.f32.mrb[29].mxu0  ;;  %1301 = vst [vmem:[%s1641_s8 + $0x70] sm:$0xff] %v1281_v2   ;;  %v1410_v11 = vpop.f32.mrb[29].mxu1 }
 0x133   : > { %v1363_v8 = vadd.f32 %v1362_v5, %v1361_v4  ;;  %v1364_v10 = vpop.f32.mrb[30].mxu0  ;;  %v1411_v13 = vadd.f32 %v1410_v11, %v1409_v6  ;;  %v1412_v16 = vpop.f32.mrb[30].mxu1 }
 0x134   : > { %v1365_v12 = vpop.f32.mrb[31].mxu0  ;;  %v1413_v20 = vpop.f32.mrb[31].mxu1 }
 0x135   : > { %v881_v17 = vmul.f32 %v1363_v8, %v1363_v8  ;;  %v925_v18 = vadd.f32 %v1363_v8, %v923_v1  ;;  %v1366_v19 = vadd.f32 %v1365_v12, %v1364_v10  ;;  %v1414_v21 = vadd.f32 %v1413_v20, %v1412_v16 }
 0x136   : > { %v895_v1 = vmul.f32 %v1689_v52, %v1689_v52 }
 0x137   : > { %v926_v22 = vadd.f32 %v924_v3, %v881_v17  ;;  %v1246_v23 = vpack.c.bf16 %v1366_v19, %v1363_v8  ;;  %v882_v24 = vmul.f32 %v1366_v19, %v1366_v19  ;;  %v927_v25 = vadd.f32 %v1366_v19, %v925_v18 }
 0x138   : > { %v1286_v26 = vpack.c.bf16 %v1414_v21, %v1411_v13  ;;  %v896_v3 = vmul.f32 %v1691_v61, %v1691_v61  ;;  %v898_v8 = vmul.f32 %v1414_v21, %v1414_v21 }
 0x139   : > { %1294 = vst [vmem:[%s1641_s8 + $0x38] sm:$0xff] %v1246_v23   ;;  %v928_v28 = vadd.f32 %v926_v22, %v882_v24  ;;  %v929_v31 = vadd.f32 %v1636_v55, %v927_v25  ;;  %v887_v55 = vmul.f32 %v1657_v29, %v1657_v29 }
 0x13a   : > { %1302 = vst [vmem:[%s1641_s8 + $0x78] sm:$0xff] %v1286_v26  }
 0x13b   : > { %v930_v33 = vadd.f32 %v928_v28, %v883_v27  ;;  %v931_v34 = vadd.f32 %v1643_v59, %v929_v31  ;;  %v888_v59 = vmul.f32 %v1659_v35, %v1659_v35 }
 0x13d   : > { %v932_v38 = vadd.f32 %v930_v33, %v884_v32  ;;  %v933_v39 = vadd.f32 %v1649_v9, %v931_v34  ;;  %v889_v9 = vmul.f32 %v1665_v49, %v1665_v49 }
 0x13f   : > { %v934_v41 = vadd.f32 %v932_v38, %v885_v36  ;;  %v935_v42 = vadd.f32 %v1651_v15, %v933_v39  ;;  %v890_v15 = vmul.f32 %v1667_v56, %v1667_v56 }
 0x141   : > { %v936_v43 = vadd.f32 %v934_v41, %v886_v40  ;;  %v937_v44 = vadd.f32 %v1657_v29, %v935_v42 }
 0x143   : > { %v938_v45 = vadd.f32 %v936_v43, %v887_v55  ;;  %v939_v46 = vadd.f32 %v1659_v35, %v937_v44 }
 0x145   : > { %v940_v47 = vadd.f32 %v938_v45, %v888_v59  ;;  %v941_v48 = vadd.f32 %v1665_v49, %v939_v46 }
 0x147   : > { %v942_v50 = vadd.f32 %v940_v47, %v889_v9  ;;  %v943_v29 = vadd.f32 %v1667_v56, %v941_v48 }
 0x149   : > { %v944_v53 = vadd.f32 %v942_v50, %v890_v15  ;;  %v945_v54 = vadd.f32 %v1673_v7, %v943_v29 }
 0x14b   : > { %v946_v35 = vadd.f32 %v944_v53, %v891_v51  ;;  %v947_v58 = vadd.f32 %v1675_v14, %v945_v54 }
 0x14d   : > { %v948_v49 = vadd.f32 %v946_v35, %v892_v57  ;;  %v949_v62 = vadd.f32 %v1681_v30, %v947_v58  ;;  %v897_v30 = vmul.f32 %v1411_v13, %v1411_v13 }
 0x14f   : > { %v950_v56 = vadd.f32 %v948_v49, %v893_v60  ;;  %v951_v0 = vadd.f32 %v1683_v37, %v949_v62 }
 0x151   : > { %v952_v7 = vadd.f32 %v950_v56, %v894_v63  ;;  %v953_v14 = vadd.f32 %v1689_v52, %v951_v0 }
 0x153   : > { %v954_v2 = vadd.f32 %v952_v7, %v895_v1  ;;  %v955_v4 = vadd.f32 %v1691_v61, %v953_v14 }
 0x155   : > { %v956_v5 = vadd.f32 %v954_v2, %v896_v3  ;;  %v957_v6 = vadd.f32 %v1411_v13, %v955_v4 }
 0x157   : > { %v958_v37 = vadd.f32 %v956_v5, %v897_v30  ;;  %v959_v10 = vadd.f32 %v1414_v21, %v957_v6 }
 0x159   : > { %v960_v52 = vadd.f32 %v958_v37, %v898_v8  ;;  %961 = vst [vmem:[%s220_s11] sm:$0xff] %v959_v10 }
 0x15b   : > { %962 = vst [vmem:[%s224_s14] sm:$0xff] %v960_v52 }
 0x15c PF: > { %s15_s15 = sadd.s32 1, %s1509_s15  }
 0x15d   : > { %p12_p5 = scmp.ge.s32.totalorder %s15_s15, 4  }
 0x15f   :  { %14 = sbr.rel (!%p12_p5) target bundleno = 1 (0x1), region = 82 }

// kernel: resnet_generator_forward.22
= control target key start
LH: loop header
LB: loop body
LE: loop exit
PB: predicated region body
PF: predicated region fallthrough
CT: control target
= control target key end

     0   :  { %s735_s15 = smov 0   ;;  %s800_s0 = inlined_call_operand.vmem [shape: bf16[128,128], index: 0, kind: input, shape index: {}]   ;;  %s801_s1 = inlined_call_operand.vmem [shape: bf16[128,128], index: 1, kind: input, shape index: {}]   ;;  %s802_s2 = inlined_call_operand.vmem [shape: bf16[128,128], index: 2, kind: output, shape index: {0}]   ;;  %s803_s3 = inlined_call_operand.vmem [shape: f32[16,128], index: 3, kind: output, shape index: {1}]   ;;  %s804_s4 = inlined_call_operand.vmem [shape: f32[16,128], index: 4, kind: output, shape index: {2}]  }
   0x1 LB: > { %s741_s16 = sadd.s32 4294967295, %s708_s15   ;;  %p570_p0 = scmp.ge.s32.totalorder %s708_s15, 1  ;;  %s708_s15 = sphi %s735_s15, %s15_s15  }
   0x2   : > { %p168_p1 = scmp.lt.s32.totalorder %s708_s15, 3 }
   0x4   : > { %p169_p2 = pnand %p570_p0, %p168_p1 }
   0x5   : > { %v690_v0 = vld [vmem:[%s801_s1] sm:$0xff] (!%p169_p2)   ;;  %s571_s19 = sshll.u32 (!%p169_p2), %s741_s16, 3  ;;  %v691_v1 = vld [vmem:[%s801_s1 + $0x8] sm:$0xff] (!%p169_p2)   ;;  %v692_v2 = vld [vmem:[%s801_s1 + $0x10] sm:$0xff] (!%p169_p2)   ;;  %p214_p4 = scmp.lt.s32.totalorder (!%p169_p2), %s741_s16, 1 }
   0x6   : > { %172 = sbr.rel (%p169_p2) target bundleno = 270 (0x10e), region = 28  ;;  %p203_p3 = scmp.lt.s32.totalorder (!%p169_p2), %s571_s19, 15  ;;  %642 = vmatprep.subr.bf16.mxu0 (!%p169_p2), %v690_v0  ;;  %666 = vmatprep.subr.bf16.mxu1 (!%p169_p2), %v690_v0  ;;  %v693_v3 = vld [vmem:[%s801_s1 + $0x18] sm:$0xff] (!%p169_p2)   ;;  %v694_v6 = vld [vmem:[%s801_s1 + $0x20] sm:$0xff] (!%p169_p2)   ;;  %v695_v7 = vld [vmem:[%s801_s1 + $0x28] sm:$0xff] (!%p169_p2)  }
   0x7   : > { %643 = vmatpush3.bf16.msra.mxu0 (!%p169_p2), %v690_v0  ;;  %674 = vmatpush3.bf16.msra.mxu1 (!%p169_p2), %v690_v0  ;;  %v696_v8 = vld [vmem:[%s801_s1 + $0x30] sm:$0xff] (!%p169_p2)   ;;  %v697_v9 = vld [vmem:[%s801_s1 + $0x38] sm:$0xff] (!%p169_p2)  }
   0x8   : > { %644 = vmatprep.subr.bf16.mxu0 (!%p169_p2), %v691_v1  ;;  %667 = vmatprep.subr.bf16.mxu1 (!%p169_p2), %v691_v1 }
   0xb   : > { %645 = vmatpush3.bf16.msra.mxu0 (!%p169_p2), %v691_v1  ;;  %675 = vmatpush3.bf16.msra.mxu1 (!%p169_p2), %v691_v1 }
   0xc   : > { %646 = vmatprep.subr.bf16.mxu0 (!%p169_p2), %v692_v2  ;;  %668 = vmatprep.subr.bf16.mxu1 (!%p169_p2), %v692_v2 }
   0xd   : > { %s806_s19 = smov (!%p203_p3, %s571_s19), 15  ;;  %s808_s16 = smov (!%p214_p4, %s741_s16), 1 }
   0xe   : > { %s572_s24 = sshll.u32 %s806_s19, 2  ;;  %s575_s17 = sshll.u32 %s808_s16, 3 }
   0xf   : > { %s763_s27 = scalar_lea.vmem %s800_s0, %s572_s24  ;;  %647 = vmatpush3.bf16.msra.mxu0 %v692_v2  ;;  %676 = vmatpush3.bf16.msra.mxu1 %v692_v2  ;;  %s212_s14 = scalar_lea.vmem %s802_s2, %s572_s24 }
  0x10   : > { %v698_v4 = vld [vmem:[%s763_s27] sm:$0xff]   ;;  %v700_v5 = vld [vmem:[%s763_s27 + $0x10] sm:$0xff]   ;;  %648 = vmatprep.subr.bf16.mxu0 %v693_v3  ;;  %669 = vmatprep.subr.bf16.mxu1 %v693_v3  ;;  %v699_v10 = vld [vmem:[%s763_s27 + $0x8] sm:$0xff]   ;;  %s217_s20 = scalar_lea.vmem %s803_s3, %s575_s17  ;;  %s221_s23 = scalar_lea.vmem %s804_s4, %s575_s17 }
  0x11   : > { %658 = vmatprep.mubr.bf16.mxu0 %v698_v4  ;;  %662 = vmatprep.mubr.bf16.mxu1 %v700_v5  ;;  %v701_v11 = vld [vmem:[%s763_s27 + $0x18] sm:$0xff]  }
  0x13   : > { %649 = vmatpush3.bf16.msra.mxu0 %v693_v3  ;;  %677 = vmatpush3.bf16.msra.mxu1 %v693_v3 }
  0x14   : > { %650 = vmatprep.subr.bf16.mxu0 %v694_v6  ;;  %670 = vmatprep.subr.bf16.mxu1 %v694_v6 }
  0x17   : > { %651 = vmatpush3.bf16.msra.mxu0 %v694_v6  ;;  %678 = vmatpush3.bf16.msra.mxu1 %v694_v6 }
  0x18   : > { %652 = vmatprep.subr.bf16.mxu0 %v695_v7  ;;  %671 = vmatprep.subr.bf16.mxu1 %v695_v7 }
  0x1b   : > { %653 = vmatpush3.bf16.msra.mxu0 %v695_v7  ;;  %679 = vmatpush3.bf16.msra.mxu1 %v695_v7 }
  0x1c   : > { %654 = vmatprep.subr.bf16.mxu0 %v696_v8  ;;  %672 = vmatprep.subr.bf16.mxu1 %v696_v8 }
  0x1f   : > { %655 = vmatpush3.bf16.msra.mxu0 %v696_v8  ;;  %680 = vmatpush3.bf16.msra.mxu1 %v696_v8 }
  0x20   : > { %656 = vmatprep.subr.bf16.mxu0 %v697_v9  ;;  %673 = vmatprep.subr.bf16.mxu1 %v697_v9 }
  0x23   : > { %657 = vmatpush3.bf16.msra.mxu0 %v697_v9  ;;  %681 = vmatpush3.bf16.msra.mxu1 %v697_v9 }
  0x26   : > { %659 = vmatmul.mubr.bf16.vlgmr.msra.gmra.mrb[0].mxu0 %v699_v10  ;;  %663 = vmatmul.mubr.bf16.vlgmr.msra.gmra.mrb[0].mxu1 %v701_v11 }
  0xf9   : > { %v660_v12 = vpop.f32.mrb[0].mxu0  ;;  %v664_v13 = vpop.f32.mrb[0].mxu1 }
  0xfa   : > { %v353_v14 = vpop.f32.mrb[1].mxu0  ;;  %v369_v15 = vpop.f32.mrb[1].mxu1  ;;  %v426_v27 = vmul.f32 %v660_v12, %v660_v12  ;;  %v430_v39 = vmul.f32 %v664_v13, %v664_v13 }
  0xfb   : > { %v661_v16 = vpop.f32.mrb[2].mxu0  ;;  %v665_v17 = vpop.f32.mrb[2].mxu1  ;;  %v424_v18 = vmul.f32 %v353_v14, %v353_v14  ;;  %v428_v32 = vmul.f32 %v369_v15, %v369_v15 }
  0xfc   : > { %v615_v19 = vpack.c.bf16 %v661_v16, %v660_v12  ;;  %v356_v20 = vpop.f32.mrb[3].mxu0  ;;  %v625_v21 = vpack.c.bf16 %v665_v17, %v664_v13  ;;  %v372_v22 = vpop.f32.mrb[3].mxu1  ;;  %v427_v30 = vmul.f32 %v661_v16, %v661_v16  ;;  %v431_v42 = vmul.f32 %v665_v17, %v665_v17 }
  0xfd   : > { %v610_v23 = vpack.c.bf16 %v356_v20, %v353_v14  ;;  %v425_v24 = vmul.f32 %v356_v20, %v356_v20  ;;  %v432_v25 = vadd.f32 %v356_v20, %v353_v14  ;;  %v620_v26 = vpack.c.bf16 %v372_v22, %v369_v15 }
  0xfe   : > { %627 = vst [vmem:[%s212_s14 + $0x8] sm:$0xff] %v615_v19   ;;  %629 = vst [vmem:[%s212_s14 + $0x18] sm:$0xff] %v625_v21   ;;  %v429_v37 = vmul.f32 %v372_v22, %v372_v22 }
  0xff   : > { %611 = vst [vmem:[%s212_s14] sm:$0xff] %v610_v23   ;;  %v433_v28 = vadd.f32 %v425_v24, %v424_v18  ;;  %v434_v29 = vadd.f32 %v660_v12, %v432_v25  ;;  %628 = vst [vmem:[%s212_s14 + $0x10] sm:$0xff] %v620_v26  }
 0x101   : > { %v435_v31 = vadd.f32 %v433_v28, %v426_v27  ;;  %v436_v33 = vadd.f32 %v661_v16, %v434_v29 }
 0x103   : > { %v437_v34 = vadd.f32 %v435_v31, %v427_v30  ;;  %v438_v35 = vadd.f32 %v436_v33, %v369_v15 }
 0x105   : > { %v439_v36 = vadd.f32 %v437_v34, %v428_v32  ;;  %v440_v38 = vadd.f32 %v438_v35, %v372_v22 }
 0x107   : > { %v441_v40 = vadd.f32 %v439_v36, %v429_v37  ;;  %v442_v41 = vadd.f32 %v664_v13, %v440_v38 }
 0x109   : > { %v443_v43 = vadd.f32 %v441_v40, %v430_v39  ;;  %v444_v44 = vadd.f32 %v665_v17, %v442_v41 }
 0x10b   : > { %v445_v45 = vadd.f32 %v443_v43, %v431_v42  ;;  %446 = vst [vmem:[%s217_s20] sm:$0xff] %v444_v44 }
 0x10d   : > { %447 = vst [vmem:[%s221_s23] sm:$0xff] %v445_v45 }
 0x10e PF: > { %s15_s15 = sadd.s32 1, %s708_s15  }
 0x10f   : > { %p12_p5 = scmp.ge.s32.totalorder %s15_s15, 4  }
 0x111   :  { %14 = sbr.rel (!%p12_p5) target bundleno = 1 (0x1), region = 82 }

// kernel: resnet_generator_forward.23
= control target key start
LH: loop header
LB: loop body
LE: loop exit
PB: predicated region body
PF: predicated region fallthrough
CT: control target
= control target key end

     0   :  { %s431_s12 = smov 0   ;;  %s461_s0 = inlined_call_operand.vmem [shape: bf16[128,128], index: 0, kind: input, shape index: {}]   ;;  %s462_s1 = inlined_call_operand.vmem [shape: f32[1,128], index: 1, kind: input, shape index: {}]   ;;  %s463_s2 = inlined_call_operand.vmem [shape: f32[1,128], index: 2, kind: input, shape index: {}]   ;;  %s464_s3 = inlined_call_operand.vmem [shape: bf16[128,128], index: 3, kind: output, shape index: {}]  }
   0x1 LB: > { %s324_s13 = sadd.s32 4294967295, %s409_s12   ;;  %p328_p0 = scmp.ge.s32.totalorder %s409_s12, 1  ;;  %s409_s12 = sphi %s431_s12, %s13_s12  }
   0x2   : > { %p138_p1 = scmp.lt.s32.totalorder %s409_s12, 3 }
   0x4   : > { %p139_p2 = pnand %p328_p0, %p138_p1 }
   0x5   : > { %s329_s14 = sshll.u32 (!%p139_p2), %s324_s13, 3  ;;  %v333_v0 = vld [vmem:[%s462_s1] ss:$0 sm:$0xff] (!%p139_p2) }
   0x6   : > { %142 = sbr.rel (%p139_p2) target bundleno = 29 (0x1d), region = 32  ;;  %p163_p3 = scmp.lt.s32.totalorder (!%p139_p2), %s329_s14, 15  ;;  %v334_v9 = vld [vmem:[%s463_s2] ss:$0 sm:$0xff] (!%p139_p2) }
   0xd   : > { %s466_s14 = smov (!%p163_p3, %s329_s14), 15 }
   0xe   : > { %s330_s15 = sshll.u32 %s466_s14, 2 }
   0xf   : > { %s166_s18 = scalar_lea.vmem %s461_s0, %s330_s15  ;;  %s172_s25 = scalar_lea.vmem %s464_s3, %s330_s15 }
  0x10   : > { %v354_v1 = vld [vmem:[%s166_s18] sm:$0xff]   ;;  %v389_v2 = vld [vmem:[%s166_s18 + $0x8] sm:$0xff]   ;;  %v390_v3 = vld [vmem:[%s166_s18 + $0x10] sm:$0xff]  }
  0x11   : > { %v355_v4 = vunpack.c.l.bf16 %v354_v1  ;;  %v356_v5 = vunpack.c.h.bf16 %v354_v1  ;;  %v359_v6 = vunpack.c.l.bf16 %v389_v2  ;;  %v360_v7 = vunpack.c.h.bf16 %v389_v2  ;;  %v391_v8 = vld [vmem:[%s166_s18 + $0x18] sm:$0xff]  }
  0x12   : > { %v363_v10 = vunpack.c.l.bf16 %v390_v3  ;;  %v364_v11 = vunpack.c.h.bf16 %v390_v3  ;;  %v367_v12 = vunpack.c.l.bf16 %v391_v8  ;;  %v368_v13 = vunpack.c.h.bf16 %v391_v8 }
  0x13   : > { %v197_v14 = vmul.f32 %v355_v4, %v333_v0  ;;  %v198_v15 = vmul.f32 %v356_v5, %v333_v0  ;;  %v199_v16 = vmul.f32 %v359_v6, %v333_v0  ;;  %v200_v17 = vmul.f32 %v360_v7, %v333_v0 }
  0x14   : > { %v201_v18 = vmul.f32 %v363_v10, %v333_v0  ;;  %v202_v19 = vmul.f32 %v364_v11, %v333_v0  ;;  %v203_v20 = vmul.f32 %v367_v12, %v333_v0  ;;  %v204_v21 = vmul.f32 %v368_v13, %v333_v0 }
  0x15   : > { %v212_v22 = vadd.f32 %v334_v9, %v197_v14  ;;  %v213_v23 = vadd.f32 %v334_v9, %v198_v15  ;;  %v214_v24 = vadd.f32 %v334_v9, %v199_v16  ;;  %v215_v25 = vadd.f32 %v334_v9, %v200_v17 }
  0x16   : > { %v216_v26 = vadd.f32 %v334_v9, %v201_v18  ;;  %v217_v27 = vadd.f32 %v334_v9, %v202_v19  ;;  %v218_v28 = vadd.f32 %v334_v9, %v203_v20  ;;  %v219_v29 = vadd.f32 %v334_v9, %v204_v21 }
  0x17   : > { %v220_v30 = vmax.f32 %v212_v22, 0.0  ;;  %v221_v31 = vmax.f32 %v213_v23, 0.0  ;;  %v222_v32 = vmax.f32 %v214_v24, 0.0  ;;  %v223_v33 = vmax.f32 %v215_v25, 0.0 }
  0x18   : > { %v224_v34 = vmax.f32 %v216_v26, 0.0  ;;  %v225_v35 = vmax.f32 %v217_v27, 0.0  ;;  %v226_v36 = vmax.f32 %v218_v28, 0.0  ;;  %v227_v37 = vmax.f32 %v219_v29, 0.0 }
  0x19   : > { %v372_v38 = vpack.c.bf16 %v221_v31, %v220_v30  ;;  %v377_v39 = vpack.c.bf16 %v223_v33, %v222_v32 }
  0x1a   : > { %v382_v40 = vpack.c.bf16 %v225_v35, %v224_v34  ;;  %v387_v41 = vpack.c.bf16 %v227_v37, %v226_v36 }
  0x1b   : > { %373 = vst [vmem:[%s172_s25] sm:$0xff] %v372_v38   ;;  %392 = vst [vmem:[%s172_s25 + $0x8] sm:$0xff] %v377_v39  }
  0x1c   : > { %393 = vst [vmem:[%s172_s25 + $0x10] sm:$0xff] %v382_v40   ;;  %394 = vst [vmem:[%s172_s25 + $0x18] sm:$0xff] %v387_v41  }
  0x1d PF: > { %s13_s12 = sadd.s32 1, %s409_s12  }
  0x1e   : > { %p10_p4 = scmp.ge.s32.totalorder %s13_s12, 4  }
  0x20   :  { %12 = sbr.rel (!%p10_p4) target bundleno = 1 (0x1), region = 62 }

// kernel: resnet_generator_forward.25
= control target key start
LH: loop header
LB: loop body
LE: loop exit
PB: predicated region body
PF: predicated region fallthrough
CT: control target
= control target key end

     0   :  { %s326_s12 = smov 0   ;;  %s343_s0 = inlined_call_operand.vmem [shape: bf16[32,128], index: 0, kind: input, shape index: {}]   ;;  %s344_s1 = inlined_call_operand.vmem [shape: f32[1,128], index: 1, kind: input, shape index: {}]   ;;  %s345_s2 = inlined_call_operand.vmem [shape: f32[1,128], index: 2, kind: input, shape index: {}]   ;;  %s346_s3 = inlined_call_operand.vmem [shape: bf16[32,128], index: 3, kind: output, shape index: {}]  }
   0x1 LB: > { %s264_s13 = sadd.s32 4294967295, %s304_s12   ;;  %p268_p0 = scmp.ge.s32.totalorder %s304_s12, 1  ;;  %s304_s12 = sphi %s326_s12, %s13_s12  }
   0x2   : > { %p138_p1 = scmp.lt.s32.totalorder %s304_s12, 3 }
   0x4   : > { %p139_p2 = pnand %p268_p0, %p138_p1 }
   0x5   : > { %s269_s14 = sshll.u32 (!%p139_p2), %s264_s13, 1  ;;  %v273_v1 = vld [vmem:[%s344_s1] ss:$0 sm:$0xff] (!%p139_p2) }
   0x6   : > { %142 = sbr.rel (%p139_p2) target bundleno = 28 (0x1c), region = 32  ;;  %p163_p3 = scmp.lt.s32.totalorder (!%p139_p2), %s269_s14, 3  ;;  %v274_v4 = vld [vmem:[%s345_s2] ss:$0 sm:$0xff] (!%p139_p2) }
   0xd   : > { %s348_s14 = smov (!%p163_p3, %s269_s14), 3 }
   0xe   : > { %s270_s15 = sshll.u32 %s348_s14, 2 }
   0xf   : > { %s166_s18 = scalar_lea.vmem %s343_s0, %s270_s15  ;;  %s172_s25 = scalar_lea.vmem %s346_s3, %s270_s15 }
  0x10   : > { %v282_v0 = vld [vmem:[%s166_s18] sm:$0xff]  }
  0x11   : > { %v283_v2 = vunpack.c.l.bf16 %v282_v0  ;;  %v284_v3 = vunpack.c.h.bf16 %v282_v0 }
  0x13   : > { %v185_v5 = vmul.f32 %v283_v2, %v273_v1  ;;  %v186_v6 = vmul.f32 %v284_v3, %v273_v1 }
  0x15   : > { %v194_v7 = vadd.f32 %v274_v4, %v185_v5  ;;  %v195_v8 = vadd.f32 %v274_v4, %v186_v6 }
  0x17   : > { %v196_v9 = vmax.f32 %v194_v7, 0.0  ;;  %v197_v10 = vmax.f32 %v195_v8, 0.0 }
  0x19   : > { %v288_v11 = vpack.c.bf16 %v197_v10, %v196_v9 }
  0x1b   : > { %289 = vst [vmem:[%s172_s25] sm:$0xff] %v288_v11  }
  0x1c PF: > { %s13_s12 = sadd.s32 1, %s304_s12  }
  0x1d   : > { %p10_p4 = scmp.ge.s32.totalorder %s13_s12, 4  }
  0x1f   :  { %12 = sbr.rel (!%p10_p4) target bundleno = 1 (0x1), region = 62 }

// kernel: resnet_generator_forward.24
= control target key start
LH: loop header
LB: loop body
LE: loop exit
PB: predicated region body
PF: predicated region fallthrough
CT: control target
= control target key end

     0   :  { %s665_s15 = smov 0   ;;  %s745_s0 = inlined_call_operand.vmem [shape: bf16[32,256], index: 0, kind: input, shape index: {}]   ;;  %s746_s1 = inlined_call_operand.vmem [shape: bf16[256,128], index: 1, kind: input, shape index: {}]   ;;  %s747_s2 = inlined_call_operand.vmem [shape: bf16[32,128], index: 2, kind: output, shape index: {0}]   ;;  %s748_s3 = inlined_call_operand.vmem [shape: f32[16,128], index: 3, kind: output, shape index: {1}]   ;;  %s749_s4 = inlined_call_operand.vmem [shape: f32[16,128], index: 4, kind: output, shape index: {2}]  }
   0x1 LB: > { %s671_s16 = sadd.s32 4294967295, %s638_s15   ;;  %p545_p0 = scmp.ge.s32.totalorder %s638_s15, 1  ;;  %s638_s15 = sphi %s665_s15, %s15_s15  }
   0x2   : > { %p169_p1 = scmp.lt.s32.totalorder %s638_s15, 3 }
   0x4   : > { %p170_p2 = pnand %p545_p0, %p169_p1 }
   0x5   : > { %v613_v0 = vld [vmem:[%s746_s1 + $0x40] sm:$0xff] (!%p170_p2)   ;;  %s546_s19 = sshll.u32 (!%p170_p2), %s671_s16, 1  ;;  %v615_v2 = vld [vmem:[%s746_s1 + $0x48] sm:$0xff] (!%p170_p2)   ;;  %v617_v4 = vld [vmem:[%s746_s1 + $0x50] sm:$0xff] (!%p170_p2)   ;;  %p217_p4 = scmp.lt.s32.totalorder (!%p170_p2), %s671_s16, 1 }
   0x6   : > { %173 = sbr.rel (%p170_p2) target bundleno = 260 (0x104), region = 28  ;;  %v614_v1 = vld [vmem:[%s746_s1] sm:$0xff] (!%p170_p2)   ;;  %583 = vmatprep.subr.bf16.mxu0 (!%p170_p2), %v613_v0  ;;  %v616_v3 = vld [vmem:[%s746_s1 + $0x8] sm:$0xff] (!%p170_p2)   ;;  %p205_p3 = scmp.lt.s32.totalorder (!%p170_p2), %s546_s19, 3  ;;  %v618_v5 = vld [vmem:[%s746_s1 + $0x10] sm:$0xff] (!%p170_p2)  }
   0x7   : > { %584 = vmatpush3.bf16.msra.mxu0 (!%p170_p2), %v614_v1  ;;  %v619_v6 = vld [vmem:[%s746_s1 + $0x58] sm:$0xff] (!%p170_p2)   ;;  %v621_v8 = vld [vmem:[%s746_s1 + $0x60] sm:$0xff] (!%p170_p2)   ;;  %v623_v10 = vld [vmem:[%s746_s1 + $0x68] sm:$0xff] (!%p170_p2)  }
   0x8   : > { %585 = vmatprep.subr.bf16.mxu0 (!%p170_p2), %v615_v2  ;;  %v620_v7 = vld [vmem:[%s746_s1 + $0x18] sm:$0xff] (!%p170_p2)   ;;  %v622_v9 = vld [vmem:[%s746_s1 + $0x20] sm:$0xff] (!%p170_p2)   ;;  %v624_v12 = vld [vmem:[%s746_s1 + $0x28] sm:$0xff] (!%p170_p2)  }
   0x9   : > { %v625_v13 = vld [vmem:[%s746_s1 + $0x70] sm:$0xff] (!%p170_p2)   ;;  %v627_v15 = vld [vmem:[%s746_s1 + $0x78] sm:$0xff] (!%p170_p2)  }
   0xa   : > { %v626_v14 = vld [vmem:[%s746_s1 + $0x30] sm:$0xff] (!%p170_p2)   ;;  %v628_v16 = vld [vmem:[%s746_s1 + $0x38] sm:$0xff] (!%p170_p2)  }
   0xb   : > { %586 = vmatpush3.bf16.msra.mxu0 (!%p170_p2), %v616_v3 }
   0xc   : > { %587 = vmatprep.subr.bf16.mxu0 (!%p170_p2), %v617_v4 }
   0xd   : > { %s751_s19 = smov (!%p205_p3, %s546_s19), 3  ;;  %s753_s16 = smov (!%p217_p4, %s671_s16), 1 }
   0xe   : > { %s575_s8 = sshll.u32 %s751_s19, 3  ;;  %s550_s5 = sshll.u32 %s751_s19, 2 }
   0xf   : > { %588 = vmatpush3.bf16.msra.mxu0 %v618_v5  ;;  %s209_s13 = scalar_lea.vmem %s745_s0, %s575_s8  ;;  %s551_s6 = sshll.u32 %s753_s16, 3 }
  0x10   : > { %589 = vmatprep.subr.bf16.mxu0 %v619_v6  ;;  %v631_v11 = vld [vmem:[%s209_s13 + $0x4] ss:$8 sps:$4 sm:$0xff]   ;;  %v629_v17 = vld [vmem:[%s209_s13] ss:$8 sps:$4 sm:$0xff]   ;;  %s215_s9 = scalar_lea.vmem %s747_s2, %s550_s5  ;;  %s220_s12 = scalar_lea.vmem %s748_s3, %s551_s6 }
  0x11   : > { %398 = vmatprep.mubr.bf16.mxu0 %v631_v11  ;;  %s224_s19 = scalar_lea.vmem %s749_s4, %s551_s6 }
  0x13   : > { %590 = vmatpush3.bf16.msra.mxu0 %v620_v7 }
  0x14   : > { %591 = vmatprep.subr.bf16.mxu0 %v621_v8 }
  0x17   : > { %592 = vmatpush3.bf16.msra.mxu0 %v622_v9 }
  0x18   : > { %593 = vmatprep.subr.bf16.mxu0 %v623_v10 }
  0x1b   : > { %594 = vmatpush3.bf16.msra.mxu0 %v624_v12 }
  0x1c   : > { %595 = vmatprep.subr.bf16.mxu0 %v625_v13 }
  0x1f   : > { %596 = vmatpush3.bf16.msra.mxu0 %v626_v14 }
  0x20   : > { %597 = vmatprep.subr.bf16.mxu0 %v627_v15 }
  0x23   : > { %598 = vmatpush3.bf16.msra.mxu0 %v628_v16 }
  0x26   : > { %399 = vmatmul.mubr.bf16.vlgmr.msra.gmra.mrb[0].mxu0 %v629_v17 }
  0xf9   : > { %v599_v18 = vpop.f32.mrb[0].mxu0 }
  0xfa   : > { %v600_v19 = vpop.f32.mrb[1].mxu0 }
  0xfb   : > { %v601_v20 = vadd.f32 %v600_v19, %v599_v18  ;;  %v602_v21 = vpop.f32.mrb[2].mxu0 }
  0xfc   : > { %v603_v22 = vpop.f32.mrb[3].mxu0 }
  0xfd   : > { %v604_v23 = vadd.f32 %v603_v22, %v602_v21  ;;  %v417_v24 = vmul.f32 %v601_v20, %v601_v20 }
  0xff   : > { %v581_v25 = vpack.c.bf16 %v604_v23, %v601_v20  ;;  %v418_v26 = vmul.f32 %v604_v23, %v604_v23  ;;  %v419_v27 = vadd.f32 %v604_v23, %v601_v20 }
 0x101   : > { %582 = vst [vmem:[%s215_s9] sm:$0xff] %v581_v25   ;;  %v420_v28 = vadd.f32 %v418_v26, %v417_v24  ;;  %421 = vst [vmem:[%s220_s12] sm:$0xff] %v419_v27 }
 0x103   : > { %422 = vst [vmem:[%s224_s19] sm:$0xff] %v420_v28 }
 0x104 PF: > { %s15_s15 = sadd.s32 1, %s638_s15  }
 0x105   : > { %p12_p5 = scmp.ge.s32.totalorder %s15_s15, 4  }
 0x107   :  { %14 = sbr.rel (!%p12_p5) target bundleno = 1 (0x1), region = 82 }

// kernel: tile.28
= control target key start
LH: loop header
LB: loop body
LE: loop exit
PB: predicated region body
PF: predicated region fallthrough
CT: control target
= control target key end

     0   :  { %s22_s0 = inlined_call_operand.vmem [shape: f32[16], index: 0, kind: input, shape index: {}]   ;;  %s23_s1 = inlined_call_operand.vmem [shape: f32[4,16], index: 1, kind: output, shape index: {}]  }
   0x1   :  { %v4_v0 = vld [vmem:[%s22_s0] ss:$0 sm:$0xff] }
   0x2   :  { %5 = vst [vmem:[%s23_s1] sm:$0xf] %v4_v0 }

// kernel: resnet_generator_forward.29
= control target key start
LH: loop header
LB: loop body
LE: loop exit
PB: predicated region body
PF: predicated region fallthrough
CT: control target
= control target key end

     0   :  { %s402_s15 = smov 0   ;;  %s428_s0 = inlined_call_operand.vmem [shape: bf16[32,128], index: 0, kind: input, shape index: {}]   ;;  %s429_s1 = inlined_call_operand.vmem [shape: f32[1,128], index: 1, kind: input, shape index: {}]   ;;  %s430_s2 = inlined_call_operand.vmem [shape: f32[1,128], index: 2, kind: input, shape index: {}]   ;;  %s431_s3 = inlined_call_operand.vmem [shape: bf16[32,128], index: 3, kind: input, shape index: {}]   ;;  %s432_s4 = inlined_call_operand.vmem [shape: bf16[32,128], index: 4, kind: output, shape index: {}]  }
   0x1 LB: > { %s329_s16 = sadd.s32 4294967295, %s375_s15   ;;  %p333_p0 = scmp.ge.s32.totalorder %s375_s15, 1  ;;  %s375_s15 = sphi %s402_s15, %s14_s15  }
   0x2   : > { %p174_p1 = scmp.lt.s32.totalorder %s375_s15, 3 }
   0x4   : > { %p175_p2 = pnand %p333_p0, %p174_p1 }
   0x5   : > { %s334_s17 = sshll.u32 (!%p175_p2), %s329_s16, 1  ;;  %v340_v1 = vld [vmem:[%s429_s1] ss:$0 sm:$0xff] (!%p175_p2) }
   0x6   : > { %178 = sbr.rel (%p175_p2) target bundleno = 28 (0x1c), region = 36  ;;  %p206_p3 = scmp.lt.s32.totalorder (!%p175_p2), %s334_s17, 3  ;;  %v341_v5 = vld [vmem:[%s430_s2] ss:$0 sm:$0xff] (!%p175_p2) }
   0xd   : > { %s434_s17 = smov (!%p206_p3, %s334_s17), 3 }
   0xe   : > { %s335_s18 = sshll.u32 %s434_s17, 2 }
   0xf   : > { %s209_s21 = scalar_lea.vmem %s428_s0, %s335_s18  ;;  %s215_s24 = scalar_lea.vmem %s431_s3, %s335_s18 }
  0x10   : > { %v349_v0 = vld [vmem:[%s209_s21] sm:$0xff]   ;;  %s221_s5 = scalar_lea.vmem %s432_s4, %s335_s18 }
  0x11   : > { %v353_v2 = vld [vmem:[%s215_s24] sm:$0xff]   ;;  %v350_v3 = vunpack.c.l.bf16 %v349_v0  ;;  %v351_v4 = vunpack.c.h.bf16 %v349_v0 }
  0x12   : > { %v354_v8 = vunpack.c.l.bf16 %v353_v2  ;;  %v355_v9 = vunpack.c.h.bf16 %v353_v2 }
  0x13   : > { %v234_v6 = vmul.f32 %v350_v3, %v340_v1  ;;  %v235_v7 = vmul.f32 %v351_v4, %v340_v1 }
  0x15   : > { %v243_v10 = vadd.f32 %v341_v5, %v234_v6  ;;  %v244_v11 = vadd.f32 %v341_v5, %v235_v7 }
  0x17   : > { %v249_v12 = vadd.f32 %v354_v8, %v243_v10  ;;  %v250_v13 = vadd.f32 %v355_v9, %v244_v11 }
  0x19   : > { %v359_v14 = vpack.c.bf16 %v250_v13, %v249_v12 }
  0x1b   : > { %360 = vst [vmem:[%s221_s5] sm:$0xff] %v359_v14  }
  0x1c PF: > { %s14_s15 = sadd.s32 1, %s375_s15  }
  0x1d   : > { %p11_p4 = scmp.ge.s32.totalorder %s14_s15, 4  }
  0x1f   :  { %13 = sbr.rel (!%p11_p4) target bundleno = 1 (0x1), region = 69 }

// kernel: tile.29
= control target key start
LH: loop header
LB: loop body
LE: loop exit
PB: predicated region body
PF: predicated region fallthrough
CT: control target
= control target key end

     0   :  { %vm7_vm0 = vcmask 130048   ;;  %s37_s8 = smov 16   ;;  %s38_s9 = smov 32   ;;  %vm13_vm1 = vcmask 523648   ;;  %vm19_vm2 = vcmask 392448   ;;  %vm25_vm3 = vcmask 261248   ;;  %s55_s0 = inlined_call_operand.vmem [shape: f32[4,16], index: 0, kind: input, shape index: {}]   ;;  %s56_s1 = inlined_call_operand.vmem [shape: f32[64], index: 1, kind: output, shape index: {}]  }
   0x1   :  { %v4_v0 = vld [vmem:[%s55_s0] sm:$0xf]  ;;  %s36_s0 = smov 48  }
   0x2   :  { %5 = vst [vmem:[#allocation1] sm:$0xf] %v4_v0 }
   0x9   :  { %v10_v1 = vld [vmem:[#allocation1 + $0x3] sm:$0x1]   ;;  %v22_v2 = vld [vmem:[#allocation1 + $0x1] sm:$0x1]   ;;  %v6_v3 = vld [vmem:[#allocation1] sm:$0x1]  }
   0xa   :  { %11 = vrot.lane.b32.xlu0 %v10_v1, %s36_s0  ;;  %23 = vrot.lane.b32.xlu1 %v22_v2, %s37_s8  ;;  %v16_v4 = vld [vmem:[#allocation1 + $0x2] sm:$0x1]   ;;  %8 = vst.msk [vmem:[#allocation0] sm:$0x1] %vm7_vm0, %v6_v3  }
   0xe   :  { %17 = vrot.lane.b32.xlu0 %v16_v4, %s38_s9 }
  0x7c   :  { %v12_v5 = vpop.permute.xlu0 %11   ;;  %v24_v6 = vpop.permute.xlu1 %23  }
  0x7d   :  { %14 = vst.msk [vmem:[#allocation0] sm:$0x1] %vm13_vm1, %v12_v5  }
  0x80   :  { %v18_v7 = vpop.permute.xlu0 %17  }
  0x81   :  { %20 = vst.msk [vmem:[#allocation0] sm:$0x1] %vm19_vm2, %v18_v7  }
  0x82   :  { %26 = vst.msk [vmem:[#allocation0] sm:$0x1] %vm25_vm3, %v24_v6  }
  0x89   :  { %v30_v8 = vld [vmem:[#allocation0] sm:$0x1] }
  0x8a   :  { %32 = vst [vmem:[%s56_s1] sm:$0x1] %v30_v8 }

// kernel: resnet_generator_forward.26
= control target key start
LH: loop header
LB: loop body
LE: loop exit
PB: predicated region body
PF: predicated region fallthrough
CT: control target
= control target key end

     0   :  { %s828_s15 = smov 0   ;;  %s932_s0 = inlined_call_operand.vmem [shape: bf16[32,384], index: 0, kind: input, shape index: {}]   ;;  %s933_s1 = inlined_call_operand.vmem [shape: bf16[384,128], index: 1, kind: input, shape index: {}]   ;;  %s934_s2 = inlined_call_operand.vmem [shape: bf16[32,128], index: 2, kind: output, shape index: {0}]   ;;  %s935_s3 = inlined_call_operand.vmem [shape: f32[16,128], index: 3, kind: output, shape index: {1}]   ;;  %s936_s4 = inlined_call_operand.vmem [shape: f32[16,128], index: 4, kind: output, shape index: {2}]  }
   0x1 LB: > { %s834_s16 = sadd.s32 4294967295, %s799_s15   ;;  %p658_p0 = scmp.ge.s32.totalorder %s799_s15, 1  ;;  %s799_s15 = sphi %s828_s15, %s15_s15  }
   0x2   : > { %p169_p1 = scmp.lt.s32.totalorder %s799_s15, 3 }
   0x4   : > { %p170_p2 = pnand %p658_p0, %p169_p1 }
   0x5   : > { %v765_v0 = vld [vmem:[%s933_s1 + $0x40] sm:$0xff] (!%p170_p2)   ;;  %v801_v1 = vmov (!%p170_p2), 0.0   ;;  %v768_v4 = vld [vmem:[%s933_s1 + $0x48] sm:$0xff] (!%p170_p2)   ;;  %vm802_vm0 = vmmov (!%p170_p2), 0   ;;  %v771_v7 = vld [vmem:[%s933_s1 + $0x50] sm:$0xff] (!%p170_p2)   ;;  %s659_s7 = sshll.u32 (!%p170_p2), %s834_s16, 1 }
   0x6   : > { %173 = sbr.rel (%p170_p2) target bundleno = 262 (0x106), region = 28  ;;  %734 = vmatprep.subr.bf16.mxu1 (!%p170_p2), %v801_v1  ;;  %v766_v2 = vld [vmem:[%s933_s1] sm:$0xff] (!%p170_p2)   ;;  %703 = vmatprep.subr.bf16.mxu0 (!%p170_p2), %v765_v0  ;;  %v769_v5 = vld [vmem:[%s933_s1 + $0x8] sm:$0xff] (!%p170_p2)   ;;  %v772_v8 = vld [vmem:[%s933_s1 + $0x10] sm:$0xff] (!%p170_p2)   ;;  %p205_p3 = scmp.lt.s32.totalorder (!%p170_p2), %s659_s7, 3 }
   0x7   : > { %v767_v3 = vld [vmem:[%s933_s1 + $0x80] sm:$0xff] (!%p170_p2)   ;;  %704 = vmatpush3.bf16.msra.mxu0 (!%p170_p2), %v766_v2  ;;  %750 = vmatprep.mubr.msk.bf16.mxu1 (!%p170_p2), %vm802_vm0, %v801_v1  ;;  %v770_v6 = vld [vmem:[%s933_s1 + $0x88] sm:$0xff] (!%p170_p2)   ;;  %v773_v9 = vld [vmem:[%s933_s1 + $0x90] sm:$0xff] (!%p170_p2)   ;;  %p217_p4 = scmp.lt.s32.totalorder (!%p170_p2), %s834_s16, 1 }
   0x8   : > { %735 = vmatpush3.bf16.msra.mxu1 (!%p170_p2), %v767_v3  ;;  %705 = vmatprep.subr.bf16.mxu0 (!%p170_p2), %v768_v4  ;;  %v774_v10 = vld [vmem:[%s933_s1 + $0x58] sm:$0xff] (!%p170_p2)   ;;  %v777_v13 = vld [vmem:[%s933_s1 + $0x60] sm:$0xff] (!%p170_p2)   ;;  %v780_v16 = vld [vmem:[%s933_s1 + $0x68] sm:$0xff] (!%p170_p2)  }
   0x9   : > { %736 = vmatprep.subr.bf16.mxu1 (!%p170_p2), %v801_v1  ;;  %v775_v11 = vld [vmem:[%s933_s1 + $0x18] sm:$0xff] (!%p170_p2)   ;;  %v778_v14 = vld [vmem:[%s933_s1 + $0x20] sm:$0xff] (!%p170_p2)   ;;  %v781_v17 = vld [vmem:[%s933_s1 + $0x28] sm:$0xff] (!%p170_p2)  }
   0xa   : > { %v776_v12 = vld [vmem:[%s933_s1 + $0x98] sm:$0xff] (!%p170_p2)   ;;  %v779_v15 = vld [vmem:[%s933_s1 + $0xa0] sm:$0xff] (!%p170_p2)   ;;  %v782_v18 = vld [vmem:[%s933_s1 + $0xa8] sm:$0xff] (!%p170_p2)  }
   0xb   : > { %706 = vmatpush3.bf16.msra.mxu0 (!%p170_p2), %v769_v5  ;;  %v783_v19 = vld [vmem:[%s933_s1 + $0x70] sm:$0xff] (!%p170_p2)   ;;  %v786_v22 = vld [vmem:[%s933_s1 + $0x78] sm:$0xff] (!%p170_p2)  }
   0xc   : > { %737 = vmatpush3.bf16.msra.mxu1 (!%p170_p2), %v770_v6  ;;  %707 = vmatprep.subr.bf16.mxu0 (!%p170_p2), %v771_v7  ;;  %v784_v20 = vld [vmem:[%s933_s1 + $0x30] sm:$0xff] (!%p170_p2)   ;;  %v787_v24 = vld [vmem:[%s933_s1 + $0x38] sm:$0xff] (!%p170_p2)  }
   0xd   : > { %738 = vmatprep.subr.bf16.mxu1 %v801_v1  ;;  %s938_s7 = smov (!%p205_p3, %s659_s7), 3  ;;  %v785_v21 = vld [vmem:[%s933_s1 + $0xb0] sm:$0xff]   ;;  %v788_v25 = vld [vmem:[%s933_s1 + $0xb8] sm:$0xff]   ;;  %s940_s16 = smov (!%p217_p4, %s834_s16), 1 }
   0xe   : > { %s754_s28 = smul.u32 12, %s938_s7  ;;  %s662_s23 = sshll.u32 %s938_s7, 2 }
   0xf   : > { %708 = vmatpush3.bf16.msra.mxu0 %v772_v8  ;;  %s663_s24 = sshll.u32 %s940_s16, 3  ;;  %s215_s27 = scalar_lea.vmem %s934_s2, %s662_s23 }
  0x10   : > { %739 = vmatpush3.bf16.msra.mxu1 %v773_v9  ;;  %709 = vmatprep.subr.bf16.mxu0 %v774_v10  ;;  %s209_s12 = scalar_lea.vmem %s932_s0, %s754_s28  ;;  %s220_s30 = scalar_lea.vmem %s935_s3, %s663_s24 }
  0x11   : > { %740 = vmatprep.subr.bf16.mxu1 %v801_v1  ;;  %v791_v23 = vld [vmem:[%s209_s12 + $0x4] ss:$12 sps:$4 sm:$0xff]   ;;  %v789_v26 = vld [vmem:[%s209_s12] ss:$12 sps:$4 sm:$0xff]   ;;  %v792_v27 = vld [vmem:[%s209_s12 + $0x8] ss:$12 sps:$4 sm:$0xff]   ;;  %s224_s7 = scalar_lea.vmem %s936_s4, %s663_s24 }
  0x12   : > { %470 = vmatprep.mubr.bf16.mxu0 %v791_v23 }
  0x13   : > { %710 = vmatpush3.bf16.msra.mxu0 %v775_v11 }
  0x14   : > { %741 = vmatpush3.bf16.msra.mxu1 %v776_v12  ;;  %711 = vmatprep.subr.bf16.mxu0 %v777_v13 }
  0x15   : > { %742 = vmatprep.subr.bf16.mxu1 %v801_v1 }
  0x17   : > { %712 = vmatpush3.bf16.msra.mxu0 %v778_v14 }
  0x18   : > { %743 = vmatpush3.bf16.msra.mxu1 %v779_v15  ;;  %713 = vmatprep.subr.bf16.mxu0 %v780_v16 }
  0x19   : > { %744 = vmatprep.subr.bf16.mxu1 %v801_v1 }
  0x1b   : > { %714 = vmatpush3.bf16.msra.mxu0 %v781_v17 }
  0x1c   : > { %745 = vmatpush3.bf16.msra.mxu1 %v782_v18  ;;  %715 = vmatprep.subr.bf16.mxu0 %v783_v19 }
  0x1d   : > { %746 = vmatprep.subr.bf16.mxu1 %v801_v1 }
  0x1f   : > { %716 = vmatpush3.bf16.msra.mxu0 %v784_v20 }
  0x20   : > { %747 = vmatpush3.bf16.msra.mxu1 %v785_v21  ;;  %717 = vmatprep.subr.bf16.mxu0 %v786_v22 }
  0x21   : > { %748 = vmatprep.subr.bf16.mxu1 %v801_v1 }
  0x23   : > { %718 = vmatpush3.bf16.msra.mxu0 %v787_v24 }
  0x24   : > { %749 = vmatpush3.bf16.msra.mxu1 %v788_v25 }
  0x26   : > { %471 = vmatmul.mubr.bf16.vlgmr.msra.gmra.mrb[0].mxu0 %v789_v26 }
  0x27   : > { %751 = vmatmul.mubr.bf16.vlgmr.msra.gmra.mrb[0].mxu1 %v792_v27 }
  0xf9   : > { %v719_v28 = vpop.f32.mrb[0].mxu0 }
  0xfa   : > { %v513_v29 = vpop.f32.mrb[0].mxu1  ;;  %v720_v30 = vpop.f32.mrb[1].mxu0 }
  0xfb   : > { %v721_v31 = vadd.f32 %v720_v30, %v719_v28  ;;  %v752_v32 = vpop.f32.mrb[1].mxu1  ;;  %v722_v33 = vpop.f32.mrb[2].mxu0 }
  0xfc   : > { %v516_v34 = vpop.f32.mrb[2].mxu1  ;;  %v723_v35 = vpop.f32.mrb[3].mxu0 }
  0xfd   : > { %v514_v36 = vadd.f32 %v721_v31, %v513_v29  ;;  %v724_v37 = vadd.f32 %v723_v35, %v722_v33  ;;  %v753_v38 = vpop.f32.mrb[3].mxu1 }
  0xff   : > { %v517_v39 = vadd.f32 %v724_v37, %v516_v34  ;;  %v530_v40 = vmul.f32 %v514_v36, %v514_v36 }
 0x101   : > { %v701_v41 = vpack.c.bf16 %v517_v39, %v514_v36  ;;  %v531_v42 = vmul.f32 %v517_v39, %v517_v39  ;;  %v532_v43 = vadd.f32 %v517_v39, %v514_v36 }
 0x103   : > { %702 = vst [vmem:[%s215_s27] sm:$0xff] %v701_v41   ;;  %v533_v44 = vadd.f32 %v531_v42, %v530_v40  ;;  %534 = vst [vmem:[%s220_s30] sm:$0xff] %v532_v43 }
 0x105   : > { %535 = vst [vmem:[%s224_s7] sm:$0xff] %v533_v44 }
 0x106 PF: > { %s15_s15 = sadd.s32 1, %s799_s15  }
 0x107   : > { %p12_p5 = scmp.ge.s32.totalorder %s15_s15, 4  }
 0x109   :  { %14 = sbr.rel (!%p12_p5) target bundleno = 1 (0x1), region = 82 }

// kernel: resnet_generator_forward.34
= control target key start
LH: loop header
LB: loop body
LE: loop exit
PB: predicated region body
PF: predicated region fallthrough
CT: control target
= control target key end

     0   :  { %s584_s15 = smov 0   ;;  %s639_s0 = inlined_call_operand.vmem [shape: bf16[32,128], index: 0, kind: input, shape index: {}]   ;;  %s640_s1 = inlined_call_operand.vmem [shape: bf16[128,128], index: 1, kind: input, shape index: {}]   ;;  %s641_s2 = inlined_call_operand.vmem [shape: bf16[32,128], index: 2, kind: output, shape index: {0}]   ;;  %s642_s3 = inlined_call_operand.vmem [shape: f32[16,128], index: 3, kind: output, shape index: {1}]   ;;  %s643_s4 = inlined_call_operand.vmem [shape: f32[16,128], index: 4, kind: output, shape index: {2}]  }
   0x1 LB: > { %s590_s16 = sadd.s32 4294967295, %s555_s15   ;;  %p474_p0 = scmp.ge.s32.totalorder %s555_s15, 1  ;;  %s555_s15 = sphi %s584_s15, %s15_s15  }
   0x2   : > { %p168_p1 = scmp.lt.s32.totalorder %s555_s15, 3 }
   0x4   : > { %p169_p2 = pnand %p474_p0, %p168_p1 }
   0x5   : > { %v540_v0 = vld [vmem:[%s640_s1] sm:$0xff] (!%p169_p2)   ;;  %v557_v1 = vmov (!%p169_p2), 0.0   ;;  %v541_v2 = vld [vmem:[%s640_s1 + $0x8] sm:$0xff] (!%p169_p2)   ;;  %vm558_vm0 = vmmov (!%p169_p2), 0   ;;  %s475_s21 = sshll.u32 (!%p169_p2), %s590_s16, 1  ;;  %v542_v3 = vld [vmem:[%s640_s1 + $0x10] sm:$0xff] (!%p169_p2)  }
   0x6   : > { %172 = sbr.rel (%p169_p2) target bundleno = 257 (0x101), region = 28  ;;  %510 = vmatprep.subr.bf16.mxu0 (!%p169_p2), %v557_v1  ;;  %526 = vmatprep.mubr.msk.bf16.mxu0 (!%p169_p2), %vm558_vm0, %v557_v1  ;;  %p203_p3 = scmp.lt.s32.totalorder (!%p169_p2), %s475_s21, 3  ;;  %v543_v4 = vld [vmem:[%s640_s1 + $0x18] sm:$0xff] (!%p169_p2)   ;;  %v544_v5 = vld [vmem:[%s640_s1 + $0x20] sm:$0xff] (!%p169_p2)   ;;  %v545_v6 = vld [vmem:[%s640_s1 + $0x28] sm:$0xff] (!%p169_p2)  }
   0x7   : > { %511 = vmatpush3.bf16.msra.mxu0 (!%p169_p2), %v540_v0  ;;  %v546_v7 = vld [vmem:[%s640_s1 + $0x30] sm:$0xff] (!%p169_p2)   ;;  %v547_v8 = vld [vmem:[%s640_s1 + $0x38] sm:$0xff] (!%p169_p2)   ;;  %p214_p4 = scmp.lt.s32.totalorder (!%p169_p2), %s590_s16, 1 }
   0x8   : > { %512 = vmatprep.subr.bf16.mxu0 (!%p169_p2), %v557_v1 }
   0xb   : > { %513 = vmatpush3.bf16.msra.mxu0 (!%p169_p2), %v541_v2 }
   0xc   : > { %514 = vmatprep.subr.bf16.mxu0 (!%p169_p2), %v557_v1 }
   0xd   : > { %s645_s21 = smov (!%p203_p3, %s475_s21), 3  ;;  %s647_s16 = smov (!%p214_p4, %s590_s16), 1 }
   0xe   : > { %s476_s24 = sshll.u32 %s645_s21, 2  ;;  %s479_s12 = sshll.u32 %s647_s16, 3 }
   0xf   : > { %s206_s27 = scalar_lea.vmem %s639_s0, %s476_s24  ;;  %515 = vmatpush3.bf16.msra.mxu0 %v542_v3  ;;  %s212_s17 = scalar_lea.vmem %s641_s2, %s476_s24 }
  0x10   : > { %516 = vmatprep.subr.bf16.mxu0 %v557_v1  ;;  %v548_v9 = vld [vmem:[%s206_s27] sm:$0xff]   ;;  %s217_s20 = scalar_lea.vmem %s642_s3, %s479_s12  ;;  %s221_s16 = scalar_lea.vmem %s643_s4, %s479_s12 }
  0x13   : > { %517 = vmatpush3.bf16.msra.mxu0 %v543_v4 }
  0x14   : > { %518 = vmatprep.subr.bf16.mxu0 %v557_v1 }
  0x17   : > { %519 = vmatpush3.bf16.msra.mxu0 %v544_v5 }
  0x18   : > { %520 = vmatprep.subr.bf16.mxu0 %v557_v1 }
  0x1b   : > { %521 = vmatpush3.bf16.msra.mxu0 %v545_v6 }
  0x1c   : > { %522 = vmatprep.subr.bf16.mxu0 %v557_v1 }
  0x1f   : > { %523 = vmatpush3.bf16.msra.mxu0 %v546_v7 }
  0x20   : > { %524 = vmatprep.subr.bf16.mxu0 %v557_v1 }
  0x23   : > { %525 = vmatpush3.bf16.msra.mxu0 %v547_v8 }
  0x26   : > { %527 = vmatmul.mubr.bf16.vlgmr.msra.gmra.mrb[0].mxu0 %v548_v9 }
  0xf9   : > { %v329_v10 = vpop.f32.mrb[0].mxu0 }
  0xfa   : > { %v528_v11 = vpop.f32.mrb[1].mxu0  ;;  %v346_v13 = vmul.f32 %v329_v10, %v329_v10 }
  0xfb   : > { %v332_v12 = vpop.f32.mrb[2].mxu0 }
  0xfc   : > { %v499_v14 = vpack.c.bf16 %v332_v12, %v329_v10  ;;  %v347_v15 = vmul.f32 %v332_v12, %v332_v12  ;;  %v348_v16 = vadd.f32 %v332_v12, %v329_v10  ;;  %v529_v17 = vpop.f32.mrb[3].mxu0 }
  0xfe   : > { %500 = vst [vmem:[%s212_s17] sm:$0xff] %v499_v14   ;;  %v349_v18 = vadd.f32 %v347_v15, %v346_v13  ;;  %350 = vst [vmem:[%s217_s20] sm:$0xff] %v348_v16 }
 0x100   : > { %351 = vst [vmem:[%s221_s16] sm:$0xff] %v349_v18 }
 0x101 PF: > { %s15_s15 = sadd.s32 1, %s555_s15  }
 0x102   : > { %p12_p5 = scmp.ge.s32.totalorder %s15_s15, 4  }
 0x104   :  { %14 = sbr.rel (!%p12_p5) target bundleno = 1 (0x1), region = 82 }

// kernel: tile.38
= control target key start
LH: loop header
LB: loop body
LE: loop exit
PB: predicated region body
PF: predicated region fallthrough
CT: control target
= control target key end

     0   :  { %s22_s0 = inlined_call_operand.vmem [shape: f32[8], index: 0, kind: input, shape index: {}]   ;;  %s23_s1 = inlined_call_operand.vmem [shape: f32[4,8], index: 1, kind: output, shape index: {}]  }
   0x1   :  { %v4_v0 = vld [vmem:[%s22_s0] ss:$0 sm:$0xff] }
   0x2   :  { %5 = vst [vmem:[%s23_s1] sm:$0xf] %v4_v0 }

// kernel: tile.39
= control target key start
LH: loop header
LB: loop body
LE: loop exit
PB: predicated region body
PF: predicated region fallthrough
CT: control target
= control target key end

     0   :  { %vm7_vm0 = vcmask 64512   ;;  %s37_s8 = smov 8   ;;  %s38_s9 = smov 16   ;;  %vm13_vm1 = vcmask 261312   ;;  %vm19_vm2 = vcmask 195712   ;;  %vm25_vm3 = vcmask 130112   ;;  %s55_s0 = inlined_call_operand.vmem [shape: f32[4,8], index: 0, kind: input, shape index: {}]   ;;  %s56_s1 = inlined_call_operand.vmem [shape: f32[32], index: 1, kind: output, shape index: {}]  }
   0x1   :  { %v4_v0 = vld [vmem:[%s55_s0] sm:$0xf]  ;;  %s36_s0 = smov 24  }
   0x2   :  { %5 = vst [vmem:[#allocation1] sm:$0xf] %v4_v0 }
   0x9   :  { %v10_v1 = vld [vmem:[#allocation1 + $0x3] sm:$0x1]   ;;  %v22_v2 = vld [vmem:[#allocation1 + $0x1] sm:$0x1]   ;;  %v6_v3 = vld [vmem:[#allocation1] sm:$0x1]  }
   0xa   :  { %11 = vrot.lane.b32.xlu0 %v10_v1, %s36_s0  ;;  %23 = vrot.lane.b32.xlu1 %v22_v2, %s37_s8  ;;  %v16_v4 = vld [vmem:[#allocation1 + $0x2] sm:$0x1]   ;;  %8 = vst.msk [vmem:[#allocation0] sm:$0x1] %vm7_vm0, %v6_v3  }
   0xe   :  { %17 = vrot.lane.b32.xlu0 %v16_v4, %s38_s9 }
  0x7c   :  { %v12_v5 = vpop.permute.xlu0 %11   ;;  %v24_v6 = vpop.permute.xlu1 %23  }
  0x7d   :  { %14 = vst.msk [vmem:[#allocation0] sm:$0x1] %vm13_vm1, %v12_v5  }
  0x80   :  { %v18_v7 = vpop.permute.xlu0 %17  }
  0x81   :  { %20 = vst.msk [vmem:[#allocation0] sm:$0x1] %vm19_vm2, %v18_v7  }
  0x82   :  { %26 = vst.msk [vmem:[#allocation0] sm:$0x1] %vm25_vm3, %v24_v6  }
  0x89   :  { %v30_v8 = vld [vmem:[#allocation0] sm:$0x1] }
  0x8a   :  { %32 = vst [vmem:[%s56_s1] sm:$0x1] %v30_v8 }

// kernel: resnet_generator_forward.39
= control target key start
LH: loop header
LB: loop body
LE: loop exit
PB: predicated region body
PF: predicated region fallthrough
CT: control target
= control target key end

     0   :  { %s628_s12 = smov 0   ;;  %s775_s0 = inlined_call_operand.vmem [shape: bf16[512,128], index: 0, kind: input, shape index: {}]   ;;  %s776_s1 = inlined_call_operand.vmem [shape: f32[1,128], index: 1, kind: input, shape index: {}]   ;;  %s777_s2 = inlined_call_operand.vmem [shape: f32[1,128], index: 2, kind: input, shape index: {}]   ;;  %s778_s3 = inlined_call_operand.vmem [shape: f32[512,128], index: 3, kind: output, shape index: {}]  }
   0x1 LB: > { %s436_s13 = sadd.s32 4294967295, %s606_s12   ;;  %p440_p0 = scmp.ge.s32.totalorder %s606_s12, 1  ;;  %s606_s12 = sphi %s628_s12, %s13_s12  }
   0x2   : > { %p138_p1 = scmp.lt.s32.totalorder %s606_s12, 3 }
   0x4   : > { %p139_p2 = pnand %p440_p0, %p138_p1 }
   0x5   : > { %s441_s14 = sshll.u32 (!%p139_p2), %s436_s13, 5  ;;  %v647_v0 = vld [vmem:[%s776_s1] ss:$0 sm:$0xff] (!%p139_p2) }
   0x6   : > { %142 = sbr.rel (%p139_p2) target bundleno = 66 (0x42), region = 32  ;;  %p163_p3 = scmp.lt.s32.totalorder (!%p139_p2), %s441_s14, 63  ;;  %v656_v9 = vld [vmem:[%s777_s2] ss:$0 sm:$0xff] (!%p139_p2) }
   0xd   : > { %s780_s14 = smov (!%p163_p3, %s441_s14), 63 }
   0xe   : > { %s442_s15 = sshll.u32 %s780_s14, 2  ;;  %s444_s23 = sshll.u32 %s780_s14, 3 }
   0xf   : > { %s642_s18 = scalar_lea.vmem %s775_s0, %s442_s15  ;;  %s695_s26 = scalar_lea.vmem %s778_s3, %s444_s23 }
  0x10   : > { %v450_v1 = vld [vmem:[%s642_s18] sm:$0xff]   ;;  %v513_v2 = vld [vmem:[%s642_s18 + $0x8] sm:$0xff]   ;;  %v514_v3 = vld [vmem:[%s642_s18 + $0x10] sm:$0xff]  }
  0x11   : > { %v451_v4 = vunpack.c.l.bf16 %v450_v1  ;;  %v452_v5 = vunpack.c.h.bf16 %v450_v1  ;;  %v455_v6 = vunpack.c.l.bf16 %v513_v2  ;;  %v456_v7 = vunpack.c.h.bf16 %v513_v2  ;;  %v515_v8 = vld [vmem:[%s642_s18 + $0x18] sm:$0xff]   ;;  %v516_v21 = vld [vmem:[%s642_s18 + $0x20] sm:$0xff]   ;;  %v517_v22 = vld [vmem:[%s642_s18 + $0x28] sm:$0xff]  }
  0x12   : > { %v459_v10 = vunpack.c.l.bf16 %v514_v3  ;;  %v460_v11 = vunpack.c.h.bf16 %v514_v3  ;;  %v463_v12 = vunpack.c.l.bf16 %v515_v8  ;;  %v464_v13 = vunpack.c.h.bf16 %v515_v8  ;;  %v518_v27 = vld [vmem:[%s642_s18 + $0x30] sm:$0xff]   ;;  %v519_v44 = vld [vmem:[%s642_s18 + $0x38] sm:$0xff]   ;;  %v520_v45 = vld [vmem:[%s642_s18 + $0x40] sm:$0xff]  }
  0x13   : > { %v245_v14 = vmul.f32 %v451_v4, %v647_v0  ;;  %v246_v15 = vmul.f32 %v452_v5, %v647_v0  ;;  %v247_v16 = vmul.f32 %v455_v6, %v647_v0  ;;  %v248_v17 = vmul.f32 %v456_v7, %v647_v0  ;;  %v521_v49 = vld [vmem:[%s642_s18 + $0x48] sm:$0xff]   ;;  %v522_v2 = vld [vmem:[%s642_s18 + $0x50] sm:$0xff]   ;;  %v523_v3 = vld [vmem:[%s642_s18 + $0x58] sm:$0xff]  }
  0x14   : > { %v249_v18 = vmul.f32 %v459_v10, %v647_v0  ;;  %v250_v19 = vmul.f32 %v460_v11, %v647_v0  ;;  %v251_v20 = vmul.f32 %v463_v12, %v647_v0  ;;  %v252_v26 = vmul.f32 %v464_v13, %v647_v0  ;;  %v524_v8 = vld [vmem:[%s642_s18 + $0x60] sm:$0xff]  }
  0x15   : > { %v284_v23 = vadd.f32 %v656_v9, %v245_v14  ;;  %v285_v24 = vadd.f32 %v656_v9, %v246_v15  ;;  %v286_v25 = vadd.f32 %v656_v9, %v247_v16  ;;  %v287_v28 = vadd.f32 %v656_v9, %v248_v17 }
  0x16   : > { %v288_v29 = vadd.f32 %v656_v9, %v249_v18  ;;  %v289_v30 = vadd.f32 %v656_v9, %v250_v19  ;;  %v290_v31 = vadd.f32 %v656_v9, %v251_v20  ;;  %v467_v32 = vunpack.c.l.bf16 %v516_v21 }
  0x17   : > { %536 = vtanh.f32 %v284_v23  ;;  %v468_v33 = vunpack.c.h.bf16 %v516_v21  ;;  %v471_v34 = vunpack.c.l.bf16 %v517_v22  ;;  %v472_v35 = vunpack.c.h.bf16 %v517_v22 }
  0x18   : > { %538 = vtanh.f32 %v285_v24  ;;  %v475_v36 = vunpack.c.l.bf16 %v518_v27  ;;  %v476_v37 = vunpack.c.h.bf16 %v518_v27  ;;  %v253_v38 = vmul.f32 %v467_v32, %v647_v0 }
  0x19   : > { %540 = vtanh.f32 %v286_v25  ;;  %v254_v39 = vmul.f32 %v468_v33, %v647_v0  ;;  %v255_v40 = vmul.f32 %v471_v34, %v647_v0  ;;  %v291_v41 = vadd.f32 %v656_v9, %v252_v26 }
  0x1a   : > { %542 = vtanh.f32 %v287_v28  ;;  %v256_v42 = vmul.f32 %v472_v35, %v647_v0  ;;  %v257_v43 = vmul.f32 %v475_v36, %v647_v0  ;;  %v292_v46 = vadd.f32 %v656_v9, %v253_v38  ;;  %v527_v36 = vld [vmem:[%s642_s18 + $0x78] sm:$0xff]  }
  0x1b   : > { %544 = vtanh.f32 %v288_v29  ;;  %v293_v47 = vadd.f32 %v656_v9, %v254_v39  ;;  %v258_v48 = vmul.f32 %v476_v37, %v647_v0  ;;  %v294_v50 = vadd.f32 %v656_v9, %v255_v40 }
  0x1c   : > { %546 = vtanh.f32 %v289_v30  ;;  %v295_v51 = vadd.f32 %v656_v9, %v256_v42  ;;  %v296_v52 = vadd.f32 %v656_v9, %v257_v43  ;;  %v479_v53 = vunpack.c.l.bf16 %v519_v44  ;;  %v525_v30 = vld [vmem:[%s642_s18 + $0x68] sm:$0xff]  }
  0x1d   : > { %548 = vtanh.f32 %v290_v31  ;;  %v480_v54 = vunpack.c.h.bf16 %v519_v44  ;;  %v483_v55 = vunpack.c.l.bf16 %v520_v45  ;;  %v484_v56 = vunpack.c.h.bf16 %v520_v45  ;;  %v526_v31 = vld [vmem:[%s642_s18 + $0x70] sm:$0xff]  }
  0x1e   : > { %550 = vtanh.f32 %v291_v41  ;;  %v487_v57 = vunpack.c.l.bf16 %v521_v49  ;;  %v488_v58 = vunpack.c.h.bf16 %v521_v49  ;;  %v259_v59 = vmul.f32 %v479_v53, %v647_v0 }
  0x1f   : > { %552 = vtanh.f32 %v292_v46  ;;  %v260_v60 = vmul.f32 %v480_v54, %v647_v0  ;;  %v261_v61 = vmul.f32 %v483_v55, %v647_v0  ;;  %v297_v62 = vadd.f32 %v656_v9, %v258_v48 }
  0x20   : > { %554 = vtanh.f32 %v293_v47  ;;  %v262_v63 = vmul.f32 %v484_v56, %v647_v0  ;;  %v263_v1 = vmul.f32 %v487_v57, %v647_v0  ;;  %v298_v5 = vadd.f32 %v656_v9, %v259_v59 }
  0x21   : > { %v537_v4 = vpop.eup %536  ;;  %556 = vtanh.f32 %v294_v50  ;;  %v299_v6 = vadd.f32 %v656_v9, %v260_v60  ;;  %v264_v7 = vmul.f32 %v488_v58, %v647_v0  ;;  %v300_v11 = vadd.f32 %v656_v9, %v261_v61 }
  0x22   : > { %v539_v10 = vpop.eup %538  ;;  %348 = vst [vmem:[%s695_s26] sm:$0xff] %v537_v4  ;;  %558 = vtanh.f32 %v295_v51  ;;  %v301_v12 = vadd.f32 %v656_v9, %v262_v63  ;;  %v302_v13 = vadd.f32 %v656_v9, %v263_v1  ;;  %v491_v15 = vunpack.c.l.bf16 %v522_v2 }
  0x23   : > { %v541_v14 = vpop.eup %540  ;;  %349 = vst [vmem:[%s695_s26 + $0x8] sm:$0xff] %v539_v10  ;;  %560 = vtanh.f32 %v296_v52  ;;  %v492_v16 = vunpack.c.h.bf16 %v522_v2  ;;  %v495_v17 = vunpack.c.l.bf16 %v523_v3  ;;  %v496_v19 = vunpack.c.h.bf16 %v523_v3 }
  0x24   : > { %v543_v18 = vpop.eup %542  ;;  %350 = vst [vmem:[%s695_s26 + $0x10] sm:$0xff] %v541_v14  ;;  %562 = vtanh.f32 %v297_v62  ;;  %v499_v20 = vunpack.c.l.bf16 %v524_v8  ;;  %v500_v21 = vunpack.c.h.bf16 %v524_v8  ;;  %v265_v23 = vmul.f32 %v491_v15, %v647_v0 }
  0x25   : > { %v545_v22 = vpop.eup %544  ;;  %351 = vst [vmem:[%s695_s26 + $0x18] sm:$0xff] %v543_v18  ;;  %564 = vtanh.f32 %v298_v5  ;;  %v266_v24 = vmul.f32 %v492_v16, %v647_v0  ;;  %v267_v25 = vmul.f32 %v495_v17, %v647_v0  ;;  %v303_v27 = vadd.f32 %v656_v9, %v264_v7 }
  0x26   : > { %v547_v26 = vpop.eup %546  ;;  %352 = vst [vmem:[%s695_s26 + $0x20] sm:$0xff] %v545_v22  ;;  %566 = vtanh.f32 %v299_v6  ;;  %v268_v28 = vmul.f32 %v496_v19, %v647_v0  ;;  %v269_v29 = vmul.f32 %v499_v20, %v647_v0  ;;  %v304_v33 = vadd.f32 %v656_v9, %v265_v23 }
  0x27   : > { %v549_v32 = vpop.eup %548  ;;  %353 = vst [vmem:[%s695_s26 + $0x28] sm:$0xff] %v547_v26  ;;  %568 = vtanh.f32 %v300_v11  ;;  %v305_v34 = vadd.f32 %v656_v9, %v266_v24  ;;  %v270_v35 = vmul.f32 %v500_v21, %v647_v0  ;;  %v306_v38 = vadd.f32 %v656_v9, %v267_v25 }
  0x28   : > { %v551_v37 = vpop.eup %550  ;;  %354 = vst [vmem:[%s695_s26 + $0x30] sm:$0xff] %v549_v32  ;;  %570 = vtanh.f32 %v301_v12  ;;  %v307_v39 = vadd.f32 %v656_v9, %v268_v28  ;;  %v308_v40 = vadd.f32 %v656_v9, %v269_v29  ;;  %v503_v42 = vunpack.c.l.bf16 %v525_v30 }
  0x29   : > { %v553_v41 = vpop.eup %552  ;;  %355 = vst [vmem:[%s695_s26 + $0x38] sm:$0xff] %v551_v37  ;;  %572 = vtanh.f32 %v302_v13  ;;  %v504_v43 = vunpack.c.h.bf16 %v525_v30  ;;  %v507_v44 = vunpack.c.l.bf16 %v526_v31  ;;  %v508_v46 = vunpack.c.h.bf16 %v526_v31 }
  0x2a   : > { %v555_v45 = vpop.eup %554  ;;  %356 = vst [vmem:[%s695_s26 + $0x40] sm:$0xff] %v553_v41  ;;  %574 = vtanh.f32 %v303_v27  ;;  %v511_v47 = vunpack.c.l.bf16 %v527_v36  ;;  %v512_v48 = vunpack.c.h.bf16 %v527_v36  ;;  %v271_v50 = vmul.f32 %v503_v42, %v647_v0 }
  0x2b   : > { %v557_v49 = vpop.eup %556  ;;  %357 = vst [vmem:[%s695_s26 + $0x48] sm:$0xff] %v555_v45  ;;  %576 = vtanh.f32 %v304_v33  ;;  %v272_v51 = vmul.f32 %v504_v43, %v647_v0  ;;  %v273_v52 = vmul.f32 %v507_v44, %v647_v0  ;;  %v309_v54 = vadd.f32 %v656_v9, %v270_v35 }
  0x2c   : > { %v559_v53 = vpop.eup %558  ;;  %358 = vst [vmem:[%s695_s26 + $0x50] sm:$0xff] %v557_v49  ;;  %578 = vtanh.f32 %v305_v34  ;;  %v274_v55 = vmul.f32 %v508_v46, %v647_v0  ;;  %v310_v57 = vadd.f32 %v656_v9, %v271_v50  ;;  %v275_v58 = vmul.f32 %v511_v47, %v647_v0 }
  0x2d   : > { %v561_v56 = vpop.eup %560  ;;  %359 = vst [vmem:[%s695_s26 + $0x58] sm:$0xff] %v559_v53  ;;  %580 = vtanh.f32 %v306_v38  ;;  %v311_v60 = vadd.f32 %v656_v9, %v272_v51  ;;  %v276_v61 = vmul.f32 %v512_v48, %v647_v0  ;;  %v312_v63 = vadd.f32 %v656_v9, %v273_v52 }
  0x2e   : > { %v563_v59 = vpop.eup %562  ;;  %360 = vst [vmem:[%s695_s26 + $0x60] sm:$0xff] %v561_v56  ;;  %582 = vtanh.f32 %v307_v39  ;;  %v313_v2 = vadd.f32 %v656_v9, %v274_v55  ;;  %v314_v4 = vadd.f32 %v656_v9, %v275_v58 }
  0x2f   : > { %v565_v62 = vpop.eup %564  ;;  %361 = vst [vmem:[%s695_s26 + $0x68] sm:$0xff] %v563_v59  ;;  %584 = vtanh.f32 %v308_v40  ;;  %v315_v5 = vadd.f32 %v656_v9, %v276_v61 }
  0x30   : > { %v567_v1 = vpop.eup %566  ;;  %362 = vst [vmem:[%s695_s26 + $0x70] sm:$0xff] %v565_v62  ;;  %586 = vtanh.f32 %v309_v54 }
  0x31   : > { %v569_v3 = vpop.eup %568  ;;  %363 = vst [vmem:[%s695_s26 + $0x78] sm:$0xff] %v567_v1  ;;  %588 = vtanh.f32 %v310_v57 }
  0x32   : > { %v571_v0 = vpop.eup %570  ;;  %364 = vst [vmem:[%s695_s26 + $0x80] sm:$0xff] %v569_v3  ;;  %590 = vtanh.f32 %v311_v60 }
  0x33   : > { %v573_v6 = vpop.eup %572  ;;  %365 = vst [vmem:[%s695_s26 + $0x88] sm:$0xff] %v571_v0  ;;  %592 = vtanh.f32 %v312_v63 }
  0x34   : > { %v575_v7 = vpop.eup %574  ;;  %366 = vst [vmem:[%s695_s26 + $0x90] sm:$0xff] %v573_v6  ;;  %594 = vtanh.f32 %v313_v2 }
  0x35   : > { %v577_v8 = vpop.eup %576  ;;  %367 = vst [vmem:[%s695_s26 + $0x98] sm:$0xff] %v575_v7  ;;  %596 = vtanh.f32 %v314_v4 }
  0x36   : > { %v579_v10 = vpop.eup %578  ;;  %368 = vst [vmem:[%s695_s26 + $0xa0] sm:$0xff] %v577_v8  ;;  %598 = vtanh.f32 %v315_v5 }
  0x37   : > { %v581_v9 = vpop.eup %580  ;;  %369 = vst [vmem:[%s695_s26 + $0xa8] sm:$0xff] %v579_v10 }
  0x38   : > { %v583_v11 = vpop.eup %582  ;;  %370 = vst [vmem:[%s695_s26 + $0xb0] sm:$0xff] %v581_v9 }
  0x39   : > { %v585_v12 = vpop.eup %584  ;;  %371 = vst [vmem:[%s695_s26 + $0xb8] sm:$0xff] %v583_v11 }
  0x3a   : > { %v587_v13 = vpop.eup %586  ;;  %372 = vst [vmem:[%s695_s26 + $0xc0] sm:$0xff] %v585_v12 }
  0x3b   : > { %v589_v14 = vpop.eup %588  ;;  %373 = vst [vmem:[%s695_s26 + $0xc8] sm:$0xff] %v587_v13 }
  0x3c   : > { %v591_v15 = vpop.eup %590  ;;  %374 = vst [vmem:[%s695_s26 + $0xd0] sm:$0xff] %v589_v14 }
  0x3d   : > { %v593_v16 = vpop.eup %592  ;;  %375 = vst [vmem:[%s695_s26 + $0xd8] sm:$0xff] %v591_v15 }
  0x3e   : > { %v595_v17 = vpop.eup %594  ;;  %376 = vst [vmem:[%s695_s26 + $0xe0] sm:$0xff] %v593_v16 }
  0x3f   : > { %v597_v18 = vpop.eup %596  ;;  %377 = vst [vmem:[%s695_s26 + $0xe8] sm:$0xff] %v595_v17 }
  0x40   : > { %v599_v19 = vpop.eup %598  ;;  %378 = vst [vmem:[%s695_s26 + $0xf0] sm:$0xff] %v597_v18 }
  0x41   : > { %379 = vst [vmem:[%s695_s26 + $0xf8] sm:$0xff] %v599_v19 }
  0x42 PF: > { %s13_s12 = sadd.s32 1, %s606_s12  }
  0x43   : > { %p10_p4 = scmp.ge.s32.totalorder %s13_s12, 4  }
  0x45   :  { %12 = sbr.rel (!%p10_p4) target bundleno = 1 (0x1), region = 62 }

// kernel: resnet_generator_forward.38
= control target key start
LH: loop header
LB: loop body
LE: loop exit
PB: predicated region body
PF: predicated region fallthrough
CT: control target
= control target key end

     0   :  { %10 = vsyncpa [#allocation3], 0  ;;  %s2716_s0 = inlined_call_operand.vmem [shape: bf16[512,512], index: 0, kind: input, shape index: {}]   ;;  %s2717_s1 = inlined_call_operand.vmem [shape: bf16[512,128], index: 1, kind: input, shape index: {}]   ;;  %s2718_s2 = inlined_call_operand.vmem [shape: bf16[512,128], index: 2, kind: output, shape index: {0}]   ;;  %s2719_s3 = inlined_call_operand.hbm [shape: f32[16,128], index: 3, kind: output, shape index: {1}]   ;;  %s2720_s4 = inlined_call_operand.hbm [shape: f32[16,128], index: 4, kind: output, shape index: {2}]  }
   0x1   :  { %12 = vsyncpa [#allocation3 + $0x1], 0 }
   0x2   :  { %13 = vsyncpa [#allocation5], 0 }
   0x3   :  { %15 = vsyncpa [#allocation5 + $0x1], 0  ;;  %s2393_s15 = smov 0   ;;  %s2395_s16 = smov 0  }
   0x4   :  { %s2397_s17 = smov 0   ;;  %s2399_s18 = smov 0  }
   0x5 LB: > { %s2414_s19 = sadd.s32 4294967295, %s2364_s18   ;;  %s1601_s20 = sadd.s32 4294967294, %s2364_s18   ;;  %s2364_s18 = sphi %s2399_s18, %s2726_s18   ;;  %s2360_s17 = sphi %s2397_s17, %s2725_s17   ;;  %s2356_s16 = sphi %s2395_s16, %s2724_s16   ;;  %s2352_s15 = sphi %s2393_s15, %s2723_s15  }
   0x6   : > { %s2418_s21 = sadd.s32 1, %s2364_s18   ;;  %s101_s22 = sadd.s32 1, %s2360_s17 }
   0x7   : > { %s98_s23 = ssub.s32 %s2364_s18, %s2418_s21  ;;  %p111_p0 = scmp.ne.s32.totalorder %s2360_s17, %s2356_s16 }
   0x8   : > { %p99_p1 = scmp.eq.s32.totalorder %s98_s23, 0  ;;  %p112_p2 = scmp.eq.s32.totalorder %s2414_s19, 1 }
   0x9   : > { %p117_p3 = scmp.ne.s32.totalorder %s2356_s16, %s2352_s15  ;;  %p118_p4 = scmp.eq.s32.totalorder %s1601_s20, 1 }
   0xa   : > { %s2429_s24 = scalar_select %p99_p1, %s2360_s17, %s101_s22  }
   0xb   : > { %p2431_p5 = por %p112_p2, %p111_p0  ;;  %p2435_p6 = por %p118_p4, %p117_p3 }
   0xc   : > { %p1604_p7 = scmp.ge.s32.totalorder %s2364_s18, 1  ;;  %p175_p8 = scmp.lt.s32.totalorder %s2364_s18, 3 }
   0xe   : > { %p176_p9 = pnand %p1604_p7, %p175_p8 }
   0xf   : > { %v2142_v0 = vld [vmem:[%s2717_s1 + $0x40] sm:$0xff] (!%p176_p9)   ;;  %v2146_v4 = vld [vmem:[%s2717_s1 + $0x48] sm:$0xff] (!%p176_p9)   ;;  %v2150_v8 = vld [vmem:[%s2717_s1 + $0x50] sm:$0xff] (!%p176_p9)   ;;  %s1607_s22 = sshll.u32 (!%p176_p9), %s2414_s19, 5  ;;  %s1742_s9 = sshll.u32 (!%p176_p9), %s2414_s19, 7 }
  0x10   : > { %179 = sbr.rel (%p176_p9) target bundleno = 428 (0x1ac), region = 28  ;;  %v2143_v1 = vld [vmem:[%s2717_s1 + $0xc0] sm:$0xff] (!%p176_p9)   ;;  %1874 = vmatprep.subr.bf16.mxu0 (!%p176_p9), %v2142_v0  ;;  %v2147_v5 = vld [vmem:[%s2717_s1 + $0xc8] sm:$0xff] (!%p176_p9)   ;;  %v2151_v9 = vld [vmem:[%s2717_s1 + $0xd0] sm:$0xff] (!%p176_p9)   ;;  %p213_p10 = scmp.lt.s32.totalorder (!%p176_p9), %s1607_s22, 63 }
  0x11   : > { %v2144_v2 = vld [vmem:[%s2717_s1] sm:$0xff] (!%p176_p9)   ;;  %1986 = vmatprep.subr.bf16.mxu1 (!%p176_p9), %v2143_v1  ;;  %v2148_v6 = vld [vmem:[%s2717_s1 + $0x8] sm:$0xff] (!%p176_p9)   ;;  %v2152_v10 = vld [vmem:[%s2717_s1 + $0x10] sm:$0xff] (!%p176_p9)   ;;  %s2642_s23 = scalar_lea.hbm (!%p176_p9), %s2719_s3, %s1742_s9  ;;  %s2650_s28 = scalar_lea.hbm (!%p176_p9), %s2720_s4, %s1742_s9 }
  0x12   : > { %v2145_v3 = vld [vmem:[%s2717_s1 + $0x80] sm:$0xff] (!%p176_p9)   ;;  %1875 = vmatpush3.bf16.msra.mxu0 (!%p176_p9), %v2144_v2  ;;  %v2149_v7 = vld [vmem:[%s2717_s1 + $0x88] sm:$0xff] (!%p176_p9)   ;;  %v2153_v11 = vld [vmem:[%s2717_s1 + $0x90] sm:$0xff] (!%p176_p9)   ;;  %s2366_s5 = smov (!%p176_p9), [#allocation2]  }
  0x13   : > { %1987 = vmatpush3.bf16.msra.mxu1 (!%p176_p9), %v2145_v3  ;;  %1876 = vmatprep.subr.bf16.mxu0 (!%p176_p9), %v2146_v4  ;;  %v2154_v12 = vld [vmem:[%s2717_s1 + $0x58] sm:$0xff] (!%p176_p9)   ;;  %v2158_v16 = vld [vmem:[%s2717_s1 + $0x60] sm:$0xff] (!%p176_p9)   ;;  %v2162_v20 = vld [vmem:[%s2717_s1 + $0x68] sm:$0xff] (!%p176_p9)  }
  0x14   : > { %1988 = vmatprep.subr.bf16.mxu1 (!%p176_p9), %v2147_v5  ;;  %v2155_v13 = vld [vmem:[%s2717_s1 + $0xd8] sm:$0xff] (!%p176_p9)   ;;  %v2159_v17 = vld [vmem:[%s2717_s1 + $0xe0] sm:$0xff] (!%p176_p9)   ;;  %v2163_v21 = vld [vmem:[%s2717_s1 + $0xe8] sm:$0xff] (!%p176_p9)  }
  0x15   : > { %v2156_v14 = vld [vmem:[%s2717_s1 + $0x18] sm:$0xff] (!%p176_p9)   ;;  %v2160_v18 = vld [vmem:[%s2717_s1 + $0x20] sm:$0xff] (!%p176_p9)   ;;  %v2164_v22 = vld [vmem:[%s2717_s1 + $0x28] sm:$0xff] (!%p176_p9)  }
  0x16   : > { %1877 = vmatpush3.bf16.msra.mxu0 (!%p176_p9), %v2148_v6  ;;  %v2157_v15 = vld [vmem:[%s2717_s1 + $0x98] sm:$0xff] (!%p176_p9)   ;;  %v2161_v19 = vld [vmem:[%s2717_s1 + $0xa0] sm:$0xff] (!%p176_p9)   ;;  %v2165_v23 = vld [vmem:[%s2717_s1 + $0xa8] sm:$0xff] (!%p176_p9)  }
  0x17   : > { %1989 = vmatpush3.bf16.msra.mxu1 %v2149_v7  ;;  %1878 = vmatprep.subr.bf16.mxu0 %v2150_v8  ;;  %s2728_s22 = smov (!%p213_p10, %s1607_s22), 63  ;;  %v2166_v24 = vld [vmem:[%s2717_s1 + $0x70] sm:$0xff]   ;;  %v2170_v28 = vld [vmem:[%s2717_s1 + $0x78] sm:$0xff]  }
  0x18   : > { %1990 = vmatprep.subr.bf16.mxu1 %v2151_v9  ;;  %v2167_v25 = vld [vmem:[%s2717_s1 + $0xf0] sm:$0xff]   ;;  %s1746_s6 = sshll.u32 %s2728_s22, 4  ;;  %v2171_v29 = vld [vmem:[%s2717_s1 + $0xf8] sm:$0xff]   ;;  %s1611_s30 = sshll.u32 %s2728_s22, 2 }
  0x19   : > { %v2168_v26 = vld [vmem:[%s2717_s1 + $0x30] sm:$0xff]   ;;  %s2538_s20 = scalar_lea.vmem %s2716_s0, %s1746_s6  ;;  %v2172_v30 = vld [vmem:[%s2717_s1 + $0x38] sm:$0xff]   ;;  %s2614_s7 = scalar_lea.vmem %s2718_s2, %s1611_s30 }
  0x1a   : > { %1879 = vmatpush3.bf16.msra.mxu0 %v2152_v10  ;;  %v2169_v27 = vld [vmem:[%s2717_s1 + $0xb0] sm:$0xff]   ;;  %v2173_v31 = vld [vmem:[%s2717_s1 + $0xb8] sm:$0xff]   ;;  %s2631_s22 = sand.u32 1, %s2356_s16   ;;  %s2274_s6 = sshll.u32 %s2366_s5, 4  ;;  %s2275_s6 = int_to_ptr.vmem [resolvable:$false] %s2274_s6 }
  0x1b   : > { %1991 = vmatpush3.bf16.msra.mxu1 %v2153_v11  ;;  %1880 = vmatprep.subr.bf16.mxu0 %v2154_v12  ;;  %v2174_v32 = vld [vmem:[%s2538_s20] ss:$16 sps:$4 sm:$0xff]   ;;  %v2176_v33 = vld [vmem:[%s2538_s20 + $0x4] ss:$16 sps:$4 sm:$0xff]   ;;  %v2177_v34 = vld [vmem:[%s2538_s20 + $0x8] ss:$16 sps:$4 sm:$0xff]  }
  0x1c   : > { %1992 = vmatprep.subr.bf16.mxu1 %v2155_v13  ;;  %v2179_v35 = vld [vmem:[%s2538_s20 + $0xc] ss:$16 sps:$4 sm:$0xff]   ;;  %898 = vmatprep.mubr.bf16.mxu0 %v2176_v33  ;;  %v2180_v36 = vld [vmem:[%s2538_s20 + $0x24] ss:$16 sps:$4 sm:$0xff]   ;;  %v2184_v38 = vld [vmem:[%s2538_s20 + $0x20] ss:$16 sps:$4 sm:$0xff]  }
  0x1d   : > { %1059 = vmatprep.mubr.bf16.mxu1 %v2179_v35  ;;  %v2182_v37 = vld [vmem:[%s2538_s20 + $0x2c] ss:$16 sps:$4 sm:$0xff]   ;;  %v2185_v39 = vld [vmem:[%s2538_s20 + $0x28] ss:$16 sps:$4 sm:$0xff]   ;;  %v2186_v40 = vld [vmem:[%s2538_s20 + $0x44] ss:$16 sps:$4 sm:$0xff]  }
  0x1e   : > { %1881 = vmatpush3.bf16.msra.mxu0 %v2156_v14  ;;  %v2188_v41 = vld [vmem:[%s2538_s20 + $0x4c] ss:$16 sps:$4 sm:$0xff]   ;;  %v2190_v42 = vld [vmem:[%s2538_s20 + $0x40] ss:$16 sps:$4 sm:$0xff]   ;;  %v2191_v43 = vld [vmem:[%s2538_s20 + $0x48] ss:$16 sps:$4 sm:$0xff]  }
  0x1f   : > { %1993 = vmatpush3.bf16.msra.mxu1 %v2157_v15  ;;  %1882 = vmatprep.subr.bf16.mxu0 %v2158_v16  ;;  %v2192_v44 = vld [vmem:[%s2538_s20 + $0x64] ss:$16 sps:$4 sm:$0xff]   ;;  %v2194_v45 = vld [vmem:[%s2538_s20 + $0x6c] ss:$16 sps:$4 sm:$0xff]   ;;  %v2196_v46 = vld [vmem:[%s2538_s20 + $0x60] ss:$16 sps:$4 sm:$0xff]  }
  0x20   : > { %1994 = vmatprep.subr.bf16.mxu1 %v2159_v17  ;;  %v2197_v47 = vld [vmem:[%s2538_s20 + $0x68] ss:$16 sps:$4 sm:$0xff]   ;;  %v2198_v48 = vld [vmem:[%s2538_s20 + $0x84] ss:$16 sps:$4 sm:$0xff]   ;;  %v2200_v49 = vld [vmem:[%s2538_s20 + $0x8c] ss:$16 sps:$4 sm:$0xff]  }
  0x21   : > { %v2202_v50 = vld [vmem:[%s2538_s20 + $0x80] ss:$16 sps:$4 sm:$0xff]   ;;  %v2203_v51 = vld [vmem:[%s2538_s20 + $0x88] ss:$16 sps:$4 sm:$0xff]   ;;  %v2204_v52 = vld [vmem:[%s2538_s20 + $0xa4] ss:$16 sps:$4 sm:$0xff]  }
  0x22   : > { %1883 = vmatpush3.bf16.msra.mxu0 %v2160_v18  ;;  %v2206_v53 = vld [vmem:[%s2538_s20 + $0xac] ss:$16 sps:$4 sm:$0xff]   ;;  %v2208_v54 = vld [vmem:[%s2538_s20 + $0xa0] ss:$16 sps:$4 sm:$0xff]   ;;  %v2209_v55 = vld [vmem:[%s2538_s20 + $0xa8] ss:$16 sps:$4 sm:$0xff]  }
  0x23   : > { %1995 = vmatpush3.bf16.msra.mxu1 %v2161_v19  ;;  %1884 = vmatprep.subr.bf16.mxu0 %v2162_v20  ;;  %v2210_v56 = vld [vmem:[%s2538_s20 + $0xc4] ss:$16 sps:$4 sm:$0xff]   ;;  %v2212_v57 = vld [vmem:[%s2538_s20 + $0xcc] ss:$16 sps:$4 sm:$0xff]   ;;  %v2214_v58 = vld [vmem:[%s2538_s20 + $0xc0] ss:$16 sps:$4 sm:$0xff]  }
  0x24   : > { %1996 = vmatprep.subr.bf16.mxu1 %v2163_v21  ;;  %v2215_v59 = vld [vmem:[%s2538_s20 + $0xc8] ss:$16 sps:$4 sm:$0xff]   ;;  %v2216_v60 = vld [vmem:[%s2538_s20 + $0xe4] ss:$16 sps:$4 sm:$0xff]   ;;  %v2218_v61 = vld [vmem:[%s2538_s20 + $0xec] ss:$16 sps:$4 sm:$0xff]  }
  0x25   : > { %v2220_v62 = vld [vmem:[%s2538_s20 + $0xe0] ss:$16 sps:$4 sm:$0xff]   ;;  %v2221_v63 = vld [vmem:[%s2538_s20 + $0xe8] ss:$16 sps:$4 sm:$0xff]   ;;  %v2222_v0 = vld [vmem:[%s2538_s20 + $0x104] ss:$16 sps:$4 sm:$0xff]  }
  0x26   : > { %1885 = vmatpush3.bf16.msra.mxu0 %v2164_v22  ;;  %v2224_v1 = vld [vmem:[%s2538_s20 + $0x10c] ss:$16 sps:$4 sm:$0xff]   ;;  %v2226_v2 = vld [vmem:[%s2538_s20 + $0x100] ss:$16 sps:$4 sm:$0xff]   ;;  %v2227_v3 = vld [vmem:[%s2538_s20 + $0x108] ss:$16 sps:$4 sm:$0xff]  }
  0x27   : > { %1997 = vmatpush3.bf16.msra.mxu1 %v2165_v23  ;;  %1886 = vmatprep.subr.bf16.mxu0 %v2166_v24  ;;  %v2228_v4 = vld [vmem:[%s2538_s20 + $0x124] ss:$16 sps:$4 sm:$0xff]   ;;  %v2230_v5 = vld [vmem:[%s2538_s20 + $0x12c] ss:$16 sps:$4 sm:$0xff]   ;;  %v2232_v6 = vld [vmem:[%s2538_s20 + $0x120] ss:$16 sps:$4 sm:$0xff]  }
  0x28   : > { %1998 = vmatprep.subr.bf16.mxu1 %v2167_v25  ;;  %v2233_v7 = vld [vmem:[%s2538_s20 + $0x128] ss:$16 sps:$4 sm:$0xff]   ;;  %v2234_v8 = vld [vmem:[%s2538_s20 + $0x144] ss:$16 sps:$4 sm:$0xff]   ;;  %v2236_v9 = vld [vmem:[%s2538_s20 + $0x14c] ss:$16 sps:$4 sm:$0xff]  }
  0x29   : > { %v2238_v10 = vld [vmem:[%s2538_s20 + $0x140] ss:$16 sps:$4 sm:$0xff]   ;;  %v2239_v11 = vld [vmem:[%s2538_s20 + $0x148] ss:$16 sps:$4 sm:$0xff]   ;;  %v2240_v12 = vld [vmem:[%s2538_s20 + $0x164] ss:$16 sps:$4 sm:$0xff]  }
  0x2a   : > { %1887 = vmatpush3.bf16.msra.mxu0 %v2168_v26  ;;  %v2242_v13 = vld [vmem:[%s2538_s20 + $0x16c] ss:$16 sps:$4 sm:$0xff]   ;;  %v2244_v14 = vld [vmem:[%s2538_s20 + $0x160] ss:$16 sps:$4 sm:$0xff]   ;;  %v2245_v15 = vld [vmem:[%s2538_s20 + $0x168] ss:$16 sps:$4 sm:$0xff]  }
  0x2b   : > { %1999 = vmatpush3.bf16.msra.mxu1 %v2169_v27  ;;  %1888 = vmatprep.subr.bf16.mxu0 %v2170_v28  ;;  %v2246_v16 = vld [vmem:[%s2538_s20 + $0x184] ss:$16 sps:$4 sm:$0xff]   ;;  %v2248_v17 = vld [vmem:[%s2538_s20 + $0x18c] ss:$16 sps:$4 sm:$0xff]   ;;  %v2250_v18 = vld [vmem:[%s2538_s20 + $0x180] ss:$16 sps:$4 sm:$0xff]  }
  0x2c   : > { %2000 = vmatprep.subr.bf16.mxu1 %v2171_v29  ;;  %v2251_v19 = vld [vmem:[%s2538_s20 + $0x188] ss:$16 sps:$4 sm:$0xff]   ;;  %v2252_v20 = vld [vmem:[%s2538_s20 + $0x1a4] ss:$16 sps:$4 sm:$0xff]   ;;  %v2254_v21 = vld [vmem:[%s2538_s20 + $0x1ac] ss:$16 sps:$4 sm:$0xff]  }
  0x2d   : > { %v2256_v22 = vld [vmem:[%s2538_s20 + $0x1a0] ss:$16 sps:$4 sm:$0xff]   ;;  %v2257_v23 = vld [vmem:[%s2538_s20 + $0x1a8] ss:$16 sps:$4 sm:$0xff]   ;;  %v2258_v24 = vld [vmem:[%s2538_s20 + $0x1c4] ss:$16 sps:$4 sm:$0xff]  }
  0x2e   : > { %1889 = vmatpush3.bf16.msra.mxu0 %v2172_v30  ;;  %v2260_v25 = vld [vmem:[%s2538_s20 + $0x1cc] ss:$16 sps:$4 sm:$0xff]   ;;  %v2262_v26 = vld [vmem:[%s2538_s20 + $0x1c0] ss:$16 sps:$4 sm:$0xff]   ;;  %v2263_v27 = vld [vmem:[%s2538_s20 + $0x1c8] ss:$16 sps:$4 sm:$0xff]  }
  0x2f   : > { %2001 = vmatpush3.bf16.msra.mxu1 %v2173_v31  ;;  %v2264_v28 = vld [vmem:[%s2538_s20 + $0x1e4] ss:$16 sps:$4 sm:$0xff]   ;;  %v2266_v29 = vld [vmem:[%s2538_s20 + $0x1ec] ss:$16 sps:$4 sm:$0xff]   ;;  %v2268_v30 = vld [vmem:[%s2538_s20 + $0x1e0] ss:$16 sps:$4 sm:$0xff]  }
  0x30   : > { %v2269_v31 = vld [vmem:[%s2538_s20 + $0x1e8] ss:$16 sps:$4 sm:$0xff]   ;;  %s1605_s8 = sshll.u32 %s2631_s22, 3  ;;  %s1450_s29 = scalar_lea.sflag [#allocation3], %s2631_s22 }
  0x31   : > { %899 = vmatmul.mubr.bf16.vlgmr.msra.gmra.mrb[0].mxu0 %v2174_v32  ;;  %s204_s10 = scalar_lea.vmem [#allocation2], %s1605_s8  ;;  %s2636_s12 = scalar_lea.vmem [#allocation4], %s1605_s8 }
  0x32   : > { %1060 = vmatmul.mubr.bf16.vlgmr.msra.gmra.mrb[0].mxu1 %v2177_v34  ;;  %906 = vmatprep.mubr.bf16.mxu0 %v2180_v36  ;;  %s1472_s11 = sshll.u32 %s204_s10, 4  ;;  %s1485_s13 = sshll.u32 %s2636_s12, 4  ;;  %s2644_s11 = int_to_ptr.vmem [resolvable:$true] %s1472_s11  ;;  %s2652_s13 = int_to_ptr.vmem [resolvable:$true] %s1485_s13 }
  0x33   : > { %1067 = vmatprep.mubr.bf16.mxu1 %v2182_v37  ;;  %s2270_s30 = scalar_lea.vmem %s2644_s11, 128  ;;  %s2276_s8 = scalar_lea.vmem %s2275_s6, 256 }
  0x34   : > { %p2271_p11 = scmp.ne.s32.totalorder %s2644_s11, %s2270_s30  ;;  %p2277_p0 = scmp.lt.s32.totalorder %s2644_s11, %s2275_s6 }
  0x35   : > { %p2278_p1 = scmp.lt.s32.totalorder %s2276_s8, %s2270_s30 }
  0x36   : > { %p2272_p12 = pnand %p2271_p11, %p2431_p5 }
  0x37   : > { %p2279_p2 = por %p2278_p1, %p2277_p0 }
  0x38   : > { %p2273_p13 = pneg %p2272_p12 }
  0x39   : > { %907 = vmatmul.mubr.bf16.gmra.mrb[4].mxu0 %v2184_v38 }
  0x3a   : > { %1068 = vmatmul.mubr.bf16.gmra.mrb[4].mxu1 %v2185_v39  ;;  %914 = vmatprep.mubr.bf16.mxu0 %v2186_v40  ;;  %p2280_p3 = pnand %p2279_p2, %p2273_p13 }
  0x3b   : > { %1075 = vmatprep.mubr.bf16.mxu1 %v2188_v41 }
  0x41   : > { %915 = vmatmul.mubr.bf16.gmra.mrb[8].mxu0 %v2190_v42 }
  0x42   : > { %1076 = vmatmul.mubr.bf16.gmra.mrb[8].mxu1 %v2191_v43  ;;  %922 = vmatprep.mubr.bf16.mxu0 %v2192_v44 }
  0x43   : > { %1083 = vmatprep.mubr.bf16.mxu1 %v2194_v45 }
  0x49   : > { %923 = vmatmul.mubr.bf16.gmra.mrb[12].mxu0 %v2196_v46 }
  0x4a   : > { %1084 = vmatmul.mubr.bf16.gmra.mrb[12].mxu1 %v2197_v47  ;;  %930 = vmatprep.mubr.bf16.mxu0 %v2198_v48 }
  0x4b   : > { %1091 = vmatprep.mubr.bf16.mxu1 %v2200_v49 }
  0x51   : > { %931 = vmatmul.mubr.bf16.gmra.mrb[16].mxu0 %v2202_v50 }
  0x52   : > { %1092 = vmatmul.mubr.bf16.gmra.mrb[16].mxu1 %v2203_v51  ;;  %938 = vmatprep.mubr.bf16.mxu0 %v2204_v52 }
  0x53   : > { %1099 = vmatprep.mubr.bf16.mxu1 %v2206_v53 }
  0x59   : > { %939 = vmatmul.mubr.bf16.gmra.mrb[20].mxu0 %v2208_v54 }
  0x5a   : > { %1100 = vmatmul.mubr.bf16.gmra.mrb[20].mxu1 %v2209_v55  ;;  %946 = vmatprep.mubr.bf16.mxu0 %v2210_v56 }
  0x5b   : > { %1107 = vmatprep.mubr.bf16.mxu1 %v2212_v57 }
  0x61   : > { %947 = vmatmul.mubr.bf16.gmra.mrb[24].mxu0 %v2214_v58 }
  0x62   : > { %1108 = vmatmul.mubr.bf16.gmra.mrb[24].mxu1 %v2215_v59  ;;  %954 = vmatprep.mubr.bf16.mxu0 %v2216_v60 }
  0x63   : > { %1115 = vmatprep.mubr.bf16.mxu1 %v2218_v61 }
  0x69   : > { %955 = vmatmul.mubr.bf16.gmra.mrb[28].mxu0 %v2220_v62 }
  0x6a   : > { %1116 = vmatmul.mubr.bf16.gmra.mrb[28].mxu1 %v2221_v63  ;;  %962 = vmatprep.mubr.bf16.mxu0 %v2222_v0 }
  0x6b   : > { %1123 = vmatprep.mubr.bf16.mxu1 %v2224_v1 }
  0x71   : > { %963 = vmatmul.mubr.bf16.gmra.mrb[32].mxu0 %v2226_v2 }
  0x72   : > { %1124 = vmatmul.mubr.bf16.gmra.mrb[32].mxu1 %v2227_v3  ;;  %970 = vmatprep.mubr.bf16.mxu0 %v2228_v4 }
  0x73   : > { %1131 = vmatprep.mubr.bf16.mxu1 %v2230_v5 }
  0x79   : > { %971 = vmatmul.mubr.bf16.gmra.mrb[36].mxu0 %v2232_v6 }
  0x7a   : > { %1132 = vmatmul.mubr.bf16.gmra.mrb[36].mxu1 %v2233_v7  ;;  %978 = vmatprep.mubr.bf16.mxu0 %v2234_v8 }
  0x7b   : > { %1139 = vmatprep.mubr.bf16.mxu1 %v2236_v9 }
  0x81   : > { %979 = vmatmul.mubr.bf16.gmra.mrb[40].mxu0 %v2238_v10 }
  0x82   : > { %1140 = vmatmul.mubr.bf16.gmra.mrb[40].mxu1 %v2239_v11  ;;  %986 = vmatprep.mubr.bf16.mxu0 %v2240_v12 }
  0x83   : > { %1147 = vmatprep.mubr.bf16.mxu1 %v2242_v13 }
  0x89   : > { %987 = vmatmul.mubr.bf16.gmra.mrb[44].mxu0 %v2244_v14 }
  0x8a   : > { %1148 = vmatmul.mubr.bf16.gmra.mrb[44].mxu1 %v2245_v15  ;;  %994 = vmatprep.mubr.bf16.mxu0 %v2246_v16 }
  0x8b   : > { %1155 = vmatprep.mubr.bf16.mxu1 %v2248_v17 }
  0x91   : > { %995 = vmatmul.mubr.bf16.gmra.mrb[48].mxu0 %v2250_v18 }
  0x92   : > { %1156 = vmatmul.mubr.bf16.gmra.mrb[48].mxu1 %v2251_v19  ;;  %1002 = vmatprep.mubr.bf16.mxu0 %v2252_v20 }
  0x93   : > { %1163 = vmatprep.mubr.bf16.mxu1 %v2254_v21 }
  0x99   : > { %1003 = vmatmul.mubr.bf16.gmra.mrb[52].mxu0 %v2256_v22 }
  0x9a   : > { %1164 = vmatmul.mubr.bf16.gmra.mrb[52].mxu1 %v2257_v23  ;;  %1010 = vmatprep.mubr.bf16.mxu0 %v2258_v24 }
  0x9b   : > { %1171 = vmatprep.mubr.bf16.mxu1 %v2260_v25 }
  0xa1   : > { %1011 = vmatmul.mubr.bf16.gmra.mrb[56].mxu0 %v2262_v26 }
  0xa2   : > { %1172 = vmatmul.mubr.bf16.gmra.mrb[56].mxu1 %v2263_v27  ;;  %1018 = vmatprep.mubr.bf16.mxu0 %v2264_v28 }
  0xa3   : > { %1179 = vmatprep.mubr.bf16.mxu1 %v2266_v29 }
  0xa9   : > { %1019 = vmatmul.mubr.bf16.gmra.mrb[60].mxu0 %v2268_v30 }
  0xaa   : > { %1180 = vmatmul.mubr.bf16.gmra.mrb[60].mxu1 %v2269_v31 }
 0x104   : > { %v1890_v32 = vpop.f32.mrb[0].mxu0 }
 0x105   : > { %v2002_v33 = vpop.f32.mrb[0].mxu1  ;;  %v1891_v34 = vpop.f32.mrb[1].mxu0 }
 0x106   : > { %v1892_v35 = vadd.f32 %v1891_v34, %v1890_v32  ;;  %v2003_v36 = vpop.f32.mrb[1].mxu1  ;;  %v1893_v37 = vpop.f32.mrb[2].mxu0 }
 0x107   : > { %v2004_v38 = vadd.f32 %v2003_v36, %v2002_v33  ;;  %v2005_v39 = vpop.f32.mrb[2].mxu1  ;;  %v1894_v40 = vpop.f32.mrb[3].mxu0 }
 0x108   : > { %v1895_v41 = vadd.f32 %v1894_v40, %v1893_v37  ;;  %v2006_v42 = vpop.f32.mrb[3].mxu1 }
 0x109   : > { %v1062_v43 = vadd.f32 %v2004_v38, %v1892_v35  ;;  %v2007_v44 = vadd.f32 %v2006_v42, %v2005_v39 }
 0x10b   : > { %v1065_v45 = vadd.f32 %v2007_v44, %v1895_v41  ;;  %v1348_v47 = vmul.f32 %v1062_v43, %v1062_v43 }
 0x10c   : > { %v1896_v46 = vpop.f32.mrb[4].mxu0 }
 0x10d   : > { %v1782_v48 = vpack.c.bf16 %v1065_v45, %v1062_v43  ;;  %v1349_v49 = vmul.f32 %v1065_v45, %v1065_v45  ;;  %v1380_v50 = vadd.f32 %v1065_v45, %v1062_v43  ;;  %v2008_v51 = vpop.f32.mrb[4].mxu1  ;;  %v1897_v52 = vpop.f32.mrb[5].mxu0 }
 0x10e   : > { %v1898_v53 = vadd.f32 %v1897_v52, %v1896_v46  ;;  %v2009_v54 = vpop.f32.mrb[5].mxu1  ;;  %v1899_v55 = vpop.f32.mrb[6].mxu0 }
 0x10f   : > { %1783 = vst [vmem:[%s2614_s7] sm:$0xff] %v1782_v48   ;;  %v1381_v56 = vadd.f32 %v1349_v49, %v1348_v47  ;;  %v2010_v57 = vadd.f32 %v2009_v54, %v2008_v51  ;;  %v2011_v58 = vpop.f32.mrb[6].mxu1  ;;  %v1900_v59 = vpop.f32.mrb[7].mxu0 }
 0x110   : > { %v1901_v60 = vadd.f32 %v1900_v59, %v1899_v55  ;;  %v2012_v61 = vpop.f32.mrb[7].mxu1 }
 0x111   : > { %v1070_v62 = vadd.f32 %v2010_v57, %v1898_v53  ;;  %v2013_v63 = vadd.f32 %v2012_v61, %v2011_v58 }
 0x113   : > { %v1350_v0 = vmul.f32 %v1070_v62, %v1070_v62  ;;  %v1382_v1 = vadd.f32 %v1380_v50, %v1070_v62  ;;  %v1073_v2 = vadd.f32 %v2013_v63, %v1901_v60 }
 0x114   : > { %v1902_v3 = vpop.f32.mrb[8].mxu0 }
 0x115   : > { %v1383_v4 = vadd.f32 %v1381_v56, %v1350_v0  ;;  %v1787_v5 = vpack.c.bf16 %v1073_v2, %v1070_v62  ;;  %v1351_v6 = vmul.f32 %v1073_v2, %v1073_v2  ;;  %v1384_v7 = vadd.f32 %v1382_v1, %v1073_v2  ;;  %v2014_v8 = vpop.f32.mrb[8].mxu1  ;;  %v1903_v9 = vpop.f32.mrb[9].mxu0 }
 0x116   : > { %v1904_v10 = vadd.f32 %v1903_v9, %v1902_v3  ;;  %v2015_v11 = vpop.f32.mrb[9].mxu1  ;;  %v1905_v12 = vpop.f32.mrb[10].mxu0 }
 0x117   : > { %1859 = vst [vmem:[%s2614_s7 + $0x8] sm:$0xff] %v1787_v5   ;;  %v1385_v13 = vadd.f32 %v1383_v4, %v1351_v6  ;;  %v2016_v14 = vadd.f32 %v2015_v11, %v2014_v8  ;;  %v2017_v15 = vpop.f32.mrb[10].mxu1  ;;  %v1906_v16 = vpop.f32.mrb[11].mxu0 }
 0x118   : > { %v1907_v17 = vadd.f32 %v1906_v16, %v1905_v12  ;;  %v2018_v18 = vpop.f32.mrb[11].mxu1 }
 0x119   : > { %v1078_v19 = vadd.f32 %v2016_v14, %v1904_v10  ;;  %v2019_v20 = vadd.f32 %v2018_v18, %v2017_v15 }
 0x11b   : > { %v1352_v21 = vmul.f32 %v1078_v19, %v1078_v19  ;;  %v1386_v22 = vadd.f32 %v1384_v7, %v1078_v19  ;;  %v1081_v23 = vadd.f32 %v2019_v20, %v1907_v17 }
 0x11c   : > { %v1908_v24 = vpop.f32.mrb[12].mxu0 }
 0x11d   : > { %v1387_v25 = vadd.f32 %v1385_v13, %v1352_v21  ;;  %v1792_v26 = vpack.c.bf16 %v1081_v23, %v1078_v19  ;;  %v1353_v27 = vmul.f32 %v1081_v23, %v1081_v23  ;;  %v1388_v28 = vadd.f32 %v1386_v22, %v1081_v23  ;;  %v2020_v29 = vpop.f32.mrb[12].mxu1  ;;  %v1909_v30 = vpop.f32.mrb[13].mxu0 }
 0x11e   : > { %v1910_v31 = vadd.f32 %v1909_v30, %v1908_v24  ;;  %v2021_v32 = vpop.f32.mrb[13].mxu1  ;;  %v1911_v33 = vpop.f32.mrb[14].mxu0 }
 0x11f   : > { %1860 = vst [vmem:[%s2614_s7 + $0x10] sm:$0xff] %v1792_v26   ;;  %v1389_v34 = vadd.f32 %v1387_v25, %v1353_v27  ;;  %v2022_v35 = vadd.f32 %v2021_v32, %v2020_v29  ;;  %v2023_v36 = vpop.f32.mrb[14].mxu1  ;;  %v1912_v37 = vpop.f32.mrb[15].mxu0 }
 0x120   : > { %v1913_v38 = vadd.f32 %v1912_v37, %v1911_v33  ;;  %v2024_v39 = vpop.f32.mrb[15].mxu1 }
 0x121   : > { %v1086_v40 = vadd.f32 %v2022_v35, %v1910_v31  ;;  %v2025_v41 = vadd.f32 %v2024_v39, %v2023_v36 }
 0x123   : > { %v1354_v42 = vmul.f32 %v1086_v40, %v1086_v40  ;;  %v1390_v43 = vadd.f32 %v1388_v28, %v1086_v40  ;;  %v1089_v44 = vadd.f32 %v2025_v41, %v1913_v38 }
 0x124   : > { %v1914_v45 = vpop.f32.mrb[16].mxu0 }
 0x125   : > { %v1391_v46 = vadd.f32 %v1389_v34, %v1354_v42  ;;  %v1797_v47 = vpack.c.bf16 %v1089_v44, %v1086_v40  ;;  %v1355_v48 = vmul.f32 %v1089_v44, %v1089_v44  ;;  %v1392_v49 = vadd.f32 %v1390_v43, %v1089_v44  ;;  %v2026_v50 = vpop.f32.mrb[16].mxu1  ;;  %v1915_v51 = vpop.f32.mrb[17].mxu0 }
 0x126   : > { %v1916_v52 = vadd.f32 %v1915_v51, %v1914_v45  ;;  %v2027_v53 = vpop.f32.mrb[17].mxu1  ;;  %v1917_v54 = vpop.f32.mrb[18].mxu0 }
 0x127   : > { %1861 = vst [vmem:[%s2614_s7 + $0x18] sm:$0xff] %v1797_v47   ;;  %v1393_v55 = vadd.f32 %v1391_v46, %v1355_v48  ;;  %v2028_v56 = vadd.f32 %v2027_v53, %v2026_v50  ;;  %v2029_v57 = vpop.f32.mrb[18].mxu1  ;;  %v1918_v58 = vpop.f32.mrb[19].mxu0 }
 0x128   : > { %v1919_v59 = vadd.f32 %v1918_v58, %v1917_v54  ;;  %v2030_v60 = vpop.f32.mrb[19].mxu1 }
 0x129   : > { %v1094_v61 = vadd.f32 %v2028_v56, %v1916_v52  ;;  %v2031_v62 = vadd.f32 %v2030_v60, %v2029_v57 }
 0x12b   : > { %v1356_v63 = vmul.f32 %v1094_v61, %v1094_v61  ;;  %v1394_v0 = vadd.f32 %v1392_v49, %v1094_v61  ;;  %v1097_v1 = vadd.f32 %v2031_v62, %v1919_v59 }
 0x12c   : > { %v1920_v2 = vpop.f32.mrb[20].mxu0 }
 0x12d   : > { %v1395_v3 = vadd.f32 %v1393_v55, %v1356_v63  ;;  %v1802_v4 = vpack.c.bf16 %v1097_v1, %v1094_v61  ;;  %v1357_v5 = vmul.f32 %v1097_v1, %v1097_v1  ;;  %v1396_v6 = vadd.f32 %v1394_v0, %v1097_v1  ;;  %v2032_v7 = vpop.f32.mrb[20].mxu1  ;;  %v1921_v8 = vpop.f32.mrb[21].mxu0 }
 0x12e   : > { %v1922_v9 = vadd.f32 %v1921_v8, %v1920_v2  ;;  %v2033_v10 = vpop.f32.mrb[21].mxu1  ;;  %v1923_v11 = vpop.f32.mrb[22].mxu0 }
 0x12f   : > { %1862 = vst [vmem:[%s2614_s7 + $0x20] sm:$0xff] %v1802_v4   ;;  %v1397_v12 = vadd.f32 %v1395_v3, %v1357_v5  ;;  %v2034_v13 = vadd.f32 %v2033_v10, %v2032_v7  ;;  %v2035_v14 = vpop.f32.mrb[22].mxu1  ;;  %v1924_v15 = vpop.f32.mrb[23].mxu0 }
 0x130   : > { %v1925_v16 = vadd.f32 %v1924_v15, %v1923_v11  ;;  %v2036_v17 = vpop.f32.mrb[23].mxu1 }
 0x131   : > { %v1102_v18 = vadd.f32 %v2034_v13, %v1922_v9  ;;  %v2037_v19 = vadd.f32 %v2036_v17, %v2035_v14 }
 0x133   : > { %v1358_v20 = vmul.f32 %v1102_v18, %v1102_v18  ;;  %v1398_v21 = vadd.f32 %v1396_v6, %v1102_v18  ;;  %v1105_v22 = vadd.f32 %v2037_v19, %v1925_v16 }
 0x134   : > { %v1926_v23 = vpop.f32.mrb[24].mxu0 }
 0x135   : > { %v1399_v24 = vadd.f32 %v1397_v12, %v1358_v20  ;;  %v1807_v25 = vpack.c.bf16 %v1105_v22, %v1102_v18  ;;  %v1359_v26 = vmul.f32 %v1105_v22, %v1105_v22  ;;  %v1400_v27 = vadd.f32 %v1398_v21, %v1105_v22  ;;  %v2038_v28 = vpop.f32.mrb[24].mxu1  ;;  %v1927_v29 = vpop.f32.mrb[25].mxu0 }
 0x136   : > { %v1928_v30 = vadd.f32 %v1927_v29, %v1926_v23  ;;  %v2039_v31 = vpop.f32.mrb[25].mxu1  ;;  %v1929_v32 = vpop.f32.mrb[26].mxu0 }
 0x137   : > { %1863 = vst [vmem:[%s2614_s7 + $0x28] sm:$0xff] %v1807_v25   ;;  %v1401_v33 = vadd.f32 %v1399_v24, %v1359_v26  ;;  %v2040_v34 = vadd.f32 %v2039_v31, %v2038_v28  ;;  %v2041_v35 = vpop.f32.mrb[26].mxu1  ;;  %v1930_v36 = vpop.f32.mrb[27].mxu0 }
 0x138   : > { %v1931_v37 = vadd.f32 %v1930_v36, %v1929_v32  ;;  %v2042_v38 = vpop.f32.mrb[27].mxu1 }
 0x139   : > { %v1110_v39 = vadd.f32 %v2040_v34, %v1928_v30  ;;  %v2043_v40 = vadd.f32 %v2042_v38, %v2041_v35 }
 0x13b   : > { %v1360_v41 = vmul.f32 %v1110_v39, %v1110_v39  ;;  %v1402_v42 = vadd.f32 %v1400_v27, %v1110_v39  ;;  %v1113_v43 = vadd.f32 %v2043_v40, %v1931_v37 }
 0x13c   : > { %v1932_v44 = vpop.f32.mrb[28].mxu0 }
 0x13d   : > { %v1403_v45 = vadd.f32 %v1401_v33, %v1360_v41  ;;  %v1812_v46 = vpack.c.bf16 %v1113_v43, %v1110_v39  ;;  %v1361_v47 = vmul.f32 %v1113_v43, %v1113_v43  ;;  %v1404_v48 = vadd.f32 %v1402_v42, %v1113_v43  ;;  %v2044_v49 = vpop.f32.mrb[28].mxu1  ;;  %v1933_v50 = vpop.f32.mrb[29].mxu0 }
 0x13e   : > { %v1934_v51 = vadd.f32 %v1933_v50, %v1932_v44  ;;  %v2045_v52 = vpop.f32.mrb[29].mxu1  ;;  %v1935_v53 = vpop.f32.mrb[30].mxu0 }
 0x13f   : > { %1864 = vst [vmem:[%s2614_s7 + $0x30] sm:$0xff] %v1812_v46   ;;  %v1405_v54 = vadd.f32 %v1403_v45, %v1361_v47  ;;  %v2046_v55 = vadd.f32 %v2045_v52, %v2044_v49  ;;  %v2047_v56 = vpop.f32.mrb[30].mxu1  ;;  %v1936_v57 = vpop.f32.mrb[31].mxu0 }
 0x140   : > { %v1937_v58 = vadd.f32 %v1936_v57, %v1935_v53  ;;  %v2048_v59 = vpop.f32.mrb[31].mxu1 }
 0x141   : > { %v1118_v60 = vadd.f32 %v2046_v55, %v1934_v51  ;;  %v2049_v61 = vadd.f32 %v2048_v59, %v2047_v56 }
 0x143   : > { %v1362_v62 = vmul.f32 %v1118_v60, %v1118_v60  ;;  %v1406_v63 = vadd.f32 %v1404_v48, %v1118_v60  ;;  %v1121_v0 = vadd.f32 %v2049_v61, %v1937_v58 }
 0x144   : > { %v1938_v1 = vpop.f32.mrb[32].mxu0 }
 0x145   : > { %v1407_v2 = vadd.f32 %v1405_v54, %v1362_v62  ;;  %v1817_v3 = vpack.c.bf16 %v1121_v0, %v1118_v60  ;;  %v1363_v4 = vmul.f32 %v1121_v0, %v1121_v0  ;;  %v1408_v5 = vadd.f32 %v1406_v63, %v1121_v0  ;;  %v2050_v6 = vpop.f32.mrb[32].mxu1  ;;  %v1939_v7 = vpop.f32.mrb[33].mxu0 }
 0x146   : > { %v1940_v8 = vadd.f32 %v1939_v7, %v1938_v1  ;;  %v2051_v9 = vpop.f32.mrb[33].mxu1  ;;  %v1941_v10 = vpop.f32.mrb[34].mxu0 }
 0x147   : > { %1865 = vst [vmem:[%s2614_s7 + $0x38] sm:$0xff] %v1817_v3   ;;  %v1409_v11 = vadd.f32 %v1407_v2, %v1363_v4  ;;  %v2052_v12 = vadd.f32 %v2051_v9, %v2050_v6  ;;  %v2053_v13 = vpop.f32.mrb[34].mxu1  ;;  %v1942_v14 = vpop.f32.mrb[35].mxu0 }
 0x148   : > { %v1943_v15 = vadd.f32 %v1942_v14, %v1941_v10  ;;  %v2054_v16 = vpop.f32.mrb[35].mxu1 }
 0x149   : > { %v1126_v17 = vadd.f32 %v2052_v12, %v1940_v8  ;;  %v2055_v18 = vadd.f32 %v2054_v16, %v2053_v13 }
 0x14b   : > { %v1364_v19 = vmul.f32 %v1126_v17, %v1126_v17  ;;  %v1410_v20 = vadd.f32 %v1408_v5, %v1126_v17  ;;  %v1129_v21 = vadd.f32 %v2055_v18, %v1943_v15 }
 0x14c   : > { %v1944_v22 = vpop.f32.mrb[36].mxu0 }
 0x14d   : > { %v1411_v23 = vadd.f32 %v1409_v11, %v1364_v19  ;;  %v1822_v24 = vpack.c.bf16 %v1129_v21, %v1126_v17  ;;  %v1365_v25 = vmul.f32 %v1129_v21, %v1129_v21  ;;  %v1412_v26 = vadd.f32 %v1410_v20, %v1129_v21  ;;  %v2056_v27 = vpop.f32.mrb[36].mxu1  ;;  %v1945_v28 = vpop.f32.mrb[37].mxu0 }
 0x14e   : > { %v1946_v29 = vadd.f32 %v1945_v28, %v1944_v22  ;;  %v2057_v30 = vpop.f32.mrb[37].mxu1  ;;  %v1947_v31 = vpop.f32.mrb[38].mxu0 }
 0x14f   : > { %1866 = vst [vmem:[%s2614_s7 + $0x40] sm:$0xff] %v1822_v24   ;;  %v1413_v32 = vadd.f32 %v1411_v23, %v1365_v25  ;;  %v2058_v33 = vadd.f32 %v2057_v30, %v2056_v27  ;;  %v2059_v34 = vpop.f32.mrb[38].mxu1  ;;  %v1948_v35 = vpop.f32.mrb[39].mxu0 }
 0x150   : > { %v1949_v36 = vadd.f32 %v1948_v35, %v1947_v31  ;;  %v2060_v37 = vpop.f32.mrb[39].mxu1 }
 0x151   : > { %v1134_v38 = vadd.f32 %v2058_v33, %v1946_v29  ;;  %v2061_v39 = vadd.f32 %v2060_v37, %v2059_v34 }
 0x153   : > { %v1366_v40 = vmul.f32 %v1134_v38, %v1134_v38  ;;  %v1414_v41 = vadd.f32 %v1412_v26, %v1134_v38  ;;  %v1137_v42 = vadd.f32 %v2061_v39, %v1949_v36 }
 0x154   : > { %v1950_v43 = vpop.f32.mrb[40].mxu0 }
 0x155   : > { %v1415_v44 = vadd.f32 %v1413_v32, %v1366_v40  ;;  %v1827_v45 = vpack.c.bf16 %v1137_v42, %v1134_v38  ;;  %v1367_v46 = vmul.f32 %v1137_v42, %v1137_v42  ;;  %v1416_v47 = vadd.f32 %v1414_v41, %v1137_v42  ;;  %v2062_v48 = vpop.f32.mrb[40].mxu1  ;;  %v1951_v49 = vpop.f32.mrb[41].mxu0 }
 0x156   : > { %v1952_v50 = vadd.f32 %v1951_v49, %v1950_v43  ;;  %v2063_v51 = vpop.f32.mrb[41].mxu1  ;;  %v1953_v52 = vpop.f32.mrb[42].mxu0 }
 0x157   : > { %1867 = vst [vmem:[%s2614_s7 + $0x48] sm:$0xff] %v1827_v45   ;;  %v1417_v53 = vadd.f32 %v1415_v44, %v1367_v46  ;;  %v2064_v54 = vadd.f32 %v2063_v51, %v2062_v48  ;;  %v2065_v55 = vpop.f32.mrb[42].mxu1  ;;  %v1954_v56 = vpop.f32.mrb[43].mxu0 }
 0x158   : > { %v1955_v57 = vadd.f32 %v1954_v56, %v1953_v52  ;;  %v2066_v58 = vpop.f32.mrb[43].mxu1 }
 0x159   : > { %v1142_v59 = vadd.f32 %v2064_v54, %v1952_v50  ;;  %v2067_v60 = vadd.f32 %v2066_v58, %v2065_v55 }
 0x15b   : > { %v1368_v61 = vmul.f32 %v1142_v59, %v1142_v59  ;;  %v1418_v62 = vadd.f32 %v1416_v47, %v1142_v59  ;;  %v1145_v63 = vadd.f32 %v2067_v60, %v1955_v57 }
 0x15c   : > { %v1956_v0 = vpop.f32.mrb[44].mxu0 }
 0x15d   : > { %v1419_v1 = vadd.f32 %v1417_v53, %v1368_v61  ;;  %v1832_v2 = vpack.c.bf16 %v1145_v63, %v1142_v59  ;;  %v1369_v3 = vmul.f32 %v1145_v63, %v1145_v63  ;;  %v1420_v4 = vadd.f32 %v1418_v62, %v1145_v63  ;;  %v2068_v5 = vpop.f32.mrb[44].mxu1  ;;  %v1957_v6 = vpop.f32.mrb[45].mxu0 }
 0x15e   : > { %v1958_v7 = vadd.f32 %v1957_v6, %v1956_v0  ;;  %v2069_v8 = vpop.f32.mrb[45].mxu1  ;;  %v1959_v9 = vpop.f32.mrb[46].mxu0 }
 0x15f   : > { %1868 = vst [vmem:[%s2614_s7 + $0x50] sm:$0xff] %v1832_v2   ;;  %v1421_v10 = vadd.f32 %v1419_v1, %v1369_v3  ;;  %v2070_v11 = vadd.f32 %v2069_v8, %v2068_v5  ;;  %v2071_v12 = vpop.f32.mrb[46].mxu1  ;;  %v1960_v13 = vpop.f32.mrb[47].mxu0 }
 0x160   : > { %v1961_v14 = vadd.f32 %v1960_v13, %v1959_v9  ;;  %v2072_v15 = vpop.f32.mrb[47].mxu1 }
 0x161   : > { %v1150_v16 = vadd.f32 %v2070_v11, %v1958_v7  ;;  %v2073_v17 = vadd.f32 %v2072_v15, %v2071_v12 }
 0x163   : > { %v1370_v18 = vmul.f32 %v1150_v16, %v1150_v16  ;;  %v1422_v19 = vadd.f32 %v1420_v4, %v1150_v16  ;;  %v1153_v20 = vadd.f32 %v2073_v17, %v1961_v14 }
 0x164   : > { %v1962_v21 = vpop.f32.mrb[48].mxu0 }
 0x165   : > { %v1423_v22 = vadd.f32 %v1421_v10, %v1370_v18  ;;  %v1837_v23 = vpack.c.bf16 %v1153_v20, %v1150_v16  ;;  %v1371_v24 = vmul.f32 %v1153_v20, %v1153_v20  ;;  %v1424_v25 = vadd.f32 %v1422_v19, %v1153_v20  ;;  %v2074_v26 = vpop.f32.mrb[48].mxu1  ;;  %v1963_v27 = vpop.f32.mrb[49].mxu0 }
 0x166   : > { %v1964_v28 = vadd.f32 %v1963_v27, %v1962_v21  ;;  %v2075_v29 = vpop.f32.mrb[49].mxu1  ;;  %v1965_v30 = vpop.f32.mrb[50].mxu0 }
 0x167   : > { %1869 = vst [vmem:[%s2614_s7 + $0x58] sm:$0xff] %v1837_v23   ;;  %v1425_v31 = vadd.f32 %v1423_v22, %v1371_v24  ;;  %v2076_v32 = vadd.f32 %v2075_v29, %v2074_v26  ;;  %v2077_v33 = vpop.f32.mrb[50].mxu1  ;;  %v1966_v34 = vpop.f32.mrb[51].mxu0 }
 0x168   : > { %v1967_v35 = vadd.f32 %v1966_v34, %v1965_v30  ;;  %v2078_v36 = vpop.f32.mrb[51].mxu1 }
 0x169   : > { %v1158_v37 = vadd.f32 %v2076_v32, %v1964_v28  ;;  %v2079_v38 = vadd.f32 %v2078_v36, %v2077_v33 }
 0x16b   : > { %v1372_v39 = vmul.f32 %v1158_v37, %v1158_v37  ;;  %v1426_v40 = vadd.f32 %v1424_v25, %v1158_v37  ;;  %v1161_v41 = vadd.f32 %v2079_v38, %v1967_v35 }
 0x16c   : > { %v1968_v42 = vpop.f32.mrb[52].mxu0 }
 0x16d   : > { %v1427_v43 = vadd.f32 %v1425_v31, %v1372_v39  ;;  %v1842_v44 = vpack.c.bf16 %v1161_v41, %v1158_v37  ;;  %v1373_v45 = vmul.f32 %v1161_v41, %v1161_v41  ;;  %v1428_v46 = vadd.f32 %v1426_v40, %v1161_v41  ;;  %v2080_v47 = vpop.f32.mrb[52].mxu1  ;;  %v1969_v48 = vpop.f32.mrb[53].mxu0 }
 0x16e   : > { %v1970_v49 = vadd.f32 %v1969_v48, %v1968_v42  ;;  %v2081_v50 = vpop.f32.mrb[53].mxu1  ;;  %v1971_v51 = vpop.f32.mrb[54].mxu0 }
 0x16f   : > { %1870 = vst [vmem:[%s2614_s7 + $0x60] sm:$0xff] %v1842_v44   ;;  %v1429_v52 = vadd.f32 %v1427_v43, %v1373_v45  ;;  %v2082_v53 = vadd.f32 %v2081_v50, %v2080_v47  ;;  %v2083_v54 = vpop.f32.mrb[54].mxu1  ;;  %v1972_v55 = vpop.f32.mrb[55].mxu0 }
 0x170   : > { %v1973_v56 = vadd.f32 %v1972_v55, %v1971_v51  ;;  %v2084_v57 = vpop.f32.mrb[55].mxu1 }
 0x171   : > { %v1166_v58 = vadd.f32 %v2082_v53, %v1970_v49  ;;  %v2085_v59 = vadd.f32 %v2084_v57, %v2083_v54 }
 0x173   : > { %v1374_v60 = vmul.f32 %v1166_v58, %v1166_v58  ;;  %v1430_v61 = vadd.f32 %v1428_v46, %v1166_v58  ;;  %v1169_v62 = vadd.f32 %v2085_v59, %v1973_v56 }
 0x174   : > { %v1974_v63 = vpop.f32.mrb[56].mxu0 }
 0x175   : > { %v1431_v0 = vadd.f32 %v1429_v52, %v1374_v60  ;;  %v1847_v1 = vpack.c.bf16 %v1169_v62, %v1166_v58  ;;  %v1375_v2 = vmul.f32 %v1169_v62, %v1169_v62  ;;  %v1432_v3 = vadd.f32 %v1430_v61, %v1169_v62  ;;  %v2086_v4 = vpop.f32.mrb[56].mxu1  ;;  %v1975_v5 = vpop.f32.mrb[57].mxu0 }
 0x176   : > { %v1976_v6 = vadd.f32 %v1975_v5, %v1974_v63  ;;  %v2087_v7 = vpop.f32.mrb[57].mxu1  ;;  %v1977_v8 = vpop.f32.mrb[58].mxu0 }
 0x177   : > { %1871 = vst [vmem:[%s2614_s7 + $0x68] sm:$0xff] %v1847_v1   ;;  %v1433_v9 = vadd.f32 %v1431_v0, %v1375_v2  ;;  %v2088_v10 = vadd.f32 %v2087_v7, %v2086_v4  ;;  %v2089_v11 = vpop.f32.mrb[58].mxu1  ;;  %v1978_v12 = vpop.f32.mrb[59].mxu0 }
 0x178   : > { %v1979_v13 = vadd.f32 %v1978_v12, %v1977_v8  ;;  %v2090_v14 = vpop.f32.mrb[59].mxu1 }
 0x179   : > { %v1174_v15 = vadd.f32 %v2088_v10, %v1976_v6  ;;  %v2091_v16 = vadd.f32 %v2090_v14, %v2089_v11 }
 0x17b   : > { %v1376_v17 = vmul.f32 %v1174_v15, %v1174_v15  ;;  %v1434_v18 = vadd.f32 %v1432_v3, %v1174_v15  ;;  %v1177_v19 = vadd.f32 %v2091_v16, %v1979_v13 }
 0x17c   : > { %v1980_v20 = vpop.f32.mrb[60].mxu0 }
 0x17d   : > { %v1435_v21 = vadd.f32 %v1433_v9, %v1376_v17  ;;  %v1852_v22 = vpack.c.bf16 %v1177_v19, %v1174_v15  ;;  %v1377_v23 = vmul.f32 %v1177_v19, %v1177_v19  ;;  %v1436_v24 = vadd.f32 %v1434_v18, %v1177_v19  ;;  %v2092_v25 = vpop.f32.mrb[60].mxu1  ;;  %v1981_v26 = vpop.f32.mrb[61].mxu0 }
 0x17e   : > { %v1982_v27 = vadd.f32 %v1981_v26, %v1980_v20  ;;  %v2093_v28 = vpop.f32.mrb[61].mxu1  ;;  %v1983_v29 = vpop.f32.mrb[62].mxu0 }
 0x17f   : > { %1872 = vst [vmem:[%s2614_s7 + $0x70] sm:$0xff] %v1852_v22   ;;  %v1437_v30 = vadd.f32 %v1435_v21, %v1377_v23  ;;  %v2094_v31 = vadd.f32 %v2093_v28, %v2092_v25  ;;  %v2095_v32 = vpop.f32.mrb[62].mxu1  ;;  %v1984_v33 = vpop.f32.mrb[63].mxu0 }
 0x180   : > { %v1985_v34 = vadd.f32 %v1984_v33, %v1983_v29  ;;  %v2096_v35 = vpop.f32.mrb[63].mxu1 }
 0x181   : > { %v1182_v36 = vadd.f32 %v2094_v31, %v1982_v27  ;;  %v2097_v37 = vadd.f32 %v2096_v35, %v2095_v32 }
 0x183   : > { %v1378_v38 = vmul.f32 %v1182_v36, %v1182_v36  ;;  %v1438_v39 = vadd.f32 %v1436_v24, %v1182_v36  ;;  %v1185_v40 = vadd.f32 %v2097_v37, %v1985_v34 }
 0x185   : > { %v1857_v41 = vpack.c.bf16 %v1185_v40, %v1182_v36  ;;  %v1379_v42 = vmul.f32 %v1185_v40, %v1185_v40  ;;  %v1440_v43 = vadd.f32 %v1438_v39, %v1185_v40  ;;  %v1439_v44 = vadd.f32 %v1437_v30, %v1378_v38 }
 0x187   : > { %1873 = vst [vmem:[%s2614_s7 + $0x78] sm:$0xff] %v1857_v41   ;;  %1442 = vst [vmem:[%s204_s10] sm:$0xff] %v1440_v43  ;;  %v1441_v45 = vadd.f32 %v1439_v44, %v1379_v42 }
 0x188   : > { %2283 = shalt.err (!%p2280_p3)
}
 0x189   : > { %s2284_s7 = scalar_lea.hbm %s2642_s23, 128  ;;  %s2288_s14 = scalar_lea.hbm %s2719_s3, 256 }
 0x18a   : > { %p2285_p4 = scmp.ne.s32.totalorder %s2642_s23, %s2284_s7  ;;  %p2289_p9 = scmp.lt.u32.totalorder %s2642_s23, %s2719_s3 }
 0x18b   : > { %p2290_p10 = scmp.lt.u32.totalorder %s2288_s14, %s2284_s7  ;;  %p2292_p12 = scmp.lt.u32.totalorder %s2284_s7, %s2642_s23 }
 0x18c   : > { %p2286_p7 = pnand %p2285_p4, %p2431_p5 }
 0x18d   : > { %p2291_p11 = por %p2290_p10, %p2289_p9 }
 0x18e   : > { %p2287_p8 = pneg %p2286_p7 }
 0x18f   : > { %p2293_p13 = por %p2292_p12, %p2291_p11 }
 0x191   : > { %p2294_p0 = pnand %p2293_p13, %p2287_p8 }
 0x193   : > { %2297 = shalt.err (!%p2294_p0)
}
 0x194   : > { %2098 = dma.vmem_to_hbm [thread:$0]  (%p2431_p5), %s2644_s11, 128, %s2642_s23, %s1450_s29   ;;  %1443 = vst [vmem:[%s2636_s12] sm:$0xff] %v1441_v45 }
 0x195   : > { %s1455_s27 = scalar_lea.sflag [#allocation5], %s2631_s22  ;;  %s2298_s30 = scalar_lea.vmem %s2652_s13, 128 }
 0x196   : > { %p2299_p1 = scmp.ne.s32.totalorder %s2652_s13, %s2298_s30  ;;  %s2367_s5 = smov [#allocation4]  }
 0x197   : > { %s2302_s6 = sshll.u32 %s2367_s5, 4  ;;  %s2303_s6 = int_to_ptr.vmem [resolvable:$false] %s2302_s6 }
 0x198   : > { %p2300_p2 = pnand %p2299_p1, %p2431_p5  ;;  %s2304_s8 = scalar_lea.vmem %s2303_s6, 256 }
 0x199   : > { %p2305_p4 = scmp.lt.s32.totalorder %s2652_s13, %s2303_s6  ;;  %p2306_p7 = scmp.lt.s32.totalorder %s2304_s8, %s2298_s30 }
 0x19a   : > { %p2301_p3 = pneg %p2300_p2 }
 0x19b   : > { %p2307_p8 = por %p2306_p7, %p2305_p4 }
 0x19d   : > { %p2308_p9 = pnand %p2307_p8, %p2301_p3 }
 0x19f   : > { %2311 = shalt.err (!%p2308_p9)
}
 0x1a0   : > { %s2312_s22 = scalar_lea.hbm %s2650_s28, 128  ;;  %s2316_s23 = scalar_lea.hbm %s2720_s4, 256 }
 0x1a1   : > { %p2313_p10 = scmp.ne.s32.totalorder %s2650_s28, %s2312_s22  ;;  %p2317_p13 = scmp.lt.u32.totalorder %s2650_s28, %s2720_s4 }
 0x1a2   : > { %p2318_p0 = scmp.lt.u32.totalorder %s2316_s23, %s2312_s22  ;;  %p2320_p2 = scmp.lt.u32.totalorder %s2312_s22, %s2650_s28 }
 0x1a3   : > { %p2314_p11 = pnand %p2313_p10, %p2431_p5 }
 0x1a4   : > { %p2319_p1 = por %p2318_p0, %p2317_p13 }
 0x1a5   : > { %p2315_p12 = pneg %p2314_p11 }
 0x1a6   : > { %p2321_p3 = por %p2320_p2, %p2319_p1 }
 0x1a8   : > { %p2322_p4 = pnand %p2321_p3, %p2315_p12 }
 0x1aa   : > { %2325 = shalt.err (!%p2322_p4)
}
 0x1ab   : > { %2099 = dma.vmem_to_hbm [thread:$0]  (%p2431_p5), %s2652_s13, 128, %s2650_s28, %s1455_s27  }
 0x1ac PF: > { %p2109_p7 = scmp.ge.s32.totalorder %s2364_s18, 2  ;;  %s1505_s9 = sand.u32 1, %s2352_s15  }
 0x1ad   : > { %s1506_s10 = scalar_lea.sflag [#allocation3], %s1505_s9 }
 0x1ae   : > { %p2103_p8 = pnand %p2109_p7, %p2435_p6 }
 0x1b0   : > { %2343 = dma.done.wait (!%p2103_p8), %s1506_s10, 128  }
 0x1b1   : > { %2345 = vsyncadd (!%p2103_p8), %s1506_s10, 4294967168  ;;  %s1515_s14 = scalar_lea.sflag [#allocation5], %s1505_s9 }
 0x1b2   : > { %2347 = dma.done.wait (!%p2103_p8), %s1515_s14, 128  }
 0x1b3   : > { %2349 = vsyncadd (!%p2103_p8), %s1515_s14, 4294967168  ;;  %p18_p5 = scmp.ge.s32.totalorder %s2418_s21, 4   ;;  %s2723_s15 = smov %s2356_s16 }
 0x1b4   : > { %s2724_s16 = smov %s2360_s17  ;;  %s2725_s17 = smov %s2429_s24 }
 0x1b5   : > { %s2726_s18 = smov %s2418_s21  ;;  %20 = sbr.rel (!%p18_p5) target bundleno = 5 (0x5), region = 92 }
 0x1bc   :  { %1520 = vsyncpa [#allocation3], 1 }
 0x1bd   :  { %1522 = vsyncpa [#allocation3 + $0x1], 1 }
 0x1be   :  { %1523 = vsyncpa [#allocation5], 1 }
 0x1bf   :  { %1525 = vsyncpa [#allocation5 + $0x1], 1 }

</bundles_post_ra>
